<compile_context>
chip_gen: v6e
topology: v6e:2x2x1
jax: 0.10.0
libtpu: 0.0.40
codegen_flags: <defaults>
</compile_context>

<pallas_src>
import jax
import jax.numpy as jnp
from jax import lax
from jax.experimental import pallas as pl
from jax.experimental.pallas import tpu as pltpu


def _row_tile(rows, tmax=1024):
    """Whole-slab row block when small (one grid step, ~zero per-step overhead);
    otherwise the largest power-of-two tile <= tmax dividing `rows` (keeps >=2
    'parallel' row blocks on the bigger slabs for v7x's two TensorCores)."""
    if rows <= tmax:
        return rows
    for t in (1024, 512, 256, 128, 64, 32, 16, 8):
        if t <= tmax and rows % t == 0:
            return t
    return rows


def _pad_lanes(x, mult=128):
    """Zero-pad the last axis to a multiple of `mult` (fused into slab construction
    so the matmul contraction dim is lane-aligned; outputs stay unpadded)."""
    pad = (-x.shape[-1]) % mult
    if pad == 0:
        return x
    return jnp.pad(x, [(0, 0)] * (x.ndim - 1) + [(0, pad)])


# ----------------------------- Pallas kernels ------------------------------

def _mm_stats_kernel(a_ref, b_ref, y_ref, st_ref):
    """One row tile of Y = A @ B plus per-column sum / sum-of-squares partials
    (rows 0 and 1 of the 8-row stats block) for fused BatchNorm statistics."""
    y = jnp.dot(a_ref[...], b_ref[...], preferred_element_type=jnp.float32)
    y_ref[...] = y
    s = jnp.sum(y, axis=0, keepdims=True)
    sq = jnp.sum(y * y, axis=0, keepdims=True)
    row = lax.broadcasted_iota(jnp.int32, st_ref.shape, 0)
    st_ref[...] = jnp.where(row == 0, s, jnp.where(row == 1, sq, 0.0))


def pallas_matmul_stats(a, b):
    """(M,K) @ (K,N) -> (M,N) f32 plus per-column (sum, sumsq) reduced over rows."""
    M, K = a.shape
    N = b.shape[1]
    tm = _row_tile(M)
    nt = M // tm
    y, st = pl.pallas_call(
        _mm_stats_kernel,
        out_shape=(jax.ShapeDtypeStruct((M, N), jnp.float32),
                   jax.ShapeDtypeStruct((nt * 8, N), jnp.float32)),
        grid=(nt,),
        in_specs=[pl.BlockSpec((tm, K), lambda i: (i, 0)),
                  pl.BlockSpec((K, N), lambda i: (0, 0))],
        out_specs=(pl.BlockSpec((tm, N), lambda i: (i, 0)),
                   pl.BlockSpec((8, N), lambda i: (i, 0))),
        compiler_params=pltpu.CompilerParams(dimension_semantics=("parallel",)),
    )(a.astype(jnp.float32), b.astype(jnp.float32))
    st = st.reshape(nt, 8, N)
    return y, jnp.sum(st[:, 0, :], axis=0), jnp.sum(st[:, 1, :], axis=0)


def _mm_tanh_kernel(a_ref, b_ref, o_ref):
    o_ref[...] = jnp.tanh(jnp.dot(a_ref[...], b_ref[...],
                                  preferred_element_type=jnp.float32))


def pallas_matmul_tanh(a, b):
    """(M,K) @ (K,N) with tanh fused into the store (final layer epilogue)."""
    M, K = a.shape
    N = b.shape[1]
    tm = _row_tile(M)
    return pl.pallas_call(
        _mm_tanh_kernel,
        out_shape=jax.ShapeDtypeStruct((M, N), jnp.float32),
        grid=(M // tm,),
        in_specs=[pl.BlockSpec((tm, K), lambda i: (i, 0)),
                  pl.BlockSpec((K, N), lambda i: (0, 0))],
        out_specs=pl.BlockSpec((tm, N), lambda i: (i, 0)),
        compiler_params=pltpu.CompilerParams(dimension_semantics=("parallel",)),
    )(a.astype(jnp.float32), b.astype(jnp.float32))


def _affine_relu_kernel(x_ref, sc_ref, sh_ref, o_ref):
    o_ref[...] = jnp.maximum(x_ref[...] * sc_ref[...] + sh_ref[...], 0.0)


def pallas_affine_relu(x, scale, shift):
    """Per-lane scale*x + shift then ReLU on a lane-dense (M, N) slab."""
    M, N = x.shape
    tm = _row_tile(M)
    return pl.pallas_call(
        _affine_relu_kernel,
        out_shape=jax.ShapeDtypeStruct((M, N), jnp.float32),
        grid=(M // tm,),
        in_specs=[pl.BlockSpec((tm, N), lambda i: (i, 0)),
                  pl.BlockSpec((1, N), lambda i: (0, 0)),
                  pl.BlockSpec((1, N), lambda i: (0, 0))],
        out_specs=pl.BlockSpec((tm, N), lambda i: (i, 0)),
        compiler_params=pltpu.CompilerParams(dimension_semantics=("parallel",)),
    )(x, scale, shift)


# --------------------- conv-transpose-as-matmul (glue) ---------------------
# ConvTranspose2d(k=4, s=2, p=1): output row p = 2*i - 1 + kh.
#   sub-row dp=0 (even): padded input rows {i, i+1}, kernel taps kh in {3, 1}
#   sub-row dp=1 (odd) : padded input rows {i+1, i+2}, kernel taps kh in {2, 0}
_KTAB = ((3, 1), (2, 0))


def _pack_w_s2(w):
    """(Cin, Cout, 4, 4) -> (pad128(9*Cin), 4*Cout) weight for the merged 3x3
    im2col matmul; N lane-packs the 2x2 sub-pixel grid with Cout (dp, dq, c)."""
    cin, cout = w.shape[0], w.shape[1]
    zero = jnp.zeros((cin, cout), w.dtype)
    rows = []
    for r in range(3):
        for s in range(3):
            blk = []
            for dp in (0, 1):
                for dq in (0, 1):
                    a, c = r - dp, s - dq
                    if a in (0, 1) and c in (0, 1):
                        blk.append(w[:, :, _KTAB[dp][a], _KTAB[dq][c]])
                    else:
                        blk.append(zero)
            rows.append(jnp.concatenate(blk, axis=1))        # (Cin, 4*Cout)
    wm = jnp.concatenate(rows, axis=0)                       # (9*Cin, 4*Cout)
    kpad = (-wm.shape[0]) % 128
    return jnp.pad(wm, ((0, kpad), (0, 0))) if kpad else wm


def _im2col3x3(x):
    """NHWC -> (B*H*W, pad128(9*C)) slab of 3x3 neighborhoods of the 1-padded input."""
    B, H, W, C = x.shape
    xp = jnp.pad(x, ((0, 0), (1, 1), (1, 1), (0, 0)))
    cols = [xp[:, r:r + H, s:s + W, :] for r in range(3) for s in range(3)]
    a = _pad_lanes(jnp.concatenate(cols, axis=-1))
    return a.reshape(B * H * W, a.shape[-1])


def _subpixel_to_nhwc(y, B, H, W, C):
    """(B*H*W, 4*C) with columns (dp, dq, c) -> NHWC (B, 2H, 2W, C)."""
    return (y.reshape(B, H, W, 2, 2, C)
             .transpose(0, 1, 3, 2, 4, 5)
             .reshape(B, 2 * H, 2 * W, C))


def _bn_scale_shift(col_sum, col_sq, n, gamma, beta, eps=1e-5):
    """BatchNorm2d training-mode stats (biased variance, PyTorch normalization)."""
    mean = col_sum / n
    var = col_sq / n - mean * mean  # E[x^2]-mean^2; fine at these scales
    scale = gamma * lax.rsqrt(var + eps)
    return scale, beta - mean * scale


def deconv_bn_relu(x, w, gamma, beta):
    """ConvTranspose2d(k=4, s=2, p=1, bias=False) + BatchNorm2d + ReLU, NHWC in/out."""
    B, H, W, _ = x.shape
    Cout = w.shape[1]
    y, s, sq = pallas_matmul_stats(_im2col3x3(x), _pack_w_s2(w))   # y: (B*H*W, 4*Cout)
    scale, shift = _bn_scale_shift(s.reshape(4, Cout).sum(0),
                                   sq.reshape(4, Cout).sum(0),
                                   4 * B * H * W, gamma, beta)
    # lane-dense (B*H, W*4*Cout) view for the elementwise pass (free reshape).
    y = pallas_affine_relu(y.reshape(B * H, W * 4 * Cout),
                           jnp.tile(scale, 4 * W)[None, :],
                           jnp.tile(shift, 4 * W)[None, :])
    return _subpixel_to_nhwc(y.reshape(B * H * W, 4 * Cout), B, H, W, Cout)


def project_bn_relu(x, w, gamma, beta):
    """ConvTranspose2d(nz, C, k=4, s=1, p=0) on a 1x1 input (= matmul) + BN + ReLU."""
    B, nz = x.shape
    Cout = w.shape[1]
    wm = jnp.transpose(w, (0, 2, 3, 1)).reshape(nz, 16 * Cout)   # cols = (kh, kw, c)
    a = _pad_lanes(x)
    wm = jnp.pad(wm, ((0, a.shape[1] - nz), (0, 0)))
    y, s, sq = pallas_matmul_stats(a, wm)                        # (B, 16*Cout)
    scale, shift = _bn_scale_shift(s.reshape(16, Cout).sum(0),
                                   sq.reshape(16, Cout).sum(0),
                                   16 * B, gamma, beta)
    y = pallas_affine_relu(y, jnp.tile(scale, 16)[None, :],
                           jnp.tile(shift, 16)[None, :])
    return y.reshape(B, 4, 4, Cout)                              # NHWC


def deconv_tanh(x, w):
    """Final ConvTranspose2d(k=4, s=2, p=1) with tanh fused into the matmul store."""
    B, H, W, _ = x.shape
    Cout = w.shape[1]
    y = pallas_matmul_tanh(_im2col3x3(x), _pack_w_s2(w))
    return _subpixel_to_nhwc(y, B, H, W, Cout)


def generator_forward(x_nchw, p):
    """(B, nz, 1, 1) -> (B, nc, 64, 64), matching the PyTorch Generator (train-mode BN)."""
    B, nz = x_nchw.shape[0], x_nchw.shape[1]
    y = project_bn_relu(x_nchw.reshape(B, nz).astype(jnp.float32),
                        p["w1"], p["g1"], p["b1"])
    y = deconv_bn_relu(y, p["w2"], p["g2"], p["b2"])
    y = deconv_bn_relu(y, p["w3"], p["g3"], p["b3"])
    y = deconv_bn_relu(y, p["w4"], p["g4"], p["b4"])
    y = deconv_tanh(y, p["w5"])
    return jnp.transpose(y, (0, 3, 1, 2))   # NHWC -> NCHW


# -------------------------- pure-JAX reference -----------------------------

def _ref_convT(x, w, stride, pad, k=4):
    wf = jnp.flip(w, axis=(2, 3))                 # flip spatial
    wc = jnp.transpose(wf, (1, 0, 2, 3))          # (Cout, Cin, kh, kw)
    return lax.conv_general_dilated(
        x, wc, window_strides=(1, 1),
        padding=[(k - 1 - pad, k - 1 - pad)] * 2,
        lhs_dilation=(stride, stride),
        dimension_numbers=("NCHW", "OIHW", "NCHW"),
        precision=lax.Precision.HIGHEST)


def _ref_bn_relu(x, gamma, beta, eps=1e-5):
    mean = x.mean(axis=(0, 2, 3), keepdims=True)
    var = x.var(axis=(0, 2, 3), keepdims=True)
    y = (x - mean) / jnp.sqrt(var + eps) * gamma[None, :, None, None] + beta[None, :, None, None]
    return jnp.maximum(y, 0.0)


def reference_forward(x, p):
    y = _ref_bn_relu(_ref_convT(x, p["w1"], 1, 0), p["g1"], p["b1"])
    y = _ref_bn_relu(_ref_convT(y, p["w2"], 2, 1), p["g2"], p["b2"])
    y = _ref_bn_relu(_ref_convT(y, p["w3"], 2, 1), p["g3"], p["b3"])
    y = _ref_bn_relu(_ref_convT(y, p["w4"], 2, 1), p["g4"], p["b4"])
    return jnp.tanh(_ref_convT(y, p["w5"], 2, 1))


# --------------------------------- main -------------------------------------

if __name__ == "__main__":
    nz, nc, ngf, B = 8, 3, 8, 2
    key = jax.random.PRNGKey(0)
    ks = jax.random.split(key, 6)

    def winit(k, shape):  # DCGAN-style deterministic init, N(0, 0.02)
        return 0.02 * jax.random.normal(k, shape, jnp.float32)

    params = {
        "w1": winit(ks[0], (nz,       ngf * 8, 4, 4)),
        "w2": winit(ks[1], (ngf * 8,  ngf * 4, 4, 4)),
        "w3": winit(ks[2], (ngf * 4,  ngf * 2, 4, 4)),
        "w4": winit(ks[3], (ngf * 2,  ngf,     4, 4)),
        "w5": winit(ks[4], (ngf,      nc,      4, 4)),
        "g1": jnp.ones((ngf * 8,), jnp.float32), "b1": jnp.zeros((ngf * 8,), jnp.float32),
        "g2": jnp.ones((ngf * 4,), jnp.float32), "b2": jnp.zeros((ngf * 4,), jnp.float32),
        "g3": jnp.ones((ngf * 2,), jnp.float32), "b3": jnp.zeros((ngf * 2,), jnp.float32),
        "g4": jnp.ones((ngf,), jnp.float32),     "b4": jnp.zeros((ngf,), jnp.float32),
    }

    x = jax.random.normal(ks[5], (B, nz, 1, 1), jnp.float32)

    out = jax.jit(generator_forward)(x, params)
    out = jax.block_until_ready(out)

    assert out.shape == (B, nc, 64, 64), out.shape
    ref = reference_forward(x, params)
    err = float(jnp.max(jnp.abs(out - ref)))
    assert jnp.allclose(out, ref, atol=2e-3, rtol=2e-3), f"max abs err {err}"

    print("KERNEL_OK")
</pallas_src>

<mosaic_0001>
module attributes {stable_mosaic.version = 11 : i64} {
  func.func @_mm_stats_kernel(%arg0: i32, %arg1: memref<2x128xf32, #tpu.memory_space<vmem>>, %arg2: memref<128x1024xf32, #tpu.memory_space<vmem>>, %arg3: memref<2x1024xf32, #tpu.memory_space<vmem>>, %arg4: memref<8x1024xf32, #tpu.memory_space<vmem>>) attributes {dimension_semantics = [#tpu.dimension_semantics<parallel>], iteration_bounds = array<i64: 1>, scalar_prefetch = 0 : i64, scratch_operands = 0 : i64, tpu.core_type = #tpu.core_type<tc>, window_params = [{transform_indices = @transform_0, window_bounds = array<i64: 2, 128>}, {pipeline_mode = #tpu.pipeline_mode<synchronous>, transform_indices = @transform_1, window_bounds = array<i64: 128, 1024>}, {transform_indices = @transform_2, window_bounds = array<i64: 2, 1024>}, {transform_indices = @transform_3, window_bounds = array<i64: 8, 1024>}]} {
    %c0 = arith.constant 0 : index
    %c0_0 = arith.constant 0 : index
    %0 = vector.load %arg1[%c0, %c0_0] : memref<2x128xf32, #tpu.memory_space<vmem>>, vector<2x128xf32>
    %c0_1 = arith.constant 0 : index
    %c0_2 = arith.constant 0 : index
    %1 = vector.load %arg2[%c0_1, %c0_2] : memref<128x1024xf32, #tpu.memory_space<vmem>>, vector<128x1024xf32>
    %cst = arith.constant dense<0.000000e+00> : vector<2x1024xf32>
    %2 = tpu.matmul %0, %1, %cst {dimension_numbers = #tpu.dot_dimension_numbers<[1], [0], [0], [1], [0, 0, 1, 1], [], []>} : vector<2x128xf32>, vector<128x1024xf32>, vector<2x1024xf32> -> vector<2x1024xf32>
    %c0_3 = arith.constant 0 : index
    %c0_4 = arith.constant 0 : index
    %3 = vector.load %arg3[%c0_3, %c0_4] : memref<2x1024xf32, #tpu.memory_space<vmem>>, vector<2x1024xf32>
    tpu.vector_store %arg3[%c0_3, %c0_4], %2 {strides = array<i32>} : memref<2x1024xf32, #tpu.memory_space<vmem>>, vector<2x1024xf32>,
    %cst_5 = arith.constant dense<0.000000e+00> : vector<1024xf32>
    %4 = vector.multi_reduction <add>, %2, %cst_5 [0] : vector<2x1024xf32> to vector<1024xf32>
    %5 = vector.shape_cast %4 : vector<1024xf32> to vector<1x1024xf32>
    %6 = arith.mulf %2, %2 : vector<2x1024xf32>
    %cst_6 = arith.constant dense<0.000000e+00> : vector<1024xf32>
    %7 = vector.multi_reduction <add>, %6, %cst_6 [0] : vector<2x1024xf32> to vector<1024xf32>
    %8 = vector.shape_cast %7 : vector<1024xf32> to vector<1x1024xf32>
    %9 = tpu.iota {dimensions = array<i32: 0>} : vector<8x1024xi32>
    %c0_i32 = arith.constant 0 : i32
    %10 = vector.broadcast %c0_i32 : i32 to vector<8x1024xi32>
    %11 = arith.cmpi eq, %9, %10 : vector<8x1024xi32>
    %c1_i32 = arith.constant 1 : i32
    %12 = vector.broadcast %c1_i32 : i32 to vector<8x1024xi32>
    %13 = arith.cmpi eq, %9, %12 : vector<8x1024xi32>
    %cst_7 = arith.constant 0.000000e+00 : f32
    %14 = vector.shape_cast %8 : vector<1x1024xf32> to vector<1x1024xf32>
    %15 = vector.broadcast %14 : vector<1x1024xf32> to vector<8x1024xf32>
    %16 = vector.broadcast %cst_7 : f32 to vector<8x1024xf32>
    %17 = arith.select %13, %15, %16 : vector<8x1024xi1>, vector<8x1024xf32>
    %18 = vector.shape_cast %5 : vector<1x1024xf32> to vector<1x1024xf32>
    %19 = vector.broadcast %18 : vector<1x1024xf32> to vector<8x1024xf32>
    %20 = arith.select %11, %19, %17 : vector<8x1024xi1>, vector<8x1024xf32>
    %c0_8 = arith.constant 0 : index
    %c0_9 = arith.constant 0 : index
    %21 = vector.load %arg4[%c0_8, %c0_9] : memref<8x1024xf32, #tpu.memory_space<vmem>>, vector<8x1024xf32>
    tpu.vector_store %arg4[%c0_8, %c0_9], %20 {strides = array<i32>} : memref<8x1024xf32, #tpu.memory_space<vmem>>, vector<8x1024xf32>,
    return
  }
  func.func @transform_0(%arg0: i32) -> (i32, i32) {
    %c0_i32 = arith.constant 0 : i32
    %c0_i32_0 = arith.constant 0 : i32
    return %arg0, %c0_i32 : i32, i32
  }
  func.func @transform_1(%arg0: i32) -> (i32, i32) {
    %c0_i32 = arith.constant 0 : i32
    %c0_i32_0 = arith.constant 0 : i32
    %c0_i32_1 = arith.constant 0 : i32
    return %c0_i32, %c0_i32_0 : i32, i32
  }
  func.func @transform_2(%arg0: i32) -> (i32, i32) {
    %c0_i32 = arith.constant 0 : i32
    %c0_i32_0 = arith.constant 0 : i32
    return %arg0, %c0_i32 : i32, i32
  }
  func.func @transform_3(%arg0: i32) -> (i32, i32) {
    %c0_i32 = arith.constant 0 : i32
    %c0_i32_0 = arith.constant 0 : i32
    return %arg0, %c0_i32 : i32, i32
  }
}

module attributes {stable_mosaic.version = 11 : i64} {
  func.func @_affine_relu_kernel(%arg0: i32, %arg1: memref<2x1024xf32, #tpu.memory_space<vmem>>, %arg2: memref<1x1024xf32, #tpu.memory_space<vmem>>, %arg3: memref<1x1024xf32, #tpu.memory_space<vmem>>, %arg4: memref<2x1024xf32, #tpu.memory_space<vmem>>) attributes {dimension_semantics = [#tpu.dimension_semantics<parallel>], iteration_bounds = array<i64: 1>, scalar_prefetch = 0 : i64, scratch_operands = 0 : i64, tpu.core_type = #tpu.core_type<tc>, window_params = [{transform_indices = @transform_0, window_bounds = array<i64: 2, 1024>}, {pipeline_mode = #tpu.pipeline_mode<synchronous>, transform_indices = @transform_1, window_bounds = array<i64: 1, 1024>}, {pipeline_mode = #tpu.pipeline_mode<synchronous>, transform_indices = @transform_2, window_bounds = array<i64: 1, 1024>}, {transform_indices = @transform_3, window_bounds = array<i64: 2, 1024>}]} {
    %c0 = arith.constant 0 : index
    %c0_0 = arith.constant 0 : index
    %0 = vector.load %arg1[%c0, %c0_0] : memref<2x1024xf32, #tpu.memory_space<vmem>>, vector<2x1024xf32>
    %c0_1 = arith.constant 0 : index
    %c0_2 = arith.constant 0 : index
    %1 = vector.load %arg2[%c0_1, %c0_2] : memref<1x1024xf32, #tpu.memory_space<vmem>>, vector<1x1024xf32>
    %2 = vector.broadcast %1 : vector<1x1024xf32> to vector<2x1024xf32>
    %3 = arith.mulf %0, %2 : vector<2x1024xf32>
    %c0_3 = arith.constant 0 : index
    %c0_4 = arith.constant 0 : index
    %4 = vector.load %arg3[%c0_3, %c0_4] : memref<1x1024xf32, #tpu.memory_space<vmem>>, vector<1x1024xf32>
    %5 = vector.broadcast %4 : vector<1x1024xf32> to vector<2x1024xf32>
    %6 = arith.addf %3, %5 : vector<2x1024xf32>
    %cst = arith.constant 0.000000e+00 : f32
    %7 = vector.broadcast %cst : f32 to vector<2x1024xf32>
    %8 = arith.maximumf %6, %7 : vector<2x1024xf32>
    %c0_5 = arith.constant 0 : index
    %c0_6 = arith.constant 0 : index
    %9 = vector.load %arg4[%c0_5, %c0_6] : memref<2x1024xf32, #tpu.memory_space<vmem>>, vector<2x1024xf32>
    tpu.vector_store %arg4[%c0_5, %c0_6], %8 {strides = array<i32>} : memref<2x1024xf32, #tpu.memory_space<vmem>>, vector<2x1024xf32>,
    return
  }
  func.func @transform_0(%arg0: i32) -> (i32, i32) {
    %c0_i32 = arith.constant 0 : i32
    %c0_i32_0 = arith.constant 0 : i32
    return %arg0, %c0_i32 : i32, i32
  }
  func.func @transform_1(%arg0: i32) -> (i32, i32) {
    %c0_i32 = arith.constant 0 : i32
    %c0_i32_0 = arith.constant 0 : i32
    %c0_i32_1 = arith.constant 0 : i32
    return %c0_i32, %c0_i32_0 : i32, i32
  }
  func.func @transform_2(%arg0: i32) -> (i32, i32) {
    %c0_i32 = arith.constant 0 : i32
    %c0_i32_0 = arith.constant 0 : i32
    %c0_i32_1 = arith.constant 0 : i32
    return %c0_i32, %c0_i32_0 : i32, i32
  }
  func.func @transform_3(%arg0: i32) -> (i32, i32) {
    %c0_i32 = arith.constant 0 : i32
    %c0_i32_0 = arith.constant 0 : i32
    return %arg0, %c0_i32 : i32, i32
  }
}

module attributes {stable_mosaic.version = 11 : i64} {
  func.func @_mm_stats_kernel(%arg0: i32, %arg1: memref<32x640xf32, #tpu.memory_space<vmem>>, %arg2: memref<640x128xf32, #tpu.memory_space<vmem>>, %arg3: memref<32x128xf32, #tpu.memory_space<vmem>>, %arg4: memref<8x128xf32, #tpu.memory_space<vmem>>) attributes {dimension_semantics = [#tpu.dimension_semantics<parallel>], iteration_bounds = array<i64: 1>, scalar_prefetch = 0 : i64, scratch_operands = 0 : i64, tpu.core_type = #tpu.core_type<tc>, window_params = [{transform_indices = @transform_0, window_bounds = array<i64: 32, 640>}, {pipeline_mode = #tpu.pipeline_mode<synchronous>, transform_indices = @transform_1, window_bounds = array<i64: 640, 128>}, {transform_indices = @transform_2, window_bounds = array<i64: 32, 128>}, {transform_indices = @transform_3, window_bounds = array<i64: 8, 128>}]} {
    %c0 = arith.constant 0 : index
    %c0_0 = arith.constant 0 : index
    %0 = vector.load %arg1[%c0, %c0_0] : memref<32x640xf32, #tpu.memory_space<vmem>>, vector<32x640xf32>
    %c0_1 = arith.constant 0 : index
    %c0_2 = arith.constant 0 : index
    %1 = vector.load %arg2[%c0_1, %c0_2] : memref<640x128xf32, #tpu.memory_space<vmem>>, vector<640x128xf32>
    %cst = arith.constant dense<0.000000e+00> : vector<32x128xf32>
    %2 = tpu.matmul %0, %1, %cst {dimension_numbers = #tpu.dot_dimension_numbers<[1], [0], [0], [1], [0, 0, 1, 1], [], []>} : vector<32x640xf32>, vector<640x128xf32>, vector<32x128xf32> -> vector<32x128xf32>
    %c0_3 = arith.constant 0 : index
    %c0_4 = arith.constant 0 : index
    %3 = vector.load %arg3[%c0_3, %c0_4] : memref<32x128xf32, #tpu.memory_space<vmem>>, vector<32x128xf32>
    tpu.vector_store %arg3[%c0_3, %c0_4], %2 {strides = array<i32>} : memref<32x128xf32, #tpu.memory_space<vmem>>, vector<32x128xf32>,
    %cst_5 = arith.constant dense<0.000000e+00> : vector<128xf32>
    %4 = vector.multi_reduction <add>, %2, %cst_5 [0] : vector<32x128xf32> to vector<128xf32>
    %5 = vector.shape_cast %4 : vector<128xf32> to vector<1x128xf32>
    %6 = arith.mulf %2, %2 : vector<32x128xf32>
    %cst_6 = arith.constant dense<0.000000e+00> : vector<128xf32>
    %7 = vector.multi_reduction <add>, %6, %cst_6 [0] : vector<32x128xf32> to vector<128xf32>
    %8 = vector.shape_cast %7 : vector<128xf32> to vector<1x128xf32>
    %9 = tpu.iota {dimensions = array<i32: 0>} : vector<8x128xi32>
    %c0_i32 = arith.constant 0 : i32
    %10 = vector.broadcast %c0_i32 : i32 to vector<8x128xi32>
    %11 = arith.cmpi eq, %9, %10 : vector<8x128xi32>
    %c1_i32 = arith.constant 1 : i32
    %12 = vector.broadcast %c1_i32 : i32 to vector<8x128xi32>
    %13 = arith.cmpi eq, %9, %12 : vector<8x128xi32>
    %cst_7 = arith.constant 0.000000e+00 : f32
    %14 = vector.shape_cast %8 : vector<1x128xf32> to vector<1x128xf32>
    %15 = vector.broadcast %14 : vector<1x128xf32> to vector<8x128xf32>
    %16 = vector.broadcast %cst_7 : f32 to vector<8x128xf32>
    %17 = arith.select %13, %15, %16 : vector<8x128xi1>, vector<8x128xf32>
    %18 = vector.shape_cast %5 : vector<1x128xf32> to vector<1x128xf32>
    %19 = vector.broadcast %18 : vector<1x128xf32> to vector<8x128xf32>
    %20 = arith.select %11, %19, %17 : vector<8x128xi1>, vector<8x128xf32>
    %c0_8 = arith.constant 0 : index
    %c0_9 = arith.constant 0 : index
    %21 = vector.load %arg4[%c0_8, %c0_9] : memref<8x128xf32, #tpu.memory_space<vmem>>, vector<8x128xf32>
    tpu.vector_store %arg4[%c0_8, %c0_9], %20 {strides = array<i32>} : memref<8x128xf32, #tpu.memory_space<vmem>>, vector<8x128xf32>,
    return
  }
  func.func @transform_0(%arg0: i32) -> (i32, i32) {
    %c0_i32 = arith.constant 0 : i32
    %c0_i32_0 = arith.constant 0 : i32
    return %arg0, %c0_i32 : i32, i32
  }
  func.func @transform_1(%arg0: i32) -> (i32, i32) {
    %c0_i32 = arith.constant 0 : i32
    %c0_i32_0 = arith.constant 0 : i32
    %c0_i32_1 = arith.constant 0 : i32
    return %c0_i32, %c0_i32_0 : i32, i32
  }
  func.func @transform_2(%arg0: i32) -> (i32, i32) {
    %c0_i32 = arith.constant 0 : i32
    %c0_i32_0 = arith.constant 0 : i32
    return %arg0, %c0_i32 : i32, i32
  }
  func.func @transform_3(%arg0: i32) -> (i32, i32) {
    %c0_i32 = arith.constant 0 : i32
    %c0_i32_0 = arith.constant 0 : i32
    return %arg0, %c0_i32 : i32, i32
  }
}

module attributes {stable_mosaic.version = 11 : i64} {
  func.func @_affine_relu_kernel(%arg0: i32, %arg1: memref<8x512xf32, #tpu.memory_space<vmem>>, %arg2: memref<1x512xf32, #tpu.memory_space<vmem>>, %arg3: memref<1x512xf32, #tpu.memory_space<vmem>>, %arg4: memref<8x512xf32, #tpu.memory_space<vmem>>) attributes {dimension_semantics = [#tpu.dimension_semantics<parallel>], iteration_bounds = array<i64: 1>, scalar_prefetch = 0 : i64, scratch_operands = 0 : i64, tpu.core_type = #tpu.core_type<tc>, window_params = [{transform_indices = @transform_0, window_bounds = array<i64: 8, 512>}, {pipeline_mode = #tpu.pipeline_mode<synchronous>, transform_indices = @transform_1, window_bounds = array<i64: 1, 512>}, {pipeline_mode = #tpu.pipeline_mode<synchronous>, transform_indices = @transform_2, window_bounds = array<i64: 1, 512>}, {transform_indices = @transform_3, window_bounds = array<i64: 8, 512>}]} {
    %c0 = arith.constant 0 : index
    %c0_0 = arith.constant 0 : index
    %0 = vector.load %arg1[%c0, %c0_0] : memref<8x512xf32, #tpu.memory_space<vmem>>, vector<8x512xf32>
    %c0_1 = arith.constant 0 : index
    %c0_2 = arith.constant 0 : index
    %1 = vector.load %arg2[%c0_1, %c0_2] : memref<1x512xf32, #tpu.memory_space<vmem>>, vector<1x512xf32>
    %2 = vector.broadcast %1 : vector<1x512xf32> to vector<8x512xf32>
    %3 = arith.mulf %0, %2 : vector<8x512xf32>
    %c0_3 = arith.constant 0 : index
    %c0_4 = arith.constant 0 : index
    %4 = vector.load %arg3[%c0_3, %c0_4] : memref<1x512xf32, #tpu.memory_space<vmem>>, vector<1x512xf32>
    %5 = vector.broadcast %4 : vector<1x512xf32> to vector<8x512xf32>
    %6 = arith.addf %3, %5 : vector<8x512xf32>
    %cst = arith.constant 0.000000e+00 : f32
    %7 = vector.broadcast %cst : f32 to vector<8x512xf32>
    %8 = arith.maximumf %6, %7 : vector<8x512xf32>
    %c0_5 = arith.constant 0 : index
    %c0_6 = arith.constant 0 : index
    %9 = vector.load %arg4[%c0_5, %c0_6] : memref<8x512xf32, #tpu.memory_space<vmem>>, vector<8x512xf32>
    tpu.vector_store %arg4[%c0_5, %c0_6], %8 {strides = array<i32>} : memref<8x512xf32, #tpu.memory_space<vmem>>, vector<8x512xf32>,
    return
  }
  func.func @transform_0(%arg0: i32) -> (i32, i32) {
    %c0_i32 = arith.constant 0 : i32
    %c0_i32_0 = arith.constant 0 : i32
    return %arg0, %c0_i32 : i32, i32
  }
  func.func @transform_1(%arg0: i32) -> (i32, i32) {
    %c0_i32 = arith.constant 0 : i32
    %c0_i32_0 = arith.constant 0 : i32
    %c0_i32_1 = arith.constant 0 : i32
    return %c0_i32, %c0_i32_0 : i32, i32
  }
  func.func @transform_2(%arg0: i32) -> (i32, i32) {
    %c0_i32 = arith.constant 0 : i32
    %c0_i32_0 = arith.constant 0 : i32
    %c0_i32_1 = arith.constant 0 : i32
    return %c0_i32, %c0_i32_0 : i32, i32
  }
  func.func @transform_3(%arg0: i32) -> (i32, i32) {
    %c0_i32 = arith.constant 0 : i32
    %c0_i32_0 = arith.constant 0 : i32
    return %arg0, %c0_i32 : i32, i32
  }
}

module attributes {stable_mosaic.version = 11 : i64} {
  func.func @_mm_stats_kernel(%arg0: i32, %arg1: memref<128x384xf32, #tpu.memory_space<vmem>>, %arg2: memref<384x64xf32, #tpu.memory_space<vmem>>, %arg3: memref<128x64xf32, #tpu.memory_space<vmem>>, %arg4: memref<8x64xf32, #tpu.memory_space<vmem>>) attributes {dimension_semantics = [#tpu.dimension_semantics<parallel>], iteration_bounds = array<i64: 1>, scalar_prefetch = 0 : i64, scratch_operands = 0 : i64, tpu.core_type = #tpu.core_type<tc>, window_params = [{transform_indices = @transform_0, window_bounds = array<i64: 128, 384>}, {pipeline_mode = #tpu.pipeline_mode<synchronous>, transform_indices = @transform_1, window_bounds = array<i64: 384, 64>}, {transform_indices = @transform_2, window_bounds = array<i64: 128, 64>}, {transform_indices = @transform_3, window_bounds = array<i64: 8, 64>}]} {
    %c0 = arith.constant 0 : index
    %c0_0 = arith.constant 0 : index
    %0 = vector.load %arg1[%c0, %c0_0] : memref<128x384xf32, #tpu.memory_space<vmem>>, vector<128x384xf32>
    %c0_1 = arith.constant 0 : index
    %c0_2 = arith.constant 0 : index
    %1 = vector.load %arg2[%c0_1, %c0_2] : memref<384x64xf32, #tpu.memory_space<vmem>>, vector<384x64xf32>
    %cst = arith.constant dense<0.000000e+00> : vector<128x64xf32>
    %2 = tpu.matmul %0, %1, %cst {dimension_numbers = #tpu.dot_dimension_numbers<[1], [0], [0], [1], [0, 0, 1, 1], [], []>} : vector<128x384xf32>, vector<384x64xf32>, vector<128x64xf32> -> vector<128x64xf32>
    %c0_3 = arith.constant 0 : index
    %c0_4 = arith.constant 0 : index
    %3 = vector.load %arg3[%c0_3, %c0_4] : memref<128x64xf32, #tpu.memory_space<vmem>>, vector<128x64xf32>
    tpu.vector_store %arg3[%c0_3, %c0_4], %2 {strides = array<i32>} : memref<128x64xf32, #tpu.memory_space<vmem>>, vector<128x64xf32>,
    %cst_5 = arith.constant dense<0.000000e+00> : vector<64xf32>
    %4 = vector.multi_reduction <add>, %2, %cst_5 [0] : vector<128x64xf32> to vector<64xf32>
    %5 = vector.shape_cast %4 : vector<64xf32> to vector<1x64xf32>
    %6 = arith.mulf %2, %2 : vector<128x64xf32>
    %cst_6 = arith.constant dense<0.000000e+00> : vector<64xf32>
    %7 = vector.multi_reduction <add>, %6, %cst_6 [0] : vector<128x64xf32> to vector<64xf32>
    %8 = vector.shape_cast %7 : vector<64xf32> to vector<1x64xf32>
    %9 = tpu.iota {dimensions = array<i32: 0>} : vector<8x64xi32>
    %c0_i32 = arith.constant 0 : i32
    %10 = vector.broadcast %c0_i32 : i32 to vector<8x64xi32>
    %11 = arith.cmpi eq, %9, %10 : vector<8x64xi32>
    %c1_i32 = arith.constant 1 : i32
    %12 = vector.broadcast %c1_i32 : i32 to vector<8x64xi32>
    %13 = arith.cmpi eq, %9, %12 : vector<8x64xi32>
    %cst_7 = arith.constant 0.000000e+00 : f32
    %14 = vector.shape_cast %8 : vector<1x64xf32> to vector<1x64xf32>
    %15 = vector.broadcast %14 : vector<1x64xf32> to vector<8x64xf32>
    %16 = vector.broadcast %cst_7 : f32 to vector<8x64xf32>
    %17 = arith.select %13, %15, %16 : vector<8x64xi1>, vector<8x64xf32>
    %18 = vector.shape_cast %5 : vector<1x64xf32> to vector<1x64xf32>
    %19 = vector.broadcast %18 : vector<1x64xf32> to vector<8x64xf32>
    %20 = arith.select %11, %19, %17 : vector<8x64xi1>, vector<8x64xf32>
    %c0_8 = arith.constant 0 : index
    %c0_9 = arith.constant 0 : index
    %21 = vector.load %arg4[%c0_8, %c0_9] : memref<8x64xf32, #tpu.memory_space<vmem>>, vector<8x64xf32>
    tpu.vector_store %arg4[%c0_8, %c0_9], %20 {strides = array<i32>} : memref<8x64xf32, #tpu.memory_space<vmem>>, vector<8x64xf32>,
    return
  }
  func.func @transform_0(%arg0: i32) -> (i32, i32) {
    %c0_i32 = arith.constant 0 : i32
    %c0_i32_0 = arith.constant 0 : i32
    return %arg0, %c0_i32 : i32, i32
  }
  func.func @transform_1(%arg0: i32) -> (i32, i32) {
    %c0_i32 = arith.constant 0 : i32
    %c0_i32_0 = arith.constant 0 : i32
    %c0_i32_1 = arith.constant 0 : i32
    return %c0_i32, %c0_i32_0 : i32, i32
  }
  func.func @transform_2(%arg0: i32) -> (i32, i32) {
    %c0_i32 = arith.constant 0 : i32
    %c0_i32_0 = arith.constant 0 : i32
    return %arg0, %c0_i32 : i32, i32
  }
  func.func @transform_3(%arg0: i32) -> (i32, i32) {
    %c0_i32 = arith.constant 0 : i32
    %c0_i32_0 = arith.constant 0 : i32
    return %arg0, %c0_i32 : i32, i32
  }
}

module attributes {stable_mosaic.version = 11 : i64} {
  func.func @_affine_relu_kernel(%arg0: i32, %arg1: memref<16x512xf32, #tpu.memory_space<vmem>>, %arg2: memref<1x512xf32, #tpu.memory_space<vmem>>, %arg3: memref<1x512xf32, #tpu.memory_space<vmem>>, %arg4: memref<16x512xf32, #tpu.memory_space<vmem>>) attributes {dimension_semantics = [#tpu.dimension_semantics<parallel>], iteration_bounds = array<i64: 1>, scalar_prefetch = 0 : i64, scratch_operands = 0 : i64, tpu.core_type = #tpu.core_type<tc>, window_params = [{transform_indices = @transform_0, window_bounds = array<i64: 16, 512>}, {pipeline_mode = #tpu.pipeline_mode<synchronous>, transform_indices = @transform_1, window_bounds = array<i64: 1, 512>}, {pipeline_mode = #tpu.pipeline_mode<synchronous>, transform_indices = @transform_2, window_bounds = array<i64: 1, 512>}, {transform_indices = @transform_3, window_bounds = array<i64: 16, 512>}]} {
    %c0 = arith.constant 0 : index
    %c0_0 = arith.constant 0 : index
    %0 = vector.load %arg1[%c0, %c0_0] : memref<16x512xf32, #tpu.memory_space<vmem>>, vector<16x512xf32>
    %c0_1 = arith.constant 0 : index
    %c0_2 = arith.constant 0 : index
    %1 = vector.load %arg2[%c0_1, %c0_2] : memref<1x512xf32, #tpu.memory_space<vmem>>, vector<1x512xf32>
    %2 = vector.broadcast %1 : vector<1x512xf32> to vector<16x512xf32>
    %3 = arith.mulf %0, %2 : vector<16x512xf32>
    %c0_3 = arith.constant 0 : index
    %c0_4 = arith.constant 0 : index
    %4 = vector.load %arg3[%c0_3, %c0_4] : memref<1x512xf32, #tpu.memory_space<vmem>>, vector<1x512xf32>
    %5 = vector.broadcast %4 : vector<1x512xf32> to vector<16x512xf32>
    %6 = arith.addf %3, %5 : vector<16x512xf32>
    %cst = arith.constant 0.000000e+00 : f32
    %7 = vector.broadcast %cst : f32 to vector<16x512xf32>
    %8 = arith.maximumf %6, %7 : vector<16x512xf32>
    %c0_5 = arith.constant 0 : index
    %c0_6 = arith.constant 0 : index
    %9 = vector.load %arg4[%c0_5, %c0_6] : memref<16x512xf32, #tpu.memory_space<vmem>>, vector<16x512xf32>
    tpu.vector_store %arg4[%c0_5, %c0_6], %8 {strides = array<i32>} : memref<16x512xf32, #tpu.memory_space<vmem>>, vector<16x512xf32>,
    return
  }
  func.func @transform_0(%arg0: i32) -> (i32, i32) {
    %c0_i32 = arith.constant 0 : i32
    %c0_i32_0 = arith.constant 0 : i32
    return %arg0, %c0_i32 : i32, i32
  }
  func.func @transform_1(%arg0: i32) -> (i32, i32) {
    %c0_i32 = arith.constant 0 : i32
    %c0_i32_0 = arith.constant 0 : i32
    %c0_i32_1 = arith.constant 0 : i32
    return %c0_i32, %c0_i32_0 : i32, i32
  }
  func.func @transform_2(%arg0: i32) -> (i32, i32) {
    %c0_i32 = arith.constant 0 : i32
    %c0_i32_0 = arith.constant 0 : i32
    %c0_i32_1 = arith.constant 0 : i32
    return %c0_i32, %c0_i32_0 : i32, i32
  }
  func.func @transform_3(%arg0: i32) -> (i32, i32) {
    %c0_i32 = arith.constant 0 : i32
    %c0_i32_0 = arith.constant 0 : i32
    return %arg0, %c0_i32 : i32, i32
  }
}

module attributes {stable_mosaic.version = 11 : i64} {
  func.func @_mm_stats_kernel(%arg0: i32, %arg1: memref<512x256xf32, #tpu.memory_space<vmem>>, %arg2: memref<256x32xf32, #tpu.memory_space<vmem>>, %arg3: memref<512x32xf32, #tpu.memory_space<vmem>>, %arg4: memref<8x32xf32, #tpu.memory_space<vmem>>) attributes {dimension_semantics = [#tpu.dimension_semantics<parallel>], iteration_bounds = array<i64: 1>, scalar_prefetch = 0 : i64, scratch_operands = 0 : i64, tpu.core_type = #tpu.core_type<tc>, window_params = [{transform_indices = @transform_0, window_bounds = array<i64: 512, 256>}, {pipeline_mode = #tpu.pipeline_mode<synchronous>, transform_indices = @transform_1, window_bounds = array<i64: 256, 32>}, {transform_indices = @transform_2, window_bounds = array<i64: 512, 32>}, {transform_indices = @transform_3, window_bounds = array<i64: 8, 32>}]} {
    %c0 = arith.constant 0 : index
    %c0_0 = arith.constant 0 : index
    %0 = vector.load %arg1[%c0, %c0_0] : memref<512x256xf32, #tpu.memory_space<vmem>>, vector<512x256xf32>
    %c0_1 = arith.constant 0 : index
    %c0_2 = arith.constant 0 : index
    %1 = vector.load %arg2[%c0_1, %c0_2] : memref<256x32xf32, #tpu.memory_space<vmem>>, vector<256x32xf32>
    %cst = arith.constant dense<0.000000e+00> : vector<512x32xf32>
    %2 = tpu.matmul %0, %1, %cst {dimension_numbers = #tpu.dot_dimension_numbers<[1], [0], [0], [1], [0, 0, 1, 1], [], []>} : vector<512x256xf32>, vector<256x32xf32>, vector<512x32xf32> -> vector<512x32xf32>
    %c0_3 = arith.constant 0 : index
    %c0_4 = arith.constant 0 : index
    %3 = vector.load %arg3[%c0_3, %c0_4] : memref<512x32xf32, #tpu.memory_space<vmem>>, vector<512x32xf32>
    tpu.vector_store %arg3[%c0_3, %c0_4], %2 {strides = array<i32>} : memref<512x32xf32, #tpu.memory_space<vmem>>, vector<512x32xf32>,
    %cst_5 = arith.constant dense<0.000000e+00> : vector<32xf32>
    %4 = vector.multi_reduction <add>, %2, %cst_5 [0] : vector<512x32xf32> to vector<32xf32>
    %5 = vector.shape_cast %4 : vector<32xf32> to vector<1x32xf32>
    %6 = arith.mulf %2, %2 : vector<512x32xf32>
    %cst_6 = arith.constant dense<0.000000e+00> : vector<32xf32>
    %7 = vector.multi_reduction <add>, %6, %cst_6 [0] : vector<512x32xf32> to vector<32xf32>
    %8 = vector.shape_cast %7 : vector<32xf32> to vector<1x32xf32>
    %9 = tpu.iota {dimensions = array<i32: 0>} : vector<8x32xi32>
    %c0_i32 = arith.constant 0 : i32
    %10 = vector.broadcast %c0_i32 : i32 to vector<8x32xi32>
    %11 = arith.cmpi eq, %9, %10 : vector<8x32xi32>
    %c1_i32 = arith.constant 1 : i32
    %12 = vector.broadcast %c1_i32 : i32 to vector<8x32xi32>
    %13 = arith.cmpi eq, %9, %12 : vector<8x32xi32>
    %cst_7 = arith.constant 0.000000e+00 : f32
    %14 = vector.shape_cast %8 : vector<1x32xf32> to vector<1x32xf32>
    %15 = vector.broadcast %14 : vector<1x32xf32> to vector<8x32xf32>
    %16 = vector.broadcast %cst_7 : f32 to vector<8x32xf32>
    %17 = arith.select %13, %15, %16 : vector<8x32xi1>, vector<8x32xf32>
    %18 = vector.shape_cast %5 : vector<1x32xf32> to vector<1x32xf32>
    %19 = vector.broadcast %18 : vector<1x32xf32> to vector<8x32xf32>
    %20 = arith.select %11, %19, %17 : vector<8x32xi1>, vector<8x32xf32>
    %c0_8 = arith.constant 0 : index
    %c0_9 = arith.constant 0 : index
    %21 = vector.load %arg4[%c0_8, %c0_9] : memref<8x32xf32, #tpu.memory_space<vmem>>, vector<8x32xf32>
    tpu.vector_store %arg4[%c0_8, %c0_9], %20 {strides = array<i32>} : memref<8x32xf32, #tpu.memory_space<vmem>>, vector<8x32xf32>,
    return
  }
  func.func @transform_0(%arg0: i32) -> (i32, i32) {
    %c0_i32 = arith.constant 0 : i32
    %c0_i32_0 = arith.constant 0 : i32
    return %arg0, %c0_i32 : i32, i32
  }
  func.func @transform_1(%arg0: i32) -> (i32, i32) {
    %c0_i32 = arith.constant 0 : i32
    %c0_i32_0 = arith.constant 0 : i32
    %c0_i32_1 = arith.constant 0 : i32
    return %c0_i32, %c0_i32_0 : i32, i32
  }
  func.func @transform_2(%arg0: i32) -> (i32, i32) {
    %c0_i32 = arith.constant 0 : i32
    %c0_i32_0 = arith.constant 0 : i32
    return %arg0, %c0_i32 : i32, i32
  }
  func.func @transform_3(%arg0: i32) -> (i32, i32) {
    %c0_i32 = arith.constant 0 : i32
    %c0_i32_0 = arith.constant 0 : i32
    return %arg0, %c0_i32 : i32, i32
  }
}

module attributes {stable_mosaic.version = 11 : i64} {
  func.func @_affine_relu_kernel(%arg0: i32, %arg1: memref<32x512xf32, #tpu.memory_space<vmem>>, %arg2: memref<1x512xf32, #tpu.memory_space<vmem>>, %arg3: memref<1x512xf32, #tpu.memory_space<vmem>>, %arg4: memref<32x512xf32, #tpu.memory_space<vmem>>) attributes {dimension_semantics = [#tpu.dimension_semantics<parallel>], iteration_bounds = array<i64: 1>, scalar_prefetch = 0 : i64, scratch_operands = 0 : i64, tpu.core_type = #tpu.core_type<tc>, window_params = [{transform_indices = @transform_0, window_bounds = array<i64: 32, 512>}, {pipeline_mode = #tpu.pipeline_mode<synchronous>, transform_indices = @transform_1, window_bounds = array<i64: 1, 512>}, {pipeline_mode = #tpu.pipeline_mode<synchronous>, transform_indices = @transform_2, window_bounds = array<i64: 1, 512>}, {transform_indices = @transform_3, window_bounds = array<i64: 32, 512>}]} {
    %c0 = arith.constant 0 : index
    %c0_0 = arith.constant 0 : index
    %0 = vector.load %arg1[%c0, %c0_0] : memref<32x512xf32, #tpu.memory_space<vmem>>, vector<32x512xf32>
    %c0_1 = arith.constant 0 : index
    %c0_2 = arith.constant 0 : index
    %1 = vector.load %arg2[%c0_1, %c0_2] : memref<1x512xf32, #tpu.memory_space<vmem>>, vector<1x512xf32>
    %2 = vector.broadcast %1 : vector<1x512xf32> to vector<32x512xf32>
    %3 = arith.mulf %0, %2 : vector<32x512xf32>
    %c0_3 = arith.constant 0 : index
    %c0_4 = arith.constant 0 : index
    %4 = vector.load %arg3[%c0_3, %c0_4] : memref<1x512xf32, #tpu.memory_space<vmem>>, vector<1x512xf32>
    %5 = vector.broadcast %4 : vector<1x512xf32> to vector<32x512xf32>
    %6 = arith.addf %3, %5 : vector<32x512xf32>
    %cst = arith.constant 0.000000e+00 : f32
    %7 = vector.broadcast %cst : f32 to vector<32x512xf32>
    %8 = arith.maximumf %6, %7 : vector<32x512xf32>
    %c0_5 = arith.constant 0 : index
    %c0_6 = arith.constant 0 : index
    %9 = vector.load %arg4[%c0_5, %c0_6] : memref<32x512xf32, #tpu.memory_space<vmem>>, vector<32x512xf32>
    tpu.vector_store %arg4[%c0_5, %c0_6], %8 {strides = array<i32>} : memref<32x512xf32, #tpu.memory_space<vmem>>, vector<32x512xf32>,
    return
  }
  func.func @transform_0(%arg0: i32) -> (i32, i32) {
    %c0_i32 = arith.constant 0 : i32
    %c0_i32_0 = arith.constant 0 : i32
    return %arg0, %c0_i32 : i32, i32
  }
  func.func @transform_1(%arg0: i32) -> (i32, i32) {
    %c0_i32 = arith.constant 0 : i32
    %c0_i32_0 = arith.constant 0 : i32
    %c0_i32_1 = arith.constant 0 : i32
    return %c0_i32, %c0_i32_0 : i32, i32
  }
  func.func @transform_2(%arg0: i32) -> (i32, i32) {
    %c0_i32 = arith.constant 0 : i32
    %c0_i32_0 = arith.constant 0 : i32
    %c0_i32_1 = arith.constant 0 : i32
    return %c0_i32, %c0_i32_0 : i32, i32
  }
  func.func @transform_3(%arg0: i32) -> (i32, i32) {
    %c0_i32 = arith.constant 0 : i32
    %c0_i32_0 = arith.constant 0 : i32
    return %arg0, %c0_i32 : i32, i32
  }
}

module attributes {stable_mosaic.version = 11 : i64} {
  func.func @_mm_tanh_kernel(%arg0: i32, %arg1: memref<1024x128xf32, #tpu.memory_space<vmem>>, %arg2: memref<128x12xf32, #tpu.memory_space<vmem>>, %arg3: memref<1024x12xf32, #tpu.memory_space<vmem>>) attributes {dimension_semantics = [#tpu.dimension_semantics<parallel>], iteration_bounds = array<i64: 2>, scalar_prefetch = 0 : i64, scratch_operands = 0 : i64, tpu.core_type = #tpu.core_type<tc>, window_params = [{transform_indices = @transform_0, window_bounds = array<i64: 1024, 128>}, {pipeline_mode = #tpu.pipeline_mode<synchronous>, transform_indices = @transform_1, window_bounds = array<i64: 128, 12>}, {transform_indices = @transform_2, window_bounds = array<i64: 1024, 12>}]} {
    %c0 = arith.constant 0 : index
    %c0_0 = arith.constant 0 : index
    %0 = vector.load %arg1[%c0, %c0_0] : memref<1024x128xf32, #tpu.memory_space<vmem>>, vector<1024x128xf32>
    %c0_1 = arith.constant 0 : index
    %c0_2 = arith.constant 0 : index
    %1 = vector.load %arg2[%c0_1, %c0_2] : memref<128x12xf32, #tpu.memory_space<vmem>>, vector<128x12xf32>
    %cst = arith.constant dense<0.000000e+00> : vector<1024x12xf32>
    %2 = tpu.matmul %0, %1, %cst {dimension_numbers = #tpu.dot_dimension_numbers<[1], [0], [0], [1], [0, 0, 1, 1], [], []>} : vector<1024x128xf32>, vector<128x12xf32>, vector<1024x12xf32> -> vector<1024x12xf32>
    %3 = math.tanh %2 : vector<1024x12xf32>
    %c0_3 = arith.constant 0 : index
    %c0_4 = arith.constant 0 : index
    %4 = vector.load %arg3[%c0_3, %c0_4] : memref<1024x12xf32, #tpu.memory_space<vmem>>, vector<1024x12xf32>
    tpu.vector_store %arg3[%c0_3, %c0_4], %3 {strides = array<i32>} : memref<1024x12xf32, #tpu.memory_space<vmem>>, vector<1024x12xf32>,
    return
  }
  func.func @transform_0(%arg0: i32) -> (i32, i32) {
    %c0_i32 = arith.constant 0 : i32
    %c0_i32_0 = arith.constant 0 : i32
    return %arg0, %c0_i32 : i32, i32
  }
  func.func @transform_1(%arg0: i32) -> (i32, i32) {
    %c0_i32 = arith.constant 0 : i32
    %c0_i32_0 = arith.constant 0 : i32
    %c0_i32_1 = arith.constant 0 : i32
    return %c0_i32, %c0_i32_0 : i32, i32
  }
  func.func @transform_2(%arg0: i32) -> (i32, i32) {
    %c0_i32 = arith.constant 0 : i32
    %c0_i32_0 = arith.constant 0 : i32
    return %arg0, %c0_i32 : i32, i32
  }
}

</mosaic_0001>

<bundles_post_ra>
// kernel: tile.43
= control target key start
LH: loop header
LB: loop body
LE: loop exit
PB: predicated region body
PF: predicated region fallthrough
CT: control target
= control target key end

     0   :  { %s28_s0 = inlined_call_operand.vmem [shape: f32[64], index: 0, kind: input, shape index: {}]   ;;  %s29_s1 = inlined_call_operand.vmem [shape: f32[16,64], index: 1, kind: output, shape index: {}]  }
   0x1   :  { %v4_v0 = vld [vmem:[%s28_s0] ss:$0 sm:$0xff] }
   0x2   :  { %5 = vst [vmem:[%s29_s1] sm:$0xff] %v4_v0  ;;  %8 = vst [vmem:[%s29_s1 + $0x8] sm:$0xff] %v4_v0 }

// kernel: tile.44
= control target key start
LH: loop header
LB: loop body
LE: loop exit
PB: predicated region body
PF: predicated region fallthrough
CT: control target
= control target key end

     0   :  { %vm3_vm0 = vcmask 523264   ;;  %vm10_vm1 = vcmask 1048064   ;;  %s125_s0 = inlined_call_operand.vmem [shape: f32[16,64], index: 0, kind: input, shape index: {}]   ;;  %s126_s1 = inlined_call_operand.vmem [shape: f32[1,1024], index: 1, kind: output, shape index: {}]  }
   0x1   :  { %v75_v0 = vld [vmem:[%s125_s0 + $0x1] ss:$2 sm:$0xff]   ;;  %v2_v1 = vld [vmem:[%s125_s0] ss:$2 sm:$0xff]   ;;  %s84_s0 = smov 64  }
   0x2   :  { %8 = vrot.lane.b32.xlu0 %v75_v0, %s84_s0  ;;  %4 = vst.msk [vmem:[#allocation0] ss:$8 sm:$0xf] %vm3_vm0, %v2_v1   ;;  %5 = vst.msk [vmem:[#allocation0] ss:$8 sm:$0xf0] %vm3_vm0, %v2_v1  }
  0x74   :  { %v9_v2 = vpop.permute.xlu0 %8  }
  0x75   :  { %11 = vst.msk [vmem:[#allocation0] ss:$8 sm:$0xf] %vm10_vm1, %v9_v2   ;;  %12 = vst.msk [vmem:[#allocation0] ss:$8 sm:$0xf0] %vm10_vm1, %v9_v2  }
  0x7c   :  { %v17_v3 = vld [vmem:[#allocation0] sm:$0x1]  ;;  %v22_v4 = vld [vmem:[#allocation0 + $0x8] sm:$0x1]  ;;  %v28_v5 = vld [vmem:[#allocation0 + $0x10] sm:$0x1] }
  0x7d   :  { %20 = vst [vmem:[%s126_s1] sm:$0x1] %v17_v3  ;;  %76 = vst [vmem:[%s126_s1 + $0x1] sm:$0x1] %v22_v4  ;;  %v35_v6 = vld [vmem:[#allocation0 + $0x18] sm:$0x1] }
  0x7e   :  { %77 = vst [vmem:[%s126_s1 + $0x2] sm:$0x1] %v28_v5  ;;  %v42_v7 = vld [vmem:[#allocation0 + $0x20] sm:$0x1]  ;;  %v49_v8 = vld [vmem:[#allocation0 + $0x28] sm:$0x1] }
  0x7f   :  { %78 = vst [vmem:[%s126_s1 + $0x3] sm:$0x1] %v35_v6  ;;  %79 = vst [vmem:[%s126_s1 + $0x4] sm:$0x1] %v42_v7  ;;  %v56_v9 = vld [vmem:[#allocation0 + $0x30] sm:$0x1] }
  0x80   :  { %80 = vst [vmem:[%s126_s1 + $0x5] sm:$0x1] %v49_v8  ;;  %v63_v10 = vld [vmem:[#allocation0 + $0x38] sm:$0x1]  ;;  %81 = vst [vmem:[%s126_s1 + $0x6] sm:$0x1] %v56_v9 }
  0x81   :  { %82 = vst [vmem:[%s126_s1 + $0x7] sm:$0x1] %v63_v10 }

// kernel: generator_forward.10
= control target key start
LH: loop header
LB: loop body
LE: loop exit
PB: predicated region body
PF: predicated region fallthrough
CT: control target
= control target key end

     0   :  { %v18_v0 = vlaneseq  ;;  %v169_v1 = vmov 1983009808   ;;  %s208_s1 = inlined_call_operand.vmem [shape: f32[1,1024], index: 1, kind: input, shape index: {}]   ;;  %s209_s2 = inlined_call_operand.vmem [shape: f32[1,1024], index: 2, kind: input, shape index: {}]   ;;  %s210_s0 = inlined_call_operand.vmem [shape: f32[2,1024], index: 0, kind: input, shape index: {}]   ;;  %s211_s3 = inlined_call_operand.vmem [shape: f32[2,1024], index: 3, kind: output, shape index: {}]  }
   0x1   :  { %v53_v2 = vunpack.c.l.s4 %v169_v1  ;;  %v16_v4 = vld [vmem:[%s208_s1] sm:$0xff]  ;;  %v15_v52 = vld [vmem:[%s210_s0 + $0x8] sm:$0xff] }
   0x2   :  { %v19_v3 = vshrl.u32 %v18_v0, 7  ;;  %v88_v10 = vld [vmem:[%s209_s2] sm:$0xff] }
   0x3   :  { %v54_v5 = vunpack.c.0.s8 %v53_v2  ;;  %v14_v35 = vld [vmem:[%s210_s0] sm:$0xff] }
   0x4   :  { %v20_v6 = vsub.s32 0, %v19_v3  ;;  %v24_v7 = vsub.s32 1, %v19_v3  ;;  %v28_v8 = vsub.s32 2, %v19_v3  ;;  %v32_v9 = vsub.s32 3, %v19_v3 }
   0x5   :  { %v57_v11 = vsub.s32 %v54_v5, %v19_v3  ;;  %v36_v12 = vsub.s32 4, %v19_v3  ;;  %v40_v13 = vsub.s32 5, %v19_v3  ;;  %v44_v14 = vsub.s32 6, %v19_v3 }
   0x6   :  { %v21_v15 = vrot.slane %v16_v4, %v20_v6  ;;  %v25_v16 = vrot.slane %v16_v4, %v24_v7  ;;  %v29_v17 = vrot.slane %v16_v4, %v28_v8  ;;  %v33_v18 = vrot.slane %v16_v4, %v32_v9 }
   0x7   :  { %v93_v19 = vrot.slane %v88_v10, %v20_v6  ;;  %v97_v20 = vrot.slane %v88_v10, %v24_v7  ;;  %v101_v21 = vrot.slane %v88_v10, %v28_v8  ;;  %v105_v22 = vrot.slane %v88_v10, %v32_v9 }
   0x8   :  { %v50_v23 = vcombine.low %v21_v15, %v25_v16  ;;  %v51_v24 = vcombine.low %v29_v17, %v33_v18  ;;  %v37_v25 = vrot.slane %v16_v4, %v36_v12  ;;  %v41_v26 = vrot.slane %v16_v4, %v40_v13 }
   0x9   :  { %v122_v27 = vcombine.low %v93_v19, %v97_v20  ;;  %v123_v28 = vcombine.low %v101_v21, %v105_v22  ;;  %v45_v29 = vrot.slane %v16_v4, %v44_v14  ;;  %v48_v30 = vsub.s32 7, %v19_v3 }
   0xa   :  { %v58_v31 = vrot.slane %v50_v23, %v57_v11  ;;  %v65_v32 = vrot.slane %v51_v24, %v57_v11  ;;  %v67_v33 = vcombine.low %v37_v25, %v41_v26  ;;  %v109_v34 = vrot.slane %v88_v10, %v36_v12 }
   0xb   :  { %v130_v36 = vrot.slane %v122_v27, %v57_v11  ;;  %v137_v37 = vrot.slane %v123_v28, %v57_v11  ;;  %v49_v38 = vrot.slane %v16_v4, %v48_v30  ;;  %v113_v39 = vrot.slane %v88_v10, %v40_v13 }
   0xc   :  { %v66_v40 = vcombine.low %v58_v31, %v65_v32  ;;  %v117_v41 = vrot.slane %v88_v10, %v44_v14  ;;  %v121_v42 = vrot.slane %v88_v10, %v48_v30  ;;  %v75_v45 = vrot.slane %v67_v33, %v57_v11 }
   0xd   :  { %v138_v43 = vcombine.low %v130_v36, %v137_v37  ;;  %v68_v44 = vcombine.low %v45_v29, %v49_v38  ;;  %v139_v46 = vcombine.low %v109_v34, %v113_v39 }
   0xe   :  { %v86_v47 = vmul.f32 %v66_v40, %v14_v35  ;;  %v140_v48 = vcombine.low %v117_v41, %v121_v42 }
   0xf   :  { %v82_v49 = vrot.slane %v68_v44, %v57_v11  ;;  %v147_v50 = vrot.slane %v139_v46, %v57_v11 }
  0x10   :  { %v158_v51 = vadd.f32 %v138_v43, %v86_v47  ;;  %v154_v53 = vrot.slane %v140_v48, %v57_v11 }
  0x11   :  { %v83_v54 = vcombine.low %v75_v45, %v82_v49 }
  0x12   :  { %v160_v55 = vmax.f32 %v158_v51, 0.0  ;;  %v155_v56 = vcombine.low %v147_v50, %v154_v53 }
  0x13   :  { %v87_v57 = vmul.f32 %v83_v54, %v15_v52 }
  0x14   :  { %162 = vst [vmem:[%s211_s3] sm:$0xff] %v160_v55 }
  0x15   :  { %v159_v58 = vadd.f32 %v155_v56, %v87_v57 }
  0x17   :  { %v161_v59 = vmax.f32 %v159_v58, 0.0 }
  0x19   :  { %163 = vst [vmem:[%s211_s3 + $0x8] sm:$0xff] %v161_v59 }

// kernel: generator_forward.9
= control target key start
LH: loop header
LB: loop body
LE: loop exit
PB: predicated region body
PF: predicated region fallthrough
CT: control target
= control target key end

     0   :  { %v631_v3 = vmov 0.0   ;;  %vm472_vm0 = vcmask 1041408   ;;  %s1139_s1 = inlined_call_operand.vmem [shape: f32[128,1024], index: 1, kind: input, shape index: {}]   ;;  %s1140_s0 = inlined_call_operand.vmem [shape: f32[2,128], index: 0, kind: input, shape index: {}]   ;;  %s1141_s2 = inlined_call_operand.vmem [shape: f32[2,1024], index: 2, kind: output, shape index: {0}]   ;;  %s1142_s3 = inlined_call_operand.vmem [shape: f32[8,1024], index: 3, kind: output, shape index: {1}]  }
   0x1   :  { %v135_v0 = vld [vmem:[%s1139_s1 + $0x3c8] sm:$0xff]  ;;  %v137_v1 = vld [vmem:[%s1139_s1 + $0x3d8] sm:$0xff]  ;;  %v134_v2 = vld [vmem:[%s1139_s1 + $0x3c0] sm:$0xff]  ;;  %206 = vmatprep.mubr.f32.mxu0 %v631_v3  ;;  %277 = vmatprep.mubr.f32.mxu1 %v631_v3 }
   0x2   :  { %142 = vmatprep.subr.mxu0 %v135_v0  ;;  %213 = vmatprep.subr.mxu1 %v137_v1  ;;  %v136_v4 = vld [vmem:[%s1139_s1 + $0x3d0] sm:$0xff]  ;;  %v127_v5 = vld [vmem:[%s1139_s1 + $0x388] sm:$0xff]  ;;  %v129_v6 = vld [vmem:[%s1139_s1 + $0x398] sm:$0xff] }
   0x3   :  { %143 = vmatpush1.msra.mxu0 %v134_v2  ;;  %214 = vmatpush1.msra.mxu1 %v136_v4  ;;  %v126_v7 = vld [vmem:[%s1139_s1 + $0x380] sm:$0xff]  ;;  %v128_v8 = vld [vmem:[%s1139_s1 + $0x390] sm:$0xff]  ;;  %v119_v9 = vld [vmem:[%s1139_s1 + $0x348] sm:$0xff] }
   0x4   :  { %144 = vmatprep.subr.mxu0 %v127_v5  ;;  %215 = vmatprep.subr.mxu1 %v129_v6  ;;  %v121_v10 = vld [vmem:[%s1139_s1 + $0x358] sm:$0xff]  ;;  %v118_v11 = vld [vmem:[%s1139_s1 + $0x340] sm:$0xff]  ;;  %v120_v12 = vld [vmem:[%s1139_s1 + $0x350] sm:$0xff] }
   0x5   :  { %145 = vmatpush1.msra.mxu0 %v126_v7  ;;  %216 = vmatpush1.msra.mxu1 %v128_v8  ;;  %v111_v13 = vld [vmem:[%s1139_s1 + $0x308] sm:$0xff]  ;;  %v113_v14 = vld [vmem:[%s1139_s1 + $0x318] sm:$0xff]  ;;  %v110_v15 = vld [vmem:[%s1139_s1 + $0x300] sm:$0xff] }
   0x6   :  { %146 = vmatprep.subr.mxu0 %v119_v9  ;;  %217 = vmatprep.subr.mxu1 %v121_v10  ;;  %v112_v16 = vld [vmem:[%s1139_s1 + $0x310] sm:$0xff]  ;;  %v103_v17 = vld [vmem:[%s1139_s1 + $0x2c8] sm:$0xff]  ;;  %v105_v18 = vld [vmem:[%s1139_s1 + $0x2d8] sm:$0xff] }
   0x7   :  { %147 = vmatpush1.msra.mxu0 %v118_v11  ;;  %218 = vmatpush1.msra.mxu1 %v120_v12  ;;  %v102_v19 = vld [vmem:[%s1139_s1 + $0x2c0] sm:$0xff]  ;;  %v104_v20 = vld [vmem:[%s1139_s1 + $0x2d0] sm:$0xff]  ;;  %v95_v21 = vld [vmem:[%s1139_s1 + $0x288] sm:$0xff] }
   0x8   :  { %148 = vmatprep.subr.mxu0 %v111_v13  ;;  %219 = vmatprep.subr.mxu1 %v113_v14  ;;  %v97_v22 = vld [vmem:[%s1139_s1 + $0x298] sm:$0xff]  ;;  %v94_v23 = vld [vmem:[%s1139_s1 + $0x280] sm:$0xff]  ;;  %v96_v24 = vld [vmem:[%s1139_s1 + $0x290] sm:$0xff] }
   0x9   :  { %149 = vmatpush1.msra.mxu0 %v110_v15  ;;  %220 = vmatpush1.msra.mxu1 %v112_v16  ;;  %v87_v25 = vld [vmem:[%s1139_s1 + $0x248] sm:$0xff]  ;;  %v89_v26 = vld [vmem:[%s1139_s1 + $0x258] sm:$0xff]  ;;  %v86_v27 = vld [vmem:[%s1139_s1 + $0x240] sm:$0xff] }
   0xa   :  { %150 = vmatprep.subr.mxu0 %v103_v17  ;;  %221 = vmatprep.subr.mxu1 %v105_v18  ;;  %v88_v28 = vld [vmem:[%s1139_s1 + $0x250] sm:$0xff]  ;;  %v79_v29 = vld [vmem:[%s1139_s1 + $0x208] sm:$0xff]  ;;  %v81_v30 = vld [vmem:[%s1139_s1 + $0x218] sm:$0xff] }
   0xb   :  { %151 = vmatpush1.msra.mxu0 %v102_v19  ;;  %222 = vmatpush1.msra.mxu1 %v104_v20  ;;  %v78_v31 = vld [vmem:[%s1139_s1 + $0x200] sm:$0xff]  ;;  %v80_v32 = vld [vmem:[%s1139_s1 + $0x210] sm:$0xff]  ;;  %v71_v33 = vld [vmem:[%s1139_s1 + $0x1c8] sm:$0xff] }
   0xc   :  { %152 = vmatprep.subr.mxu0 %v95_v21  ;;  %223 = vmatprep.subr.mxu1 %v97_v22  ;;  %v73_v34 = vld [vmem:[%s1139_s1 + $0x1d8] sm:$0xff]  ;;  %v70_v35 = vld [vmem:[%s1139_s1 + $0x1c0] sm:$0xff]  ;;  %v72_v36 = vld [vmem:[%s1139_s1 + $0x1d0] sm:$0xff] }
   0xd   :  { %153 = vmatpush1.msra.mxu0 %v94_v23  ;;  %224 = vmatpush1.msra.mxu1 %v96_v24  ;;  %v63_v37 = vld [vmem:[%s1139_s1 + $0x188] sm:$0xff]  ;;  %v65_v38 = vld [vmem:[%s1139_s1 + $0x198] sm:$0xff]  ;;  %v62_v39 = vld [vmem:[%s1139_s1 + $0x180] sm:$0xff] }
   0xe   :  { %154 = vmatprep.subr.mxu0 %v87_v25  ;;  %225 = vmatprep.subr.mxu1 %v89_v26  ;;  %v64_v40 = vld [vmem:[%s1139_s1 + $0x190] sm:$0xff]  ;;  %v55_v41 = vld [vmem:[%s1139_s1 + $0x148] sm:$0xff]  ;;  %v57_v42 = vld [vmem:[%s1139_s1 + $0x158] sm:$0xff] }
   0xf   :  { %155 = vmatpush1.msra.mxu0 %v86_v27  ;;  %226 = vmatpush1.msra.mxu1 %v88_v28  ;;  %v54_v43 = vld [vmem:[%s1139_s1 + $0x140] sm:$0xff]  ;;  %v56_v44 = vld [vmem:[%s1139_s1 + $0x150] sm:$0xff]  ;;  %v47_v45 = vld [vmem:[%s1139_s1 + $0x108] sm:$0xff] }
  0x10   :  { %156 = vmatprep.subr.mxu0 %v79_v29  ;;  %227 = vmatprep.subr.mxu1 %v81_v30  ;;  %v49_v46 = vld [vmem:[%s1139_s1 + $0x118] sm:$0xff]  ;;  %v46_v47 = vld [vmem:[%s1139_s1 + $0x100] sm:$0xff]  ;;  %v48_v48 = vld [vmem:[%s1139_s1 + $0x110] sm:$0xff] }
  0x11   :  { %157 = vmatpush1.msra.mxu0 %v78_v31  ;;  %228 = vmatpush1.msra.mxu1 %v80_v32  ;;  %v39_v49 = vld [vmem:[%s1139_s1 + $0xc8] sm:$0xff]  ;;  %v41_v50 = vld [vmem:[%s1139_s1 + $0xd8] sm:$0xff]  ;;  %v38_v51 = vld [vmem:[%s1139_s1 + $0xc0] sm:$0xff] }
  0x12   :  { %158 = vmatprep.subr.mxu0 %v71_v33  ;;  %229 = vmatprep.subr.mxu1 %v73_v34  ;;  %v40_v52 = vld [vmem:[%s1139_s1 + $0xd0] sm:$0xff]  ;;  %v31_v53 = vld [vmem:[%s1139_s1 + $0x88] sm:$0xff]  ;;  %v33_v54 = vld [vmem:[%s1139_s1 + $0x98] sm:$0xff] }
  0x13   :  { %159 = vmatpush1.msra.mxu0 %v70_v35  ;;  %230 = vmatpush1.msra.mxu1 %v72_v36  ;;  %v30_v55 = vld [vmem:[%s1139_s1 + $0x80] sm:$0xff]  ;;  %v32_v56 = vld [vmem:[%s1139_s1 + $0x90] sm:$0xff]  ;;  %v23_v57 = vld [vmem:[%s1139_s1 + $0x48] sm:$0xff] }
  0x14   :  { %160 = vmatprep.subr.mxu0 %v63_v37  ;;  %231 = vmatprep.subr.mxu1 %v65_v38  ;;  %v25_v58 = vld [vmem:[%s1139_s1 + $0x58] sm:$0xff]  ;;  %v22_v59 = vld [vmem:[%s1139_s1 + $0x40] sm:$0xff]  ;;  %v24_v60 = vld [vmem:[%s1139_s1 + $0x50] sm:$0xff] }
  0x15   :  { %161 = vmatpush1.msra.mxu0 %v62_v39  ;;  %232 = vmatpush1.msra.mxu1 %v64_v40  ;;  %v15_v61 = vld [vmem:[%s1139_s1 + $0x8] sm:$0xff]  ;;  %v17_v62 = vld [vmem:[%s1139_s1 + $0x18] sm:$0xff]  ;;  %v14_v63 = vld [vmem:[%s1139_s1] sm:$0xff] }
  0x16   :  { %162 = vmatprep.subr.mxu0 %v55_v41  ;;  %233 = vmatprep.subr.mxu1 %v57_v42  ;;  %v16_v0 = vld [vmem:[%s1139_s1 + $0x10] sm:$0xff]  ;;  %v850_v1 = vld [vmem:[%s1140_s0] sm:$0x3]  ;;  %v139_v2 = vld [vmem:[%s1139_s1 + $0x3e8] sm:$0xff] }
  0x17   :  { %163 = vmatpush1.msra.mxu0 %v54_v43  ;;  %234 = vmatpush1.msra.mxu1 %v56_v44  ;;  %v141_v4 = vld [vmem:[%s1139_s1 + $0x3f8] sm:$0xff]  ;;  %v138_v5 = vld [vmem:[%s1139_s1 + $0x3e0] sm:$0xff]  ;;  %v140_v6 = vld [vmem:[%s1139_s1 + $0x3f0] sm:$0xff] }
  0x18   :  { %164 = vmatprep.subr.mxu0 %v47_v45  ;;  %235 = vmatprep.subr.mxu1 %v49_v46  ;;  %v131_v7 = vld [vmem:[%s1139_s1 + $0x3a8] sm:$0xff]  ;;  %v133_v8 = vld [vmem:[%s1139_s1 + $0x3b8] sm:$0xff]  ;;  %v130_v9 = vld [vmem:[%s1139_s1 + $0x3a0] sm:$0xff] }
  0x19   :  { %165 = vmatpush1.msra.mxu0 %v46_v47  ;;  %236 = vmatpush1.msra.mxu1 %v48_v48  ;;  %v132_v10 = vld [vmem:[%s1139_s1 + $0x3b0] sm:$0xff]  ;;  %v123_v11 = vld [vmem:[%s1139_s1 + $0x368] sm:$0xff]  ;;  %v125_v12 = vld [vmem:[%s1139_s1 + $0x378] sm:$0xff] }
  0x1a   :  { %166 = vmatprep.subr.mxu0 %v39_v49  ;;  %237 = vmatprep.subr.mxu1 %v41_v50  ;;  %v122_v13 = vld [vmem:[%s1139_s1 + $0x360] sm:$0xff]  ;;  %v124_v14 = vld [vmem:[%s1139_s1 + $0x370] sm:$0xff]  ;;  %v115_v15 = vld [vmem:[%s1139_s1 + $0x328] sm:$0xff] }
  0x1b   :  { %167 = vmatpush1.msra.mxu0 %v38_v51  ;;  %238 = vmatpush1.msra.mxu1 %v40_v52  ;;  %v117_v16 = vld [vmem:[%s1139_s1 + $0x338] sm:$0xff]  ;;  %v114_v17 = vld [vmem:[%s1139_s1 + $0x320] sm:$0xff]  ;;  %v116_v18 = vld [vmem:[%s1139_s1 + $0x330] sm:$0xff] }
  0x1c   :  { %168 = vmatprep.subr.mxu0 %v31_v53  ;;  %239 = vmatprep.subr.mxu1 %v33_v54  ;;  %v107_v19 = vld [vmem:[%s1139_s1 + $0x2e8] sm:$0xff]  ;;  %v109_v20 = vld [vmem:[%s1139_s1 + $0x2f8] sm:$0xff]  ;;  %v106_v21 = vld [vmem:[%s1139_s1 + $0x2e0] sm:$0xff] }
  0x1d   :  { %169 = vmatpush1.msra.mxu0 %v30_v55  ;;  %240 = vmatpush1.msra.mxu1 %v32_v56  ;;  %v108_v22 = vld [vmem:[%s1139_s1 + $0x2f0] sm:$0xff]  ;;  %v99_v23 = vld [vmem:[%s1139_s1 + $0x2a8] sm:$0xff]  ;;  %v101_v24 = vld [vmem:[%s1139_s1 + $0x2b8] sm:$0xff] }
  0x1e   :  { %170 = vmatprep.subr.mxu0 %v23_v57  ;;  %241 = vmatprep.subr.mxu1 %v25_v58  ;;  %v98_v25 = vld [vmem:[%s1139_s1 + $0x2a0] sm:$0xff]  ;;  %v100_v26 = vld [vmem:[%s1139_s1 + $0x2b0] sm:$0xff]  ;;  %v91_v27 = vld [vmem:[%s1139_s1 + $0x268] sm:$0xff] }
  0x1f   :  { %171 = vmatpush1.msra.mxu0 %v22_v59  ;;  %242 = vmatpush1.msra.mxu1 %v24_v60  ;;  %v93_v28 = vld [vmem:[%s1139_s1 + $0x278] sm:$0xff]  ;;  %v90_v29 = vld [vmem:[%s1139_s1 + $0x260] sm:$0xff]  ;;  %v92_v30 = vld [vmem:[%s1139_s1 + $0x270] sm:$0xff] }
  0x20   :  { %172 = vmatprep.subr.mxu0 %v15_v61  ;;  %243 = vmatprep.subr.mxu1 %v17_v62  ;;  %v83_v31 = vld [vmem:[%s1139_s1 + $0x228] sm:$0xff]  ;;  %v85_v32 = vld [vmem:[%s1139_s1 + $0x238] sm:$0xff]  ;;  %v82_v33 = vld [vmem:[%s1139_s1 + $0x220] sm:$0xff] }
  0x21   :  { %173 = vmatpush1.msra.mxu0 %v14_v63  ;;  %244 = vmatpush1.msra.mxu1 %v16_v0  ;;  %v84_v34 = vld [vmem:[%s1139_s1 + $0x230] sm:$0xff]  ;;  %v75_v35 = vld [vmem:[%s1139_s1 + $0x1e8] sm:$0xff]  ;;  %v77_v36 = vld [vmem:[%s1139_s1 + $0x1f8] sm:$0xff] }
  0x22   :  { %207 = vmatmul.mubr.f32.vlgmr.msra.gmra.mxu0 %v850_v1  ;;  %278 = vmatmul.mubr.f32.vlgmr.msra.gmra.mxu1 %v850_v1  ;;  %v74_v37 = vld [vmem:[%s1139_s1 + $0x1e0] sm:$0xff]  ;;  %v76_v38 = vld [vmem:[%s1139_s1 + $0x1f0] sm:$0xff]  ;;  %v67_v39 = vld [vmem:[%s1139_s1 + $0x1a8] sm:$0xff] }
  0x23   :  { %284 = vmatprep.subr.mxu0 %v139_v2  ;;  %355 = vmatprep.subr.mxu1 %v141_v4  ;;  %v69_v40 = vld [vmem:[%s1139_s1 + $0x1b8] sm:$0xff]  ;;  %v66_v41 = vld [vmem:[%s1139_s1 + $0x1a0] sm:$0xff]  ;;  %v68_v42 = vld [vmem:[%s1139_s1 + $0x1b0] sm:$0xff] }
  0x24   :  { %285 = vmatpush1.msra.mxu0 %v138_v5  ;;  %356 = vmatpush1.msra.mxu1 %v140_v6  ;;  %v59_v43 = vld [vmem:[%s1139_s1 + $0x168] sm:$0xff]  ;;  %v61_v44 = vld [vmem:[%s1139_s1 + $0x178] sm:$0xff]  ;;  %v58_v45 = vld [vmem:[%s1139_s1 + $0x160] sm:$0xff]  ;;  %v439_v5 = vlaneseq  ;;  %v632_v6 = vmov 1983009808  }
  0x25   :  { %286 = vmatprep.subr.mxu0 %v131_v7  ;;  %357 = vmatprep.subr.mxu1 %v133_v8  ;;  %v60_v46 = vld [vmem:[%s1139_s1 + $0x170] sm:$0xff]  ;;  %v51_v47 = vld [vmem:[%s1139_s1 + $0x128] sm:$0xff]  ;;  %v53_v48 = vld [vmem:[%s1139_s1 + $0x138] sm:$0xff]  ;;  %v437_v7 = vunpack.c.l.s4 %v632_v6 }
  0x26   :  { %287 = vmatpush1.msra.mxu0 %v130_v9  ;;  %358 = vmatpush1.msra.mxu1 %v132_v10  ;;  %v50_v49 = vld [vmem:[%s1139_s1 + $0x120] sm:$0xff]  ;;  %v52_v50 = vld [vmem:[%s1139_s1 + $0x130] sm:$0xff]  ;;  %v43_v51 = vld [vmem:[%s1139_s1 + $0xe8] sm:$0xff]  ;;  %v1050_v8 = vshrl.u32 %v439_v5, 7 }
  0x27   :  { %288 = vmatprep.subr.mxu0 %v123_v11  ;;  %359 = vmatprep.subr.mxu1 %v125_v12  ;;  %v45_v52 = vld [vmem:[%s1139_s1 + $0xf8] sm:$0xff]  ;;  %v42_v53 = vld [vmem:[%s1139_s1 + $0xe0] sm:$0xff]  ;;  %v44_v54 = vld [vmem:[%s1139_s1 + $0xf0] sm:$0xff]  ;;  %v438_v9 = vunpack.c.0.s8 %v437_v7 }
  0x28   :  { %289 = vmatpush1.msra.mxu0 %v122_v13  ;;  %360 = vmatpush1.msra.mxu1 %v124_v14  ;;  %v35_v55 = vld [vmem:[%s1139_s1 + $0xa8] sm:$0xff]  ;;  %v37_v56 = vld [vmem:[%s1139_s1 + $0xb8] sm:$0xff]  ;;  %v34_v57 = vld [vmem:[%s1139_s1 + $0xa0] sm:$0xff]  ;;  %vm596_vm1 = vcmp.eq.s32.totalorder %v1050_v8, 1  ;;  %vm595_vm2 = vcmp.eq.s32.totalorder %v1050_v8, 0 }
  0x29   :  { %290 = vmatprep.subr.mxu0 %v115_v15  ;;  %361 = vmatprep.subr.mxu1 %v117_v16  ;;  %v36_v58 = vld [vmem:[%s1139_s1 + $0xb0] sm:$0xff]  ;;  %v27_v59 = vld [vmem:[%s1139_s1 + $0x68] sm:$0xff]  ;;  %v29_v60 = vld [vmem:[%s1139_s1 + $0x78] sm:$0xff]  ;;  %v1053_v12 = vsub.s32 %v438_v9, %v1050_v8 }
  0x2a   :  { %291 = vmatpush1.msra.mxu0 %v114_v17  ;;  %362 = vmatpush1.msra.mxu1 %v116_v18  ;;  %v26_v61 = vld [vmem:[%s1139_s1 + $0x60] sm:$0xff]  ;;  %v28_v62 = vld [vmem:[%s1139_s1 + $0x70] sm:$0xff]  ;;  %v19_v63 = vld [vmem:[%s1139_s1 + $0x28] sm:$0xff] }
  0x2b   :  { %292 = vmatprep.subr.mxu0 %v107_v19  ;;  %363 = vmatprep.subr.mxu1 %v109_v20  ;;  %v21_v0 = vld [vmem:[%s1139_s1 + $0x38] sm:$0xff]  ;;  %v18_v2 = vld [vmem:[%s1139_s1 + $0x20] sm:$0xff]  ;;  %v20_v4 = vld [vmem:[%s1139_s1 + $0x30] sm:$0xff] }
  0x2c   :  { %293 = vmatpush1.msra.mxu0 %v106_v21  ;;  %364 = vmatpush1.msra.mxu1 %v108_v22 }
  0x2d   :  { %294 = vmatprep.subr.mxu0 %v99_v23  ;;  %365 = vmatprep.subr.mxu1 %v101_v24 }
  0x2e   :  { %295 = vmatpush1.msra.mxu0 %v98_v25  ;;  %366 = vmatpush1.msra.mxu1 %v100_v26 }
  0x2f   :  { %296 = vmatprep.subr.mxu0 %v91_v27  ;;  %367 = vmatprep.subr.mxu1 %v93_v28 }
  0x30   :  { %297 = vmatpush1.msra.mxu0 %v90_v29  ;;  %368 = vmatpush1.msra.mxu1 %v92_v30 }
  0x31   :  { %298 = vmatprep.subr.mxu0 %v83_v31  ;;  %369 = vmatprep.subr.mxu1 %v85_v32 }
  0x32   :  { %299 = vmatpush1.msra.mxu0 %v82_v33  ;;  %370 = vmatpush1.msra.mxu1 %v84_v34 }
  0x33   :  { %300 = vmatprep.subr.mxu0 %v75_v35  ;;  %371 = vmatprep.subr.mxu1 %v77_v36 }
  0x34   :  { %301 = vmatpush1.msra.mxu0 %v74_v37  ;;  %372 = vmatpush1.msra.mxu1 %v76_v38 }
  0x35   :  { %302 = vmatprep.subr.mxu0 %v67_v39  ;;  %373 = vmatprep.subr.mxu1 %v69_v40 }
  0x36   :  { %303 = vmatpush1.msra.mxu0 %v66_v41  ;;  %374 = vmatpush1.msra.mxu1 %v68_v42 }
  0x37   :  { %304 = vmatprep.subr.mxu0 %v59_v43  ;;  %375 = vmatprep.subr.mxu1 %v61_v44 }
  0x38   :  { %305 = vmatpush1.msra.mxu0 %v58_v45  ;;  %376 = vmatpush1.msra.mxu1 %v60_v46 }
  0x39   :  { %306 = vmatprep.subr.mxu0 %v51_v47  ;;  %377 = vmatprep.subr.mxu1 %v53_v48 }
  0x3a   :  { %307 = vmatpush1.msra.mxu0 %v50_v49  ;;  %378 = vmatpush1.msra.mxu1 %v52_v50 }
  0x3b   :  { %308 = vmatprep.subr.mxu0 %v43_v51  ;;  %379 = vmatprep.subr.mxu1 %v45_v52 }
  0x3c   :  { %309 = vmatpush1.msra.mxu0 %v42_v53  ;;  %380 = vmatpush1.msra.mxu1 %v44_v54 }
  0x3d   :  { %310 = vmatprep.subr.mxu0 %v35_v55  ;;  %381 = vmatprep.subr.mxu1 %v37_v56 }
  0x3e   :  { %311 = vmatpush1.msra.mxu0 %v34_v57  ;;  %382 = vmatpush1.msra.mxu1 %v36_v58 }
  0x3f   :  { %312 = vmatprep.subr.mxu0 %v27_v59  ;;  %383 = vmatprep.subr.mxu1 %v29_v60 }
  0x40   :  { %313 = vmatpush1.msra.mxu0 %v26_v61  ;;  %384 = vmatpush1.msra.mxu1 %v28_v62 }
  0x41   :  { %314 = vmatprep.subr.mxu0 %v19_v63  ;;  %385 = vmatprep.subr.mxu1 %v21_v0 }
  0x42   :  { %315 = vmatpush1.msra.mxu0 %v18_v2  ;;  %348 = vmatprep.mubr.f32.mxu0 %v631_v3 }
  0x43   :  { %386 = vmatpush1.msra.mxu1 %v20_v4  ;;  %419 = vmatprep.mubr.f32.mxu1 %v631_v3 }
  0x44   :  { %349 = vmatmul.mubr.f32.vlgmr.msra.gmra.mxu0 %v850_v1  ;;  %420 = vmatmul.mubr.f32.vlgmr.msra.gmra.mxu1 %v850_v1 }
  0xe2   :  { %v208_v10 = vpop.f32.mrf.mxu0  ;;  %v279_v11 = vpop.f32.mrf.mxu1 }
  0xe3   :  { %v473_v13 = vsel %vm472_vm0, %v208_v10, 0.0  ;;  %v529_v14 = vmul.f32 %v208_v10, %v208_v10  ;;  %v487_v3 = vsel %vm472_vm0, %v279_v11, 0.0  ;;  %v531_v15 = vmul.f32 %v279_v11, %v279_v11 }
  0xe4   :  { %v474_v16 = vrot.slane %v473_v13, 4  ;;  %v488_v1 = vrot.slane %v487_v3, 4  ;;  %v210_v17 = vpop.f32.mrf.mxu0  ;;  %v281_v18 = vpop.f32.mrf.mxu1 }
  0xe5   :  { %v537_v19 = vsel %vm472_vm0, %v529_v14, 0.0  ;;  %v551_v20 = vsel %vm472_vm0, %v531_v15, 0.0  ;;  %v434_v21 = vcombine.low %v208_v10, %v210_v17  ;;  %v480_v22 = vsel %vm472_vm0, %v210_v17, 0.0 }
  0xe6   :  { %v475_v23 = vadd.f32 %v474_v16, %v473_v13  ;;  %v538_v24 = vrot.slane %v537_v19, 4  ;;  %v489_v25 = vadd.f32 %v488_v1, %v487_v3  ;;  %v552_v26 = vrot.slane %v551_v20, 4 }
  0xe7   :  { %v442_v27 = vrot.slane %v434_v21, %v1053_v12  ;;  %v481_v28 = vrot.slane %v480_v22, 4  ;;  %v530_v29 = vmul.f32 %v210_v17, %v210_v17  ;;  %v435_v30 = vcombine.low %v279_v11, %v281_v18 }
  0xe8   :  { %v476_v31 = vrot.slane %v475_v23, 2  ;;  %v539_v32 = vadd.f32 %v538_v24, %v537_v19  ;;  %v490_v33 = vrot.slane %v489_v25, 2  ;;  %v553_v34 = vadd.f32 %v552_v26, %v551_v20 }
  0xe9   :  { %v482_v35 = vadd.f32 %v481_v28, %v480_v22  ;;  %v544_v36 = vsel %vm472_vm0, %v530_v29, 0.0  ;;  %v449_v37 = vrot.slane %v435_v30, %v1053_v12  ;;  %v494_v38 = vsel %vm472_vm0, %v281_v18, 0.0 }
  0xea   :  { %v477_v39 = vadd.f32 %v476_v31, %v475_v23  ;;  %v540_v40 = vrot.slane %v539_v32, 2  ;;  %v491_v41 = vadd.f32 %v490_v33, %v489_v25  ;;  %v554_v42 = vrot.slane %v553_v34, 2 }
  0xeb   :  { %v483_v43 = vrot.slane %v482_v35, 2  ;;  %v545_v44 = vrot.slane %v544_v36, 4  ;;  %v450_v45 = vcombine.low %v442_v27, %v449_v37  ;;  %v495_v46 = vrot.slane %v494_v38, 4 }
  0xec   :  { %v478_v47 = vrot.slane %v477_v39, 1  ;;  %v541_v48 = vadd.f32 %v540_v40, %v539_v32  ;;  %v555_v49 = vadd.f32 %v554_v42, %v553_v34  ;;  %v492_v50 = vrot.slane %v491_v41, 1 }
  0xed   :  { %v546_v51 = vadd.f32 %v545_v44, %v544_v36  ;;  %v496_v52 = vadd.f32 %v495_v46, %v494_v38  ;;  %v532_v53 = vmul.f32 %v281_v18, %v281_v18  ;;  %470 = vst [vmem:[%s1141_s2] sm:$0xff] %v450_v45  ;;  %v484_v56 = vadd.f32 %v483_v43, %v482_v35 }
  0xee   :  { %v542_v54 = vrot.slane %v541_v48, 1  ;;  %v556_v55 = vrot.slane %v555_v49, 1  ;;  %v479_v63 = vadd.f32 %v478_v47, %v477_v39  ;;  %v493_v0 = vadd.f32 %v492_v50, %v491_v41 }
  0xef   :  { %v547_v57 = vrot.slane %v546_v51, 2  ;;  %v497_v58 = vrot.slane %v496_v52, 2  ;;  %v558_v59 = vsel %vm472_vm0, %v532_v53, 0.0  ;;  %v485_v6 = vrot.slane %v484_v56, 1 }
  0xf0   :  { %v543_v60 = vadd.f32 %v542_v54, %v541_v48  ;;  %v557_v61 = vadd.f32 %v556_v55, %v555_v49  ;;  %v559_v62 = vrot.slane %v558_v59, 4 }
  0xf1   :  { %v548_v2 = vadd.f32 %v547_v57, %v546_v51  ;;  %v498_v13 = vadd.f32 %v497_v58, %v496_v52  ;;  %v486_v15 = vadd.f32 %v485_v6, %v484_v56 }
  0xf2   :  { %v597_v4 = vsel %vm596_vm1, %v543_v60, 0.0  ;;  %v599_v5 = vsel %vm596_vm1, %v557_v61, 0.0  ;;  %v560_v7 = vadd.f32 %v559_v62, %v558_v59 }
  0xf3   :  { %v605_v9 = vsel %vm595_vm2, %v479_v63, %v597_v4  ;;  %v607_v10 = vsel %vm595_vm2, %v493_v0, %v599_v5  ;;  %v549_v11 = vrot.slane %v548_v2, 1  ;;  %v499_v17 = vrot.slane %v498_v13, 1 }
  0xf4   :  { %613 = vst [vmem:[%s1142_s3] sm:$0xff] %v605_v9  ;;  %615 = vst [vmem:[%s1142_s3 + $0x10] sm:$0xff] %v607_v10  ;;  %v561_v14 = vrot.slane %v560_v7, 2 }
  0xf5   :  { %v550_v3 = vadd.f32 %v549_v11, %v548_v2  ;;  %v500_v21 = vadd.f32 %v499_v17, %v498_v13 }
  0xf6   :  { %v562_v16 = vadd.f32 %v561_v14, %v560_v7 }
  0xf7   :  { %v598_v1 = vsel %vm596_vm1, %v550_v3, 0.0 }
  0xf8   :  { %v606_v18 = vsel %vm595_vm2, %v486_v15, %v598_v1  ;;  %v563_v19 = vrot.slane %v562_v16, 1 }
  0xf9   :  { %614 = vst [vmem:[%s1142_s3 + $0x8] sm:$0xff] %v606_v18 }
  0xfa   :  { %v564_v20 = vadd.f32 %v563_v19, %v562_v16 }
  0xfc   :  { %v600_v22 = vsel %vm596_vm1, %v564_v20, 0.0 }
  0xfd   :  { %v608_v23 = vsel %vm595_vm2, %v500_v21, %v600_v22 }
  0xfe   :  { %616 = vst [vmem:[%s1142_s3 + $0x18] sm:$0xff] %v608_v23 }
 0x104   :  { %v350_v24 = vpop.f32.mrf.mxu0  ;;  %v421_v25 = vpop.f32.mrf.mxu1 }
 0x105   :  { %v501_v26 = vsel %vm472_vm0, %v350_v24, 0.0  ;;  %v533_v27 = vmul.f32 %v350_v24, %v350_v24  ;;  %v515_v28 = vsel %vm472_vm0, %v421_v25, 0.0  ;;  %v535_v29 = vmul.f32 %v421_v25, %v421_v25 }
 0x106   :  { %v502_v30 = vrot.slane %v501_v26, 4  ;;  %v516_v31 = vrot.slane %v515_v28, 4  ;;  %v352_v32 = vpop.f32.mrf.mxu0  ;;  %v423_v33 = vpop.f32.mrf.mxu1 }
 0x107   :  { %v565_v34 = vsel %vm472_vm0, %v533_v27, 0.0  ;;  %v579_v35 = vsel %vm472_vm0, %v535_v29, 0.0  ;;  %v451_v36 = vcombine.low %v350_v24, %v352_v32  ;;  %v508_v37 = vsel %vm472_vm0, %v352_v32, 0.0 }
 0x108   :  { %v503_v38 = vadd.f32 %v502_v30, %v501_v26  ;;  %v566_v39 = vrot.slane %v565_v34, 4  ;;  %v517_v40 = vadd.f32 %v516_v31, %v515_v28  ;;  %v580_v41 = vrot.slane %v579_v35, 4 }
 0x109   :  { %v459_v42 = vrot.slane %v451_v36, %v1053_v12  ;;  %v509_v43 = vrot.slane %v508_v37, 4  ;;  %v534_v44 = vmul.f32 %v352_v32, %v352_v32  ;;  %v452_v45 = vcombine.low %v421_v25, %v423_v33 }
 0x10a   :  { %v504_v46 = vrot.slane %v503_v38, 2  ;;  %v567_v47 = vadd.f32 %v566_v39, %v565_v34  ;;  %v518_v48 = vrot.slane %v517_v40, 2  ;;  %v581_v49 = vadd.f32 %v580_v41, %v579_v35 }
 0x10b   :  { %v510_v50 = vadd.f32 %v509_v43, %v508_v37  ;;  %v572_v51 = vsel %vm472_vm0, %v534_v44, 0.0  ;;  %v466_v52 = vrot.slane %v452_v45, %v1053_v12  ;;  %v522_v53 = vsel %vm472_vm0, %v423_v33, 0.0 }
 0x10c   :  { %v505_v54 = vadd.f32 %v504_v46, %v503_v38  ;;  %v568_v55 = vrot.slane %v567_v47, 2  ;;  %v519_v56 = vadd.f32 %v518_v48, %v517_v40  ;;  %v582_v57 = vrot.slane %v581_v49, 2 }
 0x10d   :  { %v511_v58 = vrot.slane %v510_v50, 2  ;;  %v573_v59 = vrot.slane %v572_v51, 4  ;;  %v467_v60 = vcombine.low %v459_v42, %v466_v52  ;;  %v523_v61 = vrot.slane %v522_v53, 4 }
 0x10e   :  { %v506_v62 = vrot.slane %v505_v54, 1  ;;  %v569_v63 = vadd.f32 %v568_v55, %v567_v47  ;;  %v583_v0 = vadd.f32 %v582_v57, %v581_v49  ;;  %v520_v2 = vrot.slane %v519_v56, 1 }
 0x10f   :  { %v574_v4 = vadd.f32 %v573_v59, %v572_v51  ;;  %471 = vst [vmem:[%s1141_s2 + $0x8] sm:$0xff] %v467_v60  ;;  %v524_v12 = vadd.f32 %v523_v61, %v522_v53  ;;  %v536_v5 = vmul.f32 %v423_v33, %v423_v33  ;;  %v512_v9 = vadd.f32 %v511_v58, %v510_v50 }
 0x110   :  { %v570_v6 = vrot.slane %v569_v63, 1  ;;  %v584_v7 = vrot.slane %v583_v0, 1  ;;  %v507_v16 = vadd.f32 %v506_v62, %v505_v54  ;;  %v521_v1 = vadd.f32 %v520_v2, %v519_v56 }
 0x111   :  { %v575_v10 = vrot.slane %v574_v4, 2  ;;  %v525_v11 = vrot.slane %v524_v12, 2  ;;  %v586_v13 = vsel %vm472_vm0, %v536_v5, 0.0  ;;  %v513_v20 = vrot.slane %v512_v9, 1 }
 0x112   :  { %v571_v14 = vadd.f32 %v570_v6, %v569_v63  ;;  %v585_v3 = vadd.f32 %v584_v7, %v583_v0  ;;  %v587_v15 = vrot.slane %v586_v13, 4 }
 0x113   :  { %v576_v17 = vadd.f32 %v575_v10, %v574_v4  ;;  %v526_v25 = vadd.f32 %v525_v11, %v524_v12  ;;  %v514_v28 = vadd.f32 %v513_v20, %v512_v9 }
 0x114   :  { %v601_v18 = vsel %vm596_vm1, %v571_v14, 0.0  ;;  %v603_v19 = vsel %vm596_vm1, %v585_v3, 0.0  ;;  %v588_v21 = vadd.f32 %v587_v15, %v586_v13 }
 0x115   :  { %v609_v22 = vsel %vm595_vm2, %v507_v16, %v601_v18  ;;  %v611_v23 = vsel %vm595_vm2, %v521_v1, %v603_v19  ;;  %v577_v24 = vrot.slane %v576_v17, 1  ;;  %v527_v31 = vrot.slane %v526_v25, 1 }
 0x116   :  { %617 = vst [vmem:[%s1142_s3 + $0x20] sm:$0xff] %v609_v22  ;;  %619 = vst [vmem:[%s1142_s3 + $0x30] sm:$0xff] %v611_v23  ;;  %v589_v26 = vrot.slane %v588_v21, 2 }
 0x117   :  { %v578_v27 = vadd.f32 %v577_v24, %v576_v17  ;;  %v528_v35 = vadd.f32 %v527_v31, %v526_v25 }
 0x118   :  { %v590_v29 = vadd.f32 %v589_v26, %v588_v21 }
 0x119   :  { %v602_v30 = vsel %vm596_vm1, %v578_v27, 0.0 }
 0x11a   :  { %v610_v32 = vsel %vm595_vm2, %v514_v28, %v602_v30  ;;  %v591_v33 = vrot.slane %v590_v29, 1 }
 0x11b   :  { %618 = vst [vmem:[%s1142_s3 + $0x28] sm:$0xff] %v610_v32 }
 0x11c   :  { %v592_v34 = vadd.f32 %v591_v33, %v590_v29 }
 0x11e   :  { %v604_v36 = vsel %vm596_vm1, %v592_v34, 0.0 }
 0x11f   :  { %v612_v37 = vsel %vm595_vm2, %v528_v35, %v604_v36 }
 0x120   :  { %620 = vst [vmem:[%s1142_s3 + $0x38] sm:$0xff] %v612_v37 }

// kernel: tile.53
= control target key start
LH: loop header
LB: loop body
LE: loop exit
PB: predicated region body
PF: predicated region fallthrough
CT: control target
= control target key end

     0   :  { %s28_s0 = inlined_call_operand.vmem [shape: f32[32], index: 0, kind: input, shape index: {}]   ;;  %s29_s1 = inlined_call_operand.vmem [shape: f32[16,32], index: 1, kind: output, shape index: {}]  }
   0x1   :  { %v4_v0 = vld [vmem:[%s28_s0] ss:$0 sm:$0xff] }
   0x2   :  { %5 = vst [vmem:[%s29_s1] sm:$0xff] %v4_v0  ;;  %8 = vst [vmem:[%s29_s1 + $0x8] sm:$0xff] %v4_v0 }

// kernel: tile.54
= control target key start
LH: loop header
LB: loop body
LE: loop exit
PB: predicated region body
PF: predicated region fallthrough
CT: control target
= control target key end

     0   :  { %s62_s8 = smov 96   ;;  %vm3_vm0 = vcmask 261120   ;;  %s64_s15 = smov 64   ;;  %vm9_vm1 = vcmask 1048320   ;;  %vm15_vm2 = vcmask 785920   ;;  %vm21_vm3 = vcmask 523520   ;;  %s99_s0 = inlined_call_operand.vmem [shape: f32[16,32], index: 0, kind: input, shape index: {}]   ;;  %s100_s1 = inlined_call_operand.vmem [shape: f32[1,512], index: 1, kind: output, shape index: {}]  }
   0x1   :  { %v53_v0 = vld [vmem:[%s99_s0 + $0x3] ss:$4 sm:$0xf]   ;;  %v54_v1 = vld [vmem:[%s99_s0 + $0x2] ss:$4 sm:$0xf]  }
   0x2   :  { %7 = vrot.lane.b32.xlu0 %v53_v0, %s62_s8  ;;  %v55_v2 = vld [vmem:[%s99_s0 + $0x1] ss:$4 sm:$0xf]   ;;  %v2_v3 = vld [vmem:[%s99_s0] ss:$4 sm:$0xf]  }
   0x3   :  { %s63_s0 = smov 32   ;;  %4 = vst.msk [vmem:[#allocation0] ss:$8 sm:$0xf] %vm3_vm0, %v2_v3  }
   0x4   :  { %19 = vrot.lane.b32.xlu1 %v55_v2, %s63_s0 }
   0x6   :  { %13 = vrot.lane.b32.xlu0 %v54_v1, %s64_s15 }
  0x74   :  { %v8_v4 = vpop.permute.xlu0 %7  }
  0x75   :  { %10 = vst.msk [vmem:[#allocation0] ss:$8 sm:$0xf] %vm9_vm1, %v8_v4  }
  0x76   :  { %v20_v5 = vpop.permute.xlu1 %19  }
  0x78   :  { %v14_v6 = vpop.permute.xlu0 %13  }
  0x79   :  { %16 = vst.msk [vmem:[#allocation0] ss:$8 sm:$0xf] %vm15_vm2, %v14_v6  }
  0x7a   :  { %22 = vst.msk [vmem:[#allocation0] ss:$8 sm:$0xf] %vm21_vm3, %v20_v5  }
  0x81   :  { %v27_v7 = vld [vmem:[#allocation0] sm:$0x1]  ;;  %v32_v8 = vld [vmem:[#allocation0 + $0x8] sm:$0x1]  ;;  %v38_v9 = vld [vmem:[#allocation0 + $0x10] sm:$0x1] }
  0x82   :  { %30 = vst [vmem:[%s100_s1] sm:$0x1] %v27_v7  ;;  %56 = vst [vmem:[%s100_s1 + $0x1] sm:$0x1] %v32_v8  ;;  %v45_v10 = vld [vmem:[#allocation0 + $0x18] sm:$0x1] }
  0x83   :  { %57 = vst [vmem:[%s100_s1 + $0x2] sm:$0x1] %v38_v9  ;;  %58 = vst [vmem:[%s100_s1 + $0x3] sm:$0x1] %v45_v10 }

// kernel: generator_forward.11
= control target key start
LH: loop header
LB: loop body
LE: loop exit
PB: predicated region body
PF: predicated region fallthrough
CT: control target
= control target key end

     0   :  { %s922_s1 = inlined_call_operand.vmem [shape: f32[640,128], index: 1, kind: input, shape index: {}]   ;;  %s923_s0 = inlined_call_operand.vmem [shape: f32[32,640], index: 0, kind: input, shape index: {}]   ;;  %s924_s2 = inlined_call_operand.vmem [shape: f32[32,128], index: 2, kind: output, shape index: {0}]   ;;  %s925_s3 = inlined_call_operand.vmem [shape: f32[8,128], index: 3, kind: output, shape index: {1}]  }
   0x1   :  { %v64_v0 = vld [vmem:[%s922_s1 + $0xf8] sm:$0xff]  ;;  %v63_v4 = vld [vmem:[%s922_s1 + $0xf0] sm:$0xff]  ;;  %v62_v8 = vld [vmem:[%s922_s1 + $0xe8] sm:$0xff] }
   0x2   :  { %v96_v1 = vld [vmem:[%s922_s1 + $0x1f8] sm:$0xff]  ;;  %409 = vmatprep.subr.mxu0 %v64_v0  ;;  %v95_v5 = vld [vmem:[%s922_s1 + $0x1f0] sm:$0xff]  ;;  %v94_v9 = vld [vmem:[%s922_s1 + $0x1e8] sm:$0xff] }
   0x3   :  { %v48_v2 = vld [vmem:[%s922_s1 + $0x78] sm:$0xff]  ;;  %453 = vmatprep.subr.mxu1 %v96_v1  ;;  %v47_v6 = vld [vmem:[%s922_s1 + $0x70] sm:$0xff]  ;;  %v46_v10 = vld [vmem:[%s922_s1 + $0x68] sm:$0xff] }
   0x4   :  { %v80_v3 = vld [vmem:[%s922_s1 + $0x178] sm:$0xff]  ;;  %410 = vmatpush3.msra.mxu0 %v48_v2  ;;  %v79_v7 = vld [vmem:[%s922_s1 + $0x170] sm:$0xff]  ;;  %v78_v11 = vld [vmem:[%s922_s1 + $0x168] sm:$0xff] }
   0x5   :  { %454 = vmatpush3.msra.mxu1 %v80_v3  ;;  %411 = vmatprep.subr.mxu0 %v63_v4  ;;  %v61_v12 = vld [vmem:[%s922_s1 + $0xe0] sm:$0xff]  ;;  %v60_v16 = vld [vmem:[%s922_s1 + $0xd8] sm:$0xff]  ;;  %v59_v20 = vld [vmem:[%s922_s1 + $0xd0] sm:$0xff] }
   0x6   :  { %455 = vmatprep.subr.mxu1 %v95_v5  ;;  %412 = vmatpush3.msra.mxu0 %v47_v6  ;;  %v93_v13 = vld [vmem:[%s922_s1 + $0x1e0] sm:$0xff]  ;;  %v92_v17 = vld [vmem:[%s922_s1 + $0x1d8] sm:$0xff]  ;;  %v91_v21 = vld [vmem:[%s922_s1 + $0x1d0] sm:$0xff] }
   0x7   :  { %456 = vmatpush3.msra.mxu1 %v79_v7  ;;  %413 = vmatprep.subr.mxu0 %v62_v8  ;;  %v45_v14 = vld [vmem:[%s922_s1 + $0x60] sm:$0xff]  ;;  %v44_v18 = vld [vmem:[%s922_s1 + $0x58] sm:$0xff]  ;;  %v43_v22 = vld [vmem:[%s922_s1 + $0x50] sm:$0xff] }
   0x8   :  { %457 = vmatprep.subr.mxu1 %v94_v9  ;;  %v77_v15 = vld [vmem:[%s922_s1 + $0x160] sm:$0xff]  ;;  %414 = vmatpush3.msra.mxu0 %v46_v10  ;;  %v76_v19 = vld [vmem:[%s922_s1 + $0x158] sm:$0xff]  ;;  %v75_v23 = vld [vmem:[%s922_s1 + $0x150] sm:$0xff] }
   0x9   :  { %458 = vmatpush3.msra.mxu1 %v78_v11  ;;  %415 = vmatprep.subr.mxu0 %v61_v12  ;;  %v58_v24 = vld [vmem:[%s922_s1 + $0xc8] sm:$0xff]  ;;  %v57_v28 = vld [vmem:[%s922_s1 + $0xc0] sm:$0xff]  ;;  %v56_v32 = vld [vmem:[%s922_s1 + $0xb8] sm:$0xff] }
   0xa   :  { %459 = vmatprep.subr.mxu1 %v93_v13  ;;  %416 = vmatpush3.msra.mxu0 %v45_v14  ;;  %v90_v25 = vld [vmem:[%s922_s1 + $0x1c8] sm:$0xff]  ;;  %v89_v29 = vld [vmem:[%s922_s1 + $0x1c0] sm:$0xff]  ;;  %v88_v33 = vld [vmem:[%s922_s1 + $0x1b8] sm:$0xff] }
   0xb   :  { %460 = vmatpush3.msra.mxu1 %v77_v15  ;;  %417 = vmatprep.subr.mxu0 %v60_v16  ;;  %v42_v26 = vld [vmem:[%s922_s1 + $0x48] sm:$0xff]  ;;  %v41_v30 = vld [vmem:[%s922_s1 + $0x40] sm:$0xff]  ;;  %v40_v34 = vld [vmem:[%s922_s1 + $0x38] sm:$0xff] }
   0xc   :  { %461 = vmatprep.subr.mxu1 %v92_v17  ;;  %418 = vmatpush3.msra.mxu0 %v44_v18  ;;  %v74_v27 = vld [vmem:[%s922_s1 + $0x148] sm:$0xff]  ;;  %v73_v31 = vld [vmem:[%s922_s1 + $0x140] sm:$0xff]  ;;  %v72_v35 = vld [vmem:[%s922_s1 + $0x138] sm:$0xff] }
   0xd   :  { %462 = vmatpush3.msra.mxu1 %v76_v19  ;;  %419 = vmatprep.subr.mxu0 %v59_v20  ;;  %v55_v36 = vld [vmem:[%s922_s1 + $0xb0] sm:$0xff]  ;;  %v54_v40 = vld [vmem:[%s922_s1 + $0xa8] sm:$0xff]  ;;  %v53_v44 = vld [vmem:[%s922_s1 + $0xa0] sm:$0xff] }
   0xe   :  { %463 = vmatprep.subr.mxu1 %v91_v21  ;;  %420 = vmatpush3.msra.mxu0 %v43_v22  ;;  %v87_v37 = vld [vmem:[%s922_s1 + $0x1b0] sm:$0xff]  ;;  %v86_v41 = vld [vmem:[%s922_s1 + $0x1a8] sm:$0xff]  ;;  %v85_v45 = vld [vmem:[%s922_s1 + $0x1a0] sm:$0xff] }
   0xf   :  { %464 = vmatpush3.msra.mxu1 %v75_v23  ;;  %421 = vmatprep.subr.mxu0 %v58_v24  ;;  %v39_v38 = vld [vmem:[%s922_s1 + $0x30] sm:$0xff]  ;;  %v38_v42 = vld [vmem:[%s922_s1 + $0x28] sm:$0xff]  ;;  %v37_v46 = vld [vmem:[%s922_s1 + $0x20] sm:$0xff] }
  0x10   :  { %465 = vmatprep.subr.mxu1 %v90_v25  ;;  %422 = vmatpush3.msra.mxu0 %v42_v26  ;;  %v71_v39 = vld [vmem:[%s922_s1 + $0x130] sm:$0xff]  ;;  %v70_v43 = vld [vmem:[%s922_s1 + $0x128] sm:$0xff]  ;;  %v69_v47 = vld [vmem:[%s922_s1 + $0x120] sm:$0xff] }
  0x11   :  { %466 = vmatpush3.msra.mxu1 %v74_v27  ;;  %423 = vmatprep.subr.mxu0 %v57_v28  ;;  %v52_v48 = vld [vmem:[%s922_s1 + $0x98] sm:$0xff]  ;;  %v51_v52 = vld [vmem:[%s922_s1 + $0x90] sm:$0xff]  ;;  %v50_v56 = vld [vmem:[%s922_s1 + $0x88] sm:$0xff] }
  0x12   :  { %467 = vmatprep.subr.mxu1 %v89_v29  ;;  %424 = vmatpush3.msra.mxu0 %v41_v30  ;;  %v84_v49 = vld [vmem:[%s922_s1 + $0x198] sm:$0xff]  ;;  %v83_v53 = vld [vmem:[%s922_s1 + $0x190] sm:$0xff]  ;;  %v82_v57 = vld [vmem:[%s922_s1 + $0x188] sm:$0xff] }
  0x13   :  { %468 = vmatpush3.msra.mxu1 %v73_v31  ;;  %425 = vmatprep.subr.mxu0 %v56_v32  ;;  %v36_v50 = vld [vmem:[%s922_s1 + $0x18] sm:$0xff]  ;;  %v35_v54 = vld [vmem:[%s922_s1 + $0x10] sm:$0xff]  ;;  %v34_v58 = vld [vmem:[%s922_s1 + $0x8] sm:$0xff] }
  0x14   :  { %469 = vmatprep.subr.mxu1 %v88_v33  ;;  %426 = vmatpush3.msra.mxu0 %v40_v34  ;;  %v68_v51 = vld [vmem:[%s922_s1 + $0x118] sm:$0xff]  ;;  %v67_v55 = vld [vmem:[%s922_s1 + $0x110] sm:$0xff]  ;;  %v66_v59 = vld [vmem:[%s922_s1 + $0x108] sm:$0xff] }
  0x15   :  { %470 = vmatpush3.msra.mxu1 %v72_v35  ;;  %427 = vmatprep.subr.mxu0 %v55_v36  ;;  %v49_v60 = vld [vmem:[%s922_s1 + $0x80] sm:$0xff]  ;;  %v14_v63 = vld [vmem:[%s923_s0 + $0x8] sm:$0xff]  ;;  %v16_v1 = vld [vmem:[%s923_s0 + $0x18] sm:$0xff] }
  0x16   :  { %471 = vmatprep.subr.mxu1 %v87_v37  ;;  %428 = vmatpush3.msra.mxu0 %v39_v38  ;;  %v81_v61 = vld [vmem:[%s922_s1 + $0x180] sm:$0xff]  ;;  %v15_v3 = vld [vmem:[%s923_s0 + $0x10] sm:$0xff]  ;;  %v112_v4 = vld [vmem:[%s922_s1 + $0x278] sm:$0xff] }
  0x17   :  { %472 = vmatpush3.msra.mxu1 %v71_v39  ;;  %429 = vmatprep.subr.mxu0 %v54_v40  ;;  %v33_v62 = vld [vmem:[%s922_s1] sm:$0xff]  ;;  %v111_v5 = vld [vmem:[%s922_s1 + $0x270] sm:$0xff]  ;;  %v110_v6 = vld [vmem:[%s922_s1 + $0x268] sm:$0xff] }
  0x18   :  { %473 = vmatprep.subr.mxu1 %v86_v41  ;;  %430 = vmatpush3.msra.mxu0 %v38_v42  ;;  %v65_v0 = vld [vmem:[%s922_s1 + $0x100] sm:$0xff]  ;;  %v108_v8 = vld [vmem:[%s922_s1 + $0x258] sm:$0xff]  ;;  %v107_v9 = vld [vmem:[%s922_s1 + $0x250] sm:$0xff] }
  0x19   :  { %474 = vmatpush3.msra.mxu1 %v70_v43  ;;  %431 = vmatprep.subr.mxu0 %v53_v44  ;;  %v13_v2 = vld [vmem:[%s923_s0] sm:$0xff]  ;;  %v106_v10 = vld [vmem:[%s922_s1 + $0x248] sm:$0xff]  ;;  %v104_v12 = vld [vmem:[%s922_s1 + $0x238] sm:$0xff] }
  0x1a   :  { %475 = vmatprep.subr.mxu1 %v85_v45  ;;  %432 = vmatpush3.msra.mxu0 %v37_v46  ;;  %v109_v7 = vld [vmem:[%s922_s1 + $0x260] sm:$0xff]  ;;  %v19_v13 = vld [vmem:[%s923_s0 + $0x30] sm:$0xff]  ;;  %v18_v15 = vld [vmem:[%s923_s0 + $0x28] sm:$0xff] }
  0x1b   :  { %476 = vmatpush3.msra.mxu1 %v69_v47  ;;  %433 = vmatprep.subr.mxu0 %v52_v48  ;;  %v105_v11 = vld [vmem:[%s922_s1 + $0x240] sm:$0xff]  ;;  %v20_v16 = vld [vmem:[%s923_s0 + $0x38] sm:$0xff]  ;;  %v103_v17 = vld [vmem:[%s922_s1 + $0x230] sm:$0xff] }
  0x1c   :  { %477 = vmatprep.subr.mxu1 %v84_v49  ;;  %434 = vmatpush3.msra.mxu0 %v36_v50  ;;  %v21_v14 = vld [vmem:[%s923_s0 + $0x40] sm:$0xff]  ;;  %v102_v18 = vld [vmem:[%s922_s1 + $0x228] sm:$0xff]  ;;  %v24_v19 = vld [vmem:[%s923_s0 + $0x58] sm:$0xff] }
  0x1d   :  { %478 = vmatpush3.msra.mxu1 %v68_v51  ;;  %435 = vmatprep.subr.mxu0 %v51_v52  ;;  %v26_v20 = vld [vmem:[%s923_s0 + $0x68] sm:$0xff]  ;;  %v23_v21 = vld [vmem:[%s923_s0 + $0x50] sm:$0xff]  ;;  %v25_v22 = vld [vmem:[%s923_s0 + $0x60] sm:$0xff] }
  0x1e   :  { %479 = vmatprep.subr.mxu1 %v83_v53  ;;  %436 = vmatpush3.msra.mxu0 %v35_v54  ;;  %v101_v23 = vld [vmem:[%s922_s1 + $0x220] sm:$0xff]  ;;  %v100_v24 = vld [vmem:[%s922_s1 + $0x218] sm:$0xff]  ;;  %v31_v26 = vld [vmem:[%s923_s0 + $0x90] sm:$0xff] }
  0x1f   :  { %480 = vmatpush3.msra.mxu1 %v67_v55  ;;  %437 = vmatprep.subr.mxu0 %v50_v56  ;;  %v29_v25 = vld [vmem:[%s923_s0 + $0x80] sm:$0xff]  ;;  %v28_v27 = vld [vmem:[%s923_s0 + $0x78] sm:$0xff]  ;;  %v30_v28 = vld [vmem:[%s923_s0 + $0x88] sm:$0xff] }
  0x20   :  { %481 = vmatprep.subr.mxu1 %v82_v57  ;;  %438 = vmatpush3.msra.mxu0 %v34_v58  ;;  %v99_v29 = vld [vmem:[%s922_s1 + $0x210] sm:$0xff]  ;;  %v98_v30 = vld [vmem:[%s922_s1 + $0x208] sm:$0xff]  ;;  %v97_v31 = vld [vmem:[%s922_s1 + $0x200] sm:$0xff] }
  0x21   :  { %482 = vmatpush3.msra.mxu1 %v66_v59  ;;  %439 = vmatprep.subr.mxu0 %v49_v60  ;;  %v17_v32 = vld [vmem:[%s923_s0 + $0x20] sm:$0xff]  ;;  %v27_v33 = vld [vmem:[%s923_s0 + $0x70] sm:$0xff]  ;;  %v22_v34 = vld [vmem:[%s923_s0 + $0x48] sm:$0xff] }
  0x22   :  { %483 = vmatprep.subr.mxu1 %v81_v61  ;;  %440 = vmatpush3.msra.mxu0 %v33_v62  ;;  %v32_v35 = vld [vmem:[%s923_s0 + $0x98] sm:$0xff] }
  0x23   :  { %177 = vmatprep.mubr.f32.mxu0 %v14_v63  ;;  %484 = vmatpush3.msra.mxu1 %v65_v0 }
  0x24   :  { %262 = vmatprep.mubr.f32.mxu1 %v16_v1  ;;  %178 = vmatmul.mubr.f32.vlgmr.msra.gmra.mxu0 %v13_v2 }
  0x25   :  { %263 = vmatmul.mubr.f32.vlgmr.msra.gmra.mxu1 %v15_v3  ;;  %517 = vmatprep.subr.mxu0 %v112_v4 }
  0x26   :  { %555 = vmatprep.subr.mxu1 %v112_v4  ;;  %518 = vmatpush3.msra.mxu0 %v112_v4 }
  0x27   :  { %571 = vmatpush3.msra.mxu1 %v112_v4  ;;  %519 = vmatprep.subr.mxu0 %v111_v5 }
  0x28   :  { %556 = vmatprep.subr.mxu1 %v111_v5  ;;  %520 = vmatpush3.msra.mxu0 %v111_v5 }
  0x29   :  { %572 = vmatpush3.msra.mxu1 %v111_v5  ;;  %521 = vmatprep.subr.mxu0 %v110_v6 }
  0x2a   :  { %557 = vmatprep.subr.mxu1 %v110_v6  ;;  %522 = vmatpush3.msra.mxu0 %v110_v6 }
  0x2b   :  { %573 = vmatpush3.msra.mxu1 %v110_v6  ;;  %523 = vmatprep.subr.mxu0 %v109_v7 }
  0x2c   :  { %558 = vmatprep.subr.mxu1 %v109_v7  ;;  %524 = vmatpush3.msra.mxu0 %v109_v7 }
  0x2d   :  { %574 = vmatpush3.msra.mxu1 %v109_v7  ;;  %525 = vmatprep.subr.mxu0 %v108_v8 }
  0x2e   :  { %559 = vmatprep.subr.mxu1 %v108_v8  ;;  %526 = vmatpush3.msra.mxu0 %v108_v8 }
  0x2f   :  { %575 = vmatpush3.msra.mxu1 %v108_v8  ;;  %527 = vmatprep.subr.mxu0 %v107_v9 }
  0x30   :  { %560 = vmatprep.subr.mxu1 %v107_v9  ;;  %528 = vmatpush3.msra.mxu0 %v107_v9 }
  0x31   :  { %576 = vmatpush3.msra.mxu1 %v107_v9  ;;  %529 = vmatprep.subr.mxu0 %v106_v10 }
  0x32   :  { %561 = vmatprep.subr.mxu1 %v106_v10  ;;  %530 = vmatpush3.msra.mxu0 %v106_v10 }
  0x33   :  { %577 = vmatpush3.msra.mxu1 %v106_v10  ;;  %531 = vmatprep.subr.mxu0 %v105_v11 }
  0x34   :  { %562 = vmatprep.subr.mxu1 %v105_v11  ;;  %532 = vmatpush3.msra.mxu0 %v105_v11 }
  0x35   :  { %578 = vmatpush3.msra.mxu1 %v105_v11  ;;  %533 = vmatprep.subr.mxu0 %v104_v12 }
  0x36   :  { %563 = vmatprep.subr.mxu1 %v104_v12  ;;  %182 = vmatprep.mubr.f32.mxu0 %v19_v13 }
  0x37   :  { %267 = vmatprep.mubr.f32.mxu1 %v21_v14  ;;  %534 = vmatpush3.msra.mxu0 %v104_v12 }
  0x38   :  { %579 = vmatpush3.msra.mxu1 %v104_v12  ;;  %183 = vmatmul.mubr.f32.gmra.mxu0 %v18_v15 }
  0x39   :  { %268 = vmatmul.mubr.f32.gmra.mxu1 %v20_v16  ;;  %535 = vmatprep.subr.mxu0 %v103_v17 }
  0x3a   :  { %564 = vmatprep.subr.mxu1 %v103_v17  ;;  %536 = vmatpush3.msra.mxu0 %v103_v17 }
  0x3b   :  { %580 = vmatpush3.msra.mxu1 %v103_v17  ;;  %537 = vmatprep.subr.mxu0 %v102_v18 }
  0x3c   :  { %565 = vmatprep.subr.mxu1 %v102_v18  ;;  %187 = vmatprep.mubr.f32.mxu0 %v24_v19 }
  0x3d   :  { %272 = vmatprep.mubr.f32.mxu1 %v26_v20  ;;  %538 = vmatpush3.msra.mxu0 %v102_v18 }
  0x3e   :  { %581 = vmatpush3.msra.mxu1 %v102_v18  ;;  %188 = vmatmul.mubr.f32.gmra.mxu0 %v23_v21  ;;  %v394_v21 = vlaneseq }
  0x3f   :  { %273 = vmatmul.mubr.f32.gmra.mxu1 %v25_v22  ;;  %539 = vmatprep.subr.mxu0 %v101_v23 }
  0x40   :  { %566 = vmatprep.subr.mxu1 %v101_v23  ;;  %540 = vmatpush3.msra.mxu0 %v101_v23 }
  0x41   :  { %582 = vmatpush3.msra.mxu1 %v101_v23  ;;  %541 = vmatprep.subr.mxu0 %v100_v24 }
  0x42   :  { %567 = vmatprep.subr.mxu1 %v100_v24  ;;  %192 = vmatprep.mubr.f32.mxu0 %v29_v25 }
  0x43   :  { %277 = vmatprep.mubr.f32.mxu1 %v31_v26  ;;  %542 = vmatpush3.msra.mxu0 %v100_v24  ;;  %v395_v26 = vshrl.u32 %v394_v21, 7 }
  0x44   :  { %583 = vmatpush3.msra.mxu1 %v100_v24  ;;  %193 = vmatmul.mubr.f32.gmra.mxu0 %v28_v27 }
  0x45   :  { %278 = vmatmul.mubr.f32.gmra.mxu1 %v30_v28  ;;  %543 = vmatprep.subr.mxu0 %v99_v29  ;;  %vm397_vm0 = vcmp.eq.s32.totalorder %v395_v26, 1  ;;  %vm396_vm1 = vcmp.eq.s32.totalorder %v395_v26, 0 }
  0x46   :  { %568 = vmatprep.subr.mxu1 %v99_v29  ;;  %544 = vmatpush3.msra.mxu0 %v99_v29 }
  0x47   :  { %584 = vmatpush3.msra.mxu1 %v99_v29  ;;  %545 = vmatprep.subr.mxu0 %v98_v30 }
  0x48   :  { %569 = vmatprep.subr.mxu1 %v98_v30  ;;  %546 = vmatpush3.msra.mxu0 %v98_v30 }
  0x49   :  { %585 = vmatpush3.msra.mxu1 %v98_v30  ;;  %547 = vmatprep.subr.mxu0 %v97_v31 }
  0x4a   :  { %570 = vmatprep.subr.mxu1 %v97_v31  ;;  %548 = vmatpush3.msra.mxu0 %v97_v31 }
  0x4b   :  { %586 = vmatpush3.msra.mxu1 %v97_v31  ;;  %549 = vmatprep.mubr.f32.mxu0 %v17_v32 }
  0x4c   :  { %552 = vmatprep.mubr.f32.mxu1 %v27_v33  ;;  %550 = vmatmul.mubr.f32.vlgmr.msra.gmra.mxu0 %v22_v34 }
  0x4d   :  { %553 = vmatmul.mubr.f32.vlgmr.msra.gmra.mxu1 %v32_v35 }
  0xe4   :  { %v441_v36 = vpop.f32.mrf.mxu0 }
  0xe5   :  { %v485_v37 = vpop.f32.mrf.mxu1 }
  0xe6   :  { %v442_v38 = vpop.f32.mrf.mxu0 }
  0xe7   :  { %v486_v39 = vpop.f32.mrf.mxu1  ;;  %v443_v56 = vadd.f32 %v442_v38, %v441_v36 }
  0xe8   :  { %v487_v57 = vadd.f32 %v486_v39, %v485_v37 }
  0xea   :  { %v265_v2 = vadd.f32 %v487_v57, %v443_v56 }
  0xf8   :  { %v444_v40 = vpop.f32.mrf.mxu0 }
  0xf9   :  { %v488_v41 = vpop.f32.mrf.mxu1 }
  0xfa   :  { %v445_v42 = vpop.f32.mrf.mxu0 }
  0xfb   :  { %v489_v43 = vpop.f32.mrf.mxu1  ;;  %v446_v52 = vadd.f32 %v445_v42, %v444_v40 }
  0xfc   :  { %v490_v53 = vadd.f32 %v489_v43, %v488_v41 }
  0xfe   :  { %v447_v44 = vpop.f32.mrf.mxu0  ;;  %v270_v61 = vadd.f32 %v490_v53, %v446_v52 }
  0xff   :  { %v491_v45 = vpop.f32.mrf.mxu1 }
 0x100   :  { %v448_v46 = vpop.f32.mrf.mxu0 }
 0x101   :  { %v492_v47 = vpop.f32.mrf.mxu1  ;;  %v449_v58 = vadd.f32 %v448_v46, %v447_v44 }
 0x102   :  { %v493_v59 = vadd.f32 %v492_v47, %v491_v45 }
 0x104   :  { %v450_v48 = vpop.f32.mrf.mxu0  ;;  %v275_v3 = vadd.f32 %v493_v59, %v449_v58 }
 0x105   :  { %v494_v49 = vpop.f32.mrf.mxu1 }
 0x106   :  { %v451_v50 = vpop.f32.mrf.mxu0 }
 0x107   :  { %v495_v51 = vpop.f32.mrf.mxu1  ;;  %v452_v54 = vadd.f32 %v451_v50, %v450_v48 }
 0x108   :  { %v496_v55 = vadd.f32 %v495_v51, %v494_v49 }
 0x10a   :  { %v280_v60 = vadd.f32 %v496_v55, %v452_v54 }
 0x10c   :  { %v551_v62 = vpop.f32.mrf.mxu0 }
 0x10d   :  { %v554_v63 = vpop.f32.mrf.mxu1  ;;  %v355_v0 = vadd.f32 %v551_v62, %v270_v61 }
 0x10e   :  { %v365_v1 = vadd.f32 %v554_v63, %v280_v60  ;;  %v349_v4 = vpop.f32.mrf.mxu0 }
 0x10f   :  { %v359_v5 = vpop.f32.mrf.mxu1  ;;  %369 = vst [vmem:[%s924_s2 + $0x8] sm:$0xff] %v355_v0  ;;  %v350_v6 = vadd.f32 %v349_v4, %v265_v2  ;;  %v382_v8 = vmul.f32 %v355_v0, %v355_v0 }
 0x110   :  { %371 = vst [vmem:[%s924_s2 + $0x18] sm:$0xff] %v365_v1  ;;  %v360_v7 = vadd.f32 %v359_v5, %v275_v3  ;;  %v384_v14 = vmul.f32 %v365_v1, %v365_v1 }
 0x111   :  { %368 = vst [vmem:[%s924_s2] sm:$0xff] %v350_v6  ;;  %v372_v9 = vadd.f32 %v355_v0, %v350_v6  ;;  %v381_v10 = vmul.f32 %v350_v6, %v350_v6 }
 0x112   :  { %370 = vst [vmem:[%s924_s2 + $0x10] sm:$0xff] %v360_v7  ;;  %v383_v13 = vmul.f32 %v360_v7, %v360_v7 }
 0x113   :  { %v385_v11 = vadd.f32 %v382_v8, %v381_v10  ;;  %v373_v12 = vadd.f32 %v372_v9, %v360_v7 }
 0x115   :  { %v374_v15 = vadd.f32 %v373_v12, %v365_v1  ;;  %v386_v16 = vadd.f32 %v385_v11, %v383_v13 }
 0x117   :  { %v375_v17 = vrot.slane %v374_v15, 4  ;;  %v387_v18 = vadd.f32 %v386_v16, %v384_v14 }
 0x119   :  { %v376_v19 = vadd.f32 %v375_v17, %v374_v15  ;;  %v388_v20 = vrot.slane %v387_v18, 4 }
 0x11b   :  { %v377_v22 = vrot.slane %v376_v19, 2  ;;  %v389_v23 = vadd.f32 %v388_v20, %v387_v18 }
 0x11d   :  { %v378_v24 = vadd.f32 %v377_v22, %v376_v19  ;;  %v390_v25 = vrot.slane %v389_v23, 2 }
 0x11f   :  { %v391_v27 = vadd.f32 %v390_v25, %v389_v23  ;;  %v379_v28 = vrot.slane %v378_v24, 1 }
 0x121   :  { %v392_v29 = vrot.slane %v391_v27, 1  ;;  %v380_v31 = vadd.f32 %v379_v28, %v378_v24 }
 0x123   :  { %v393_v30 = vadd.f32 %v392_v29, %v391_v27 }
 0x125   :  { %v398_v32 = vsel %vm397_vm0, %v393_v30, 0.0 }
 0x126   :  { %v399_v33 = vsel %vm396_vm1, %v380_v31, %v398_v32 }
 0x127   :  { %400 = vst [vmem:[%s925_s3] sm:$0xff] %v399_v33 }

// kernel: generator_forward.12
= control target key start
LH: loop header
LB: loop body
LE: loop exit
PB: predicated region body
PF: predicated region fallthrough
CT: control target
= control target key end

     0   :  { %v20_v0 = vlaneseq  ;;  %s132_s1 = inlined_call_operand.vmem [shape: f32[1,512], index: 1, kind: input, shape index: {}]   ;;  %s133_s2 = inlined_call_operand.vmem [shape: f32[1,512], index: 2, kind: input, shape index: {}]   ;;  %s134_s0 = inlined_call_operand.vmem [shape: f32[8,512], index: 0, kind: input, shape index: {}]   ;;  %s135_s3 = inlined_call_operand.vmem [shape: f32[8,512], index: 3, kind: output, shape index: {}]  }
   0x1   :  { %v18_v2 = vld [vmem:[%s132_s1] sm:$0xf]  ;;  %v15_v9 = vld [vmem:[%s134_s0 + $0x8] sm:$0xff]  ;;  %v16_v14 = vld [vmem:[%s134_s0 + $0x10] sm:$0xff] }
   0x2   :  { %v21_v1 = vshrl.u32 %v20_v0, 7  ;;  %v44_v3 = vld [vmem:[%s133_s2] sm:$0xf]  ;;  %v17_v15 = vld [vmem:[%s134_s0 + $0x18] sm:$0xff] }
   0x3   :  { %v14_v8 = vld [vmem:[%s134_s0] sm:$0xff] }
   0x4   :  { %v22_v4 = vsub.s32 0, %v21_v1  ;;  %v26_v5 = vsub.s32 1, %v21_v1  ;;  %v30_v6 = vsub.s32 2, %v21_v1  ;;  %v34_v7 = vsub.s32 3, %v21_v1 }
   0x6   :  { %v23_v10 = vrot.slane %v18_v2, %v22_v4  ;;  %v49_v11 = vrot.slane %v44_v3, %v22_v4  ;;  %v27_v12 = vrot.slane %v18_v2, %v26_v5  ;;  %v53_v13 = vrot.slane %v44_v3, %v26_v5 }
   0x7   :  { %v31_v16 = vrot.slane %v18_v2, %v30_v6  ;;  %v57_v17 = vrot.slane %v44_v3, %v30_v6  ;;  %v35_v18 = vrot.slane %v18_v2, %v34_v7  ;;  %v61_v19 = vrot.slane %v44_v3, %v34_v7 }
   0x8   :  { %v40_v20 = vmul.f32 %v23_v10, %v14_v8  ;;  %v41_v21 = vmul.f32 %v27_v12, %v15_v9 }
   0x9   :  { %v42_v22 = vmul.f32 %v31_v16, %v16_v14  ;;  %v43_v23 = vmul.f32 %v35_v18, %v17_v15 }
   0xa   :  { %v66_v24 = vadd.f32 %v49_v11, %v40_v20  ;;  %v67_v25 = vadd.f32 %v53_v13, %v41_v21 }
   0xb   :  { %v68_v26 = vadd.f32 %v57_v17, %v42_v22  ;;  %v69_v27 = vadd.f32 %v61_v19, %v43_v23 }
   0xc   :  { %v70_v28 = vmax.f32 %v66_v24, 0.0  ;;  %v71_v29 = vmax.f32 %v67_v25, 0.0 }
   0xd   :  { %v72_v30 = vmax.f32 %v68_v26, 0.0  ;;  %v73_v31 = vmax.f32 %v69_v27, 0.0 }
   0xe   :  { %74 = vst [vmem:[%s135_s3] sm:$0xff] %v70_v28  ;;  %75 = vst [vmem:[%s135_s3 + $0x8] sm:$0xff] %v71_v29 }
   0xf   :  { %76 = vst [vmem:[%s135_s3 + $0x10] sm:$0xff] %v72_v30  ;;  %77 = vst [vmem:[%s135_s3 + $0x18] sm:$0xff] %v73_v31 }

// kernel: tile.63
= control target key start
LH: loop header
LB: loop body
LE: loop exit
PB: predicated region body
PF: predicated region fallthrough
CT: control target
= control target key end

     0   :  { %s40_s0 = inlined_call_operand.vmem [shape: f32[16], index: 0, kind: input, shape index: {}]   ;;  %s41_s1 = inlined_call_operand.vmem [shape: f32[32,16], index: 1, kind: output, shape index: {}]  }
   0x1   :  { %v4_v0 = vld [vmem:[%s40_s0] ss:$0 sm:$0xff] }
   0x2   :  { %5 = vst [vmem:[%s41_s1] sm:$0xff] %v4_v0  ;;  %12 = vst [vmem:[%s41_s1 + $0x8] sm:$0xff] %v4_v0 }
   0x3   :  { %13 = vst [vmem:[%s41_s1 + $0x10] sm:$0xff] %v4_v0  ;;  %14 = vst [vmem:[%s41_s1 + $0x18] sm:$0xff] %v4_v0 }

// kernel: tile.64
= control target key start
LH: loop header
LB: loop body
LE: loop exit
PB: predicated region body
PF: predicated region fallthrough
CT: control target
= control target key end

     0   :  { %s94_s8 = smov 112   ;;  %s95_s11 = smov 80   ;;  %vm3_vm0 = vcmask 130048   ;;  %vm9_vm1 = vcmask 1048448   ;;  %vm15_vm2 = vcmask 917248   ;;  %vm21_vm3 = vcmask 786048   ;;  %s147_s0 = inlined_call_operand.vmem [shape: f32[32,16], index: 0, kind: input, shape index: {}]   ;;  %s148_s1 = inlined_call_operand.vmem [shape: f32[1,512], index: 1, kind: output, shape index: {}]  }
   0x1   :  { %v77_v0 = vld [vmem:[%s147_s0 + $0x7] ss:$8 sm:$0xf]   ;;  %v79_v1 = vld [vmem:[%s147_s0 + $0x5] ss:$8 sm:$0xf]  }
   0x2   :  { %7 = vrot.lane.b32.xlu0 %v77_v0, %s94_s8  ;;  %19 = vrot.lane.b32.xlu1 %v79_v1, %s95_s11  ;;  %v78_v2 = vld [vmem:[%s147_s0 + $0x6] ss:$8 sm:$0xf]   ;;  %v80_v3 = vld [vmem:[%s147_s0 + $0x4] ss:$8 sm:$0xf]  }
   0x3   :  { %s96_s16 = smov 96   ;;  %v2_v4 = vld [vmem:[%s147_s0] ss:$8 sm:$0xf]   ;;  %s97_s19 = smov 64   ;;  %vm27_vm4 = vcmask 654848  }
   0x4   :  { %v81_v5 = vld [vmem:[%s147_s0 + $0x3] ss:$8 sm:$0xf]   ;;  %4 = vst.msk [vmem:[#allocation0] ss:$8 sm:$0xf] %vm3_vm0, %v2_v4  }
   0x5   :  { %v82_v6 = vld [vmem:[%s147_s0 + $0x2] ss:$8 sm:$0xf]   ;;  %s98_s24 = smov 48   ;;  %s99_s25 = smov 32   ;;  %vm33_vm5 = vcmask 523648  }
   0x6   :  { %13 = vrot.lane.b32.xlu0 %v78_v2, %s96_s16  ;;  %25 = vrot.lane.b32.xlu1 %v80_v3, %s97_s19  ;;  %v83_v7 = vld [vmem:[%s147_s0 + $0x1] ss:$8 sm:$0xf]   ;;  %s100_s0 = smov 16   ;;  %vm39_vm6 = vcmask 392448   ;;  %vm45_vm7 = vcmask 261248  }
   0xa   :  { %31 = vrot.lane.b32.xlu0 %v81_v5, %s98_s24  ;;  %37 = vrot.lane.b32.xlu1 %v82_v6, %s99_s25 }
   0xe   :  { %43 = vrot.lane.b32.xlu0 %v83_v7, %s100_s0 }
  0x74   :  { %v8_v8 = vpop.permute.xlu0 %7   ;;  %v20_v9 = vpop.permute.xlu1 %19  }
  0x75   :  { %10 = vst.msk [vmem:[#allocation0] ss:$8 sm:$0xf] %vm9_vm1, %v8_v8  }
  0x78   :  { %v14_v10 = vpop.permute.xlu0 %13   ;;  %v26_v11 = vpop.permute.xlu1 %25  }
  0x79   :  { %16 = vst.msk [vmem:[#allocation0] ss:$8 sm:$0xf] %vm15_vm2, %v14_v10  }
  0x7a   :  { %22 = vst.msk [vmem:[#allocation0] ss:$8 sm:$0xf] %vm21_vm3, %v20_v9  }
  0x7b   :  { %28 = vst.msk [vmem:[#allocation0] ss:$8 sm:$0xf] %vm27_vm4, %v26_v11  }
  0x7c   :  { %v32_v12 = vpop.permute.xlu0 %31   ;;  %v38_v13 = vpop.permute.xlu1 %37  }
  0x7d   :  { %34 = vst.msk [vmem:[#allocation0] ss:$8 sm:$0xf] %vm33_vm5, %v32_v12  }
  0x7e   :  { %40 = vst.msk [vmem:[#allocation0] ss:$8 sm:$0xf] %vm39_vm6, %v38_v13  }
  0x80   :  { %v44_v14 = vpop.permute.xlu0 %43  }
  0x81   :  { %46 = vst.msk [vmem:[#allocation0] ss:$8 sm:$0xf] %vm45_vm7, %v44_v14  }
  0x88   :  { %v51_v15 = vld [vmem:[#allocation0] sm:$0x1]  ;;  %v56_v16 = vld [vmem:[#allocation0 + $0x8] sm:$0x1]  ;;  %v62_v17 = vld [vmem:[#allocation0 + $0x10] sm:$0x1] }
  0x89   :  { %54 = vst [vmem:[%s148_s1] sm:$0x1] %v51_v15  ;;  %84 = vst [vmem:[%s148_s1 + $0x1] sm:$0x1] %v56_v16  ;;  %v69_v18 = vld [vmem:[#allocation0 + $0x18] sm:$0x1] }
  0x8a   :  { %85 = vst [vmem:[%s148_s1 + $0x2] sm:$0x1] %v62_v17  ;;  %86 = vst [vmem:[%s148_s1 + $0x3] sm:$0x1] %v69_v18 }

// kernel: generator_forward.14
= control target key start
LH: loop header
LB: loop body
LE: loop exit
PB: predicated region body
PF: predicated region fallthrough
CT: control target
= control target key end

     0   :  { %v24_v0 = vlaneseq  ;;  %s176_s1 = inlined_call_operand.vmem [shape: f32[1,512], index: 1, kind: input, shape index: {}]   ;;  %s177_s2 = inlined_call_operand.vmem [shape: f32[1,512], index: 2, kind: input, shape index: {}]   ;;  %s178_s0 = inlined_call_operand.vmem [shape: f32[16,512], index: 0, kind: input, shape index: {}]   ;;  %s179_s3 = inlined_call_operand.vmem [shape: f32[16,512], index: 3, kind: output, shape index: {}]  }
   0x1   :  { %v22_v2 = vld [vmem:[%s176_s1] sm:$0xf]  ;;  %v15_v6 = vld [vmem:[%s178_s0 + $0x8] sm:$0xff]  ;;  %v16_v10 = vld [vmem:[%s178_s0 + $0x10] sm:$0xff] }
   0x2   :  { %v25_v1 = vshrl.u32 %v24_v0, 7  ;;  %v52_v3 = vld [vmem:[%s177_s2] sm:$0xf]  ;;  %v19_v12 = vld [vmem:[%s178_s0 + $0x28] sm:$0xff]  ;;  %v17_v17 = vld [vmem:[%s178_s0 + $0x18] sm:$0xff] }
   0x3   :  { %v14_v4 = vld [vmem:[%s178_s0] sm:$0xff]  ;;  %v20_v18 = vld [vmem:[%s178_s0 + $0x30] sm:$0xff]  ;;  %v21_v19 = vld [vmem:[%s178_s0 + $0x38] sm:$0xff] }
   0x4   :  { %v26_v5 = vsub.s32 0, %v25_v1  ;;  %v30_v7 = vsub.s32 1, %v25_v1  ;;  %v34_v8 = vsub.s32 2, %v25_v1  ;;  %v38_v9 = vsub.s32 3, %v25_v1  ;;  %v18_v11 = vld [vmem:[%s178_s0 + $0x20] sm:$0xff] }
   0x6   :  { %v27_v13 = vrot.slane %v22_v2, %v26_v5  ;;  %v57_v14 = vrot.slane %v52_v3, %v26_v5  ;;  %v31_v15 = vrot.slane %v22_v2, %v30_v7  ;;  %v61_v16 = vrot.slane %v52_v3, %v30_v7 }
   0x7   :  { %v35_v20 = vrot.slane %v22_v2, %v34_v8  ;;  %v65_v21 = vrot.slane %v52_v3, %v34_v8  ;;  %v39_v22 = vrot.slane %v22_v2, %v38_v9  ;;  %v69_v23 = vrot.slane %v52_v3, %v38_v9 }
   0x8   :  { %v44_v24 = vmul.f32 %v27_v13, %v14_v4  ;;  %v45_v25 = vmul.f32 %v31_v15, %v15_v6  ;;  %v48_v26 = vmul.f32 %v27_v13, %v18_v11  ;;  %v49_v27 = vmul.f32 %v31_v15, %v19_v12 }
   0x9   :  { %v46_v28 = vmul.f32 %v35_v20, %v16_v10  ;;  %v47_v29 = vmul.f32 %v39_v22, %v17_v17  ;;  %v50_v30 = vmul.f32 %v35_v20, %v20_v18  ;;  %v51_v31 = vmul.f32 %v39_v22, %v21_v19 }
   0xa   :  { %v74_v32 = vadd.f32 %v57_v14, %v44_v24  ;;  %v75_v33 = vadd.f32 %v61_v16, %v45_v25  ;;  %v78_v34 = vadd.f32 %v57_v14, %v48_v26  ;;  %v79_v35 = vadd.f32 %v61_v16, %v49_v27 }
   0xb   :  { %v76_v36 = vadd.f32 %v65_v21, %v46_v28  ;;  %v77_v37 = vadd.f32 %v69_v23, %v47_v29  ;;  %v80_v38 = vadd.f32 %v65_v21, %v50_v30  ;;  %v81_v39 = vadd.f32 %v69_v23, %v51_v31 }
   0xc   :  { %v82_v40 = vmax.f32 %v74_v32, 0.0  ;;  %v83_v41 = vmax.f32 %v75_v33, 0.0  ;;  %v86_v42 = vmax.f32 %v78_v34, 0.0  ;;  %v87_v43 = vmax.f32 %v79_v35, 0.0 }
   0xd   :  { %v84_v44 = vmax.f32 %v76_v36, 0.0  ;;  %v85_v45 = vmax.f32 %v77_v37, 0.0  ;;  %v88_v46 = vmax.f32 %v80_v38, 0.0  ;;  %v89_v47 = vmax.f32 %v81_v39, 0.0 }
   0xe   :  { %90 = vst [vmem:[%s179_s3] sm:$0xff] %v82_v40  ;;  %91 = vst [vmem:[%s179_s3 + $0x8] sm:$0xff] %v83_v41 }
   0xf   :  { %94 = vst [vmem:[%s179_s3 + $0x20] sm:$0xff] %v86_v42  ;;  %95 = vst [vmem:[%s179_s3 + $0x28] sm:$0xff] %v87_v43 }
  0x10   :  { %92 = vst [vmem:[%s179_s3 + $0x10] sm:$0xff] %v84_v44  ;;  %93 = vst [vmem:[%s179_s3 + $0x18] sm:$0xff] %v85_v45 }
  0x11   :  { %96 = vst [vmem:[%s179_s3 + $0x30] sm:$0xff] %v88_v46  ;;  %97 = vst [vmem:[%s179_s3 + $0x38] sm:$0xff] %v89_v47 }

// kernel: generator_forward.13
= control target key start
LH: loop header
LB: loop body
LE: loop exit
PB: predicated region body
PF: predicated region fallthrough
CT: control target
= control target key end

     0   :  { %vm399_vm0 = vcmask 523264   ;;  %s1097_s1 = inlined_call_operand.vmem [shape: f32[384,64], index: 1, kind: input, shape index: {}]   ;;  %s1098_s0 = inlined_call_operand.vmem [shape: f32[128,384], index: 0, kind: input, shape index: {}]   ;;  %s1099_s2 = inlined_call_operand.vmem [shape: f32[128,64], index: 2, kind: output, shape index: {0}]   ;;  %s1100_s3 = inlined_call_operand.vmem [shape: f32[8,64], index: 3, kind: output, shape index: {1}]  }
   0x1   :  { %v92_v0 = vld [vmem:[%s1097_s1 + $0xf8] sm:$0xff]  ;;  %v91_v2 = vld [vmem:[%s1097_s1 + $0xf0] sm:$0xff]  ;;  %v90_v5 = vld [vmem:[%s1097_s1 + $0xe8] sm:$0xff] }
   0x2   :  { %v76_v1 = vld [vmem:[%s1097_s1 + $0x78] sm:$0xff]  ;;  %521 = vmatprep.subr.mxu0 %v92_v0  ;;  %v75_v4 = vld [vmem:[%s1097_s1 + $0x70] sm:$0xff]  ;;  %v74_v7 = vld [vmem:[%s1097_s1 + $0x68] sm:$0xff] }
   0x3   :  { %v108_v3 = vld [vmem:[%s1097_s1 + $0x178] sm:$0xff]  ;;  %522 = vmatpush3.msra.mxu0 %v76_v1  ;;  %v107_v6 = vld [vmem:[%s1097_s1 + $0x170] sm:$0xff]  ;;  %v106_v8 = vld [vmem:[%s1097_s1 + $0x168] sm:$0xff] }
   0x4   :  { %633 = vmatprep.subr.mxu1 %v108_v3  ;;  %523 = vmatprep.subr.mxu0 %v91_v2  ;;  %v89_v9 = vld [vmem:[%s1097_s1 + $0xe0] sm:$0xff]  ;;  %v88_v12 = vld [vmem:[%s1097_s1 + $0xd8] sm:$0xff]  ;;  %v87_v15 = vld [vmem:[%s1097_s1 + $0xd0] sm:$0xff] }
   0x5   :  { %634 = vmatpush3.msra.mxu1 %v108_v3  ;;  %524 = vmatpush3.msra.mxu0 %v75_v4  ;;  %v73_v10 = vld [vmem:[%s1097_s1 + $0x60] sm:$0xff]  ;;  %v72_v13 = vld [vmem:[%s1097_s1 + $0x58] sm:$0xff]  ;;  %v71_v16 = vld [vmem:[%s1097_s1 + $0x50] sm:$0xff] }
   0x6   :  { %635 = vmatprep.subr.mxu1 %v107_v6  ;;  %525 = vmatprep.subr.mxu0 %v90_v5  ;;  %v105_v11 = vld [vmem:[%s1097_s1 + $0x160] sm:$0xff]  ;;  %v104_v14 = vld [vmem:[%s1097_s1 + $0x158] sm:$0xff]  ;;  %v103_v17 = vld [vmem:[%s1097_s1 + $0x150] sm:$0xff] }
   0x7   :  { %636 = vmatpush3.msra.mxu1 %v107_v6  ;;  %526 = vmatpush3.msra.mxu0 %v74_v7  ;;  %v86_v18 = vld [vmem:[%s1097_s1 + $0xc8] sm:$0xff]  ;;  %v85_v21 = vld [vmem:[%s1097_s1 + $0xc0] sm:$0xff]  ;;  %v84_v24 = vld [vmem:[%s1097_s1 + $0xb8] sm:$0xff] }
   0x8   :  { %637 = vmatprep.subr.mxu1 %v106_v8  ;;  %527 = vmatprep.subr.mxu0 %v89_v9  ;;  %v70_v19 = vld [vmem:[%s1097_s1 + $0x48] sm:$0xff]  ;;  %v69_v22 = vld [vmem:[%s1097_s1 + $0x40] sm:$0xff]  ;;  %v68_v25 = vld [vmem:[%s1097_s1 + $0x38] sm:$0xff] }
   0x9   :  { %638 = vmatpush3.msra.mxu1 %v106_v8  ;;  %528 = vmatpush3.msra.mxu0 %v73_v10  ;;  %v102_v20 = vld [vmem:[%s1097_s1 + $0x148] sm:$0xff]  ;;  %v101_v23 = vld [vmem:[%s1097_s1 + $0x140] sm:$0xff]  ;;  %v100_v26 = vld [vmem:[%s1097_s1 + $0x138] sm:$0xff] }
   0xa   :  { %639 = vmatprep.subr.mxu1 %v105_v11  ;;  %529 = vmatprep.subr.mxu0 %v88_v12  ;;  %v83_v27 = vld [vmem:[%s1097_s1 + $0xb0] sm:$0xff]  ;;  %v82_v30 = vld [vmem:[%s1097_s1 + $0xa8] sm:$0xff]  ;;  %v81_v33 = vld [vmem:[%s1097_s1 + $0xa0] sm:$0xff] }
   0xb   :  { %640 = vmatpush3.msra.mxu1 %v105_v11  ;;  %530 = vmatpush3.msra.mxu0 %v72_v13  ;;  %v67_v28 = vld [vmem:[%s1097_s1 + $0x30] sm:$0xff]  ;;  %v66_v31 = vld [vmem:[%s1097_s1 + $0x28] sm:$0xff]  ;;  %v65_v34 = vld [vmem:[%s1097_s1 + $0x20] sm:$0xff] }
   0xc   :  { %641 = vmatprep.subr.mxu1 %v104_v14  ;;  %531 = vmatprep.subr.mxu0 %v87_v15  ;;  %v99_v29 = vld [vmem:[%s1097_s1 + $0x130] sm:$0xff]  ;;  %v98_v32 = vld [vmem:[%s1097_s1 + $0x128] sm:$0xff]  ;;  %v97_v35 = vld [vmem:[%s1097_s1 + $0x120] sm:$0xff] }
   0xd   :  { %642 = vmatpush3.msra.mxu1 %v104_v14  ;;  %532 = vmatpush3.msra.mxu0 %v71_v16  ;;  %v80_v36 = vld [vmem:[%s1097_s1 + $0x98] sm:$0xff]  ;;  %v79_v39 = vld [vmem:[%s1097_s1 + $0x90] sm:$0xff]  ;;  %v78_v42 = vld [vmem:[%s1097_s1 + $0x88] sm:$0xff] }
   0xe   :  { %643 = vmatprep.subr.mxu1 %v103_v17  ;;  %533 = vmatprep.subr.mxu0 %v86_v18  ;;  %v64_v37 = vld [vmem:[%s1097_s1 + $0x18] sm:$0xff]  ;;  %v63_v40 = vld [vmem:[%s1097_s1 + $0x10] sm:$0xff]  ;;  %v62_v43 = vld [vmem:[%s1097_s1 + $0x8] sm:$0xff] }
   0xf   :  { %644 = vmatpush3.msra.mxu1 %v103_v17  ;;  %534 = vmatpush3.msra.mxu0 %v70_v19  ;;  %v96_v38 = vld [vmem:[%s1097_s1 + $0x118] sm:$0xff]  ;;  %v95_v41 = vld [vmem:[%s1097_s1 + $0x110] sm:$0xff]  ;;  %v94_v44 = vld [vmem:[%s1097_s1 + $0x108] sm:$0xff] }
  0x10   :  { %645 = vmatprep.subr.mxu1 %v102_v20  ;;  %535 = vmatprep.subr.mxu0 %v85_v21  ;;  %v77_v45 = vld [vmem:[%s1097_s1 + $0x80] sm:$0xff]  ;;  %v14_v46 = vld [vmem:[%s1098_s0 + $0x8] sm:$0xff]  ;;  %v15_v50 = vld [vmem:[%s1098_s0 + $0x10] sm:$0xff] }
  0x11   :  { %646 = vmatpush3.msra.mxu1 %v102_v20  ;;  %536 = vmatpush3.msra.mxu0 %v69_v22  ;;  %v61_v47 = vld [vmem:[%s1097_s1] sm:$0xff]  ;;  %v18_v51 = vld [vmem:[%s1098_s0 + $0x28] sm:$0xff]  ;;  %v16_v54 = vld [vmem:[%s1098_s0 + $0x18] sm:$0xff] }
  0x12   :  { %647 = vmatprep.subr.mxu1 %v101_v23  ;;  %537 = vmatprep.subr.mxu0 %v84_v24  ;;  %v13_v48 = vld [vmem:[%s1098_s0] sm:$0xff]  ;;  %v20_v55 = vld [vmem:[%s1098_s0 + $0x38] sm:$0xff]  ;;  %v27_v57 = vld [vmem:[%s1098_s0 + $0x70] sm:$0xff] }
  0x13   :  { %648 = vmatpush3.msra.mxu1 %v101_v23  ;;  %538 = vmatpush3.msra.mxu0 %v68_v25  ;;  %v93_v49 = vld [vmem:[%s1097_s1 + $0x100] sm:$0xff]  ;;  %v24_v56 = vld [vmem:[%s1098_s0 + $0x58] sm:$0xff]  ;;  %v19_v58 = vld [vmem:[%s1098_s0 + $0x30] sm:$0xff] }
  0x14   :  { %649 = vmatprep.subr.mxu1 %v100_v26  ;;  %539 = vmatprep.subr.mxu0 %v83_v27  ;;  %v17_v52 = vld [vmem:[%s1098_s0 + $0x20] sm:$0xff]  ;;  %v23_v59 = vld [vmem:[%s1098_s0 + $0x50] sm:$0xff]  ;;  %v30_v60 = vld [vmem:[%s1098_s0 + $0x88] sm:$0xff] }
  0x15   :  { %650 = vmatpush3.msra.mxu1 %v100_v26  ;;  %540 = vmatpush3.msra.mxu0 %v67_v28  ;;  %v21_v53 = vld [vmem:[%s1098_s0 + $0x40] sm:$0xff]  ;;  %v22_v62 = vld [vmem:[%s1098_s0 + $0x48] sm:$0xff]  ;;  %v36_v0 = vld [vmem:[%s1098_s0 + $0xb8] sm:$0xff] }
  0x16   :  { %651 = vmatprep.subr.mxu1 %v99_v29  ;;  %541 = vmatprep.subr.mxu0 %v82_v30  ;;  %v33_v61 = vld [vmem:[%s1098_s0 + $0xa0] sm:$0xff]  ;;  %v26_v63 = vld [vmem:[%s1098_s0 + $0x68] sm:$0xff]  ;;  %v39_v1 = vld [vmem:[%s1098_s0 + $0xd0] sm:$0xff] }
  0x17   :  { %652 = vmatpush3.msra.mxu1 %v99_v29  ;;  %542 = vmatpush3.msra.mxu0 %v66_v31  ;;  %v25_v2 = vld [vmem:[%s1098_s0 + $0x60] sm:$0xff]  ;;  %v42_v4 = vld [vmem:[%s1098_s0 + $0xe8] sm:$0xff]  ;;  %v28_v6 = vld [vmem:[%s1098_s0 + $0x78] sm:$0xff] }
  0x18   :  { %653 = vmatprep.subr.mxu1 %v98_v32  ;;  %543 = vmatprep.subr.mxu0 %v81_v33  ;;  %v29_v3 = vld [vmem:[%s1098_s0 + $0x80] sm:$0xff]  ;;  %v32_v7 = vld [vmem:[%s1098_s0 + $0x98] sm:$0xff]  ;;  %v51_v9 = vld [vmem:[%s1098_s0 + $0x130] sm:$0xff] }
  0x19   :  { %654 = vmatpush3.msra.mxu1 %v98_v32  ;;  %544 = vmatpush3.msra.mxu0 %v65_v34  ;;  %v45_v5 = vld [vmem:[%s1098_s0 + $0x100] sm:$0xff]  ;;  %v48_v8 = vld [vmem:[%s1098_s0 + $0x118] sm:$0xff]  ;;  %v31_v10 = vld [vmem:[%s1098_s0 + $0x90] sm:$0xff] }
  0x1a   :  { %655 = vmatprep.subr.mxu1 %v97_v35  ;;  %545 = vmatprep.subr.mxu0 %v80_v36  ;;  %v35_v11 = vld [vmem:[%s1098_s0 + $0xb0] sm:$0xff]  ;;  %v54_v12 = vld [vmem:[%s1098_s0 + $0x148] sm:$0xff]  ;;  %v57_v13 = vld [vmem:[%s1098_s0 + $0x160] sm:$0xff] }
  0x1b   :  { %656 = vmatpush3.msra.mxu1 %v97_v35  ;;  %546 = vmatpush3.msra.mxu0 %v64_v37  ;;  %v34_v14 = vld [vmem:[%s1098_s0 + $0xa8] sm:$0xff]  ;;  %v60_v16 = vld [vmem:[%s1098_s0 + $0x178] sm:$0xff]  ;;  %v37_v17 = vld [vmem:[%s1098_s0 + $0xc0] sm:$0xff] }
  0x1c   :  { %657 = vmatprep.subr.mxu1 %v96_v38  ;;  %547 = vmatprep.subr.mxu0 %v79_v39  ;;  %v38_v15 = vld [vmem:[%s1098_s0 + $0xc8] sm:$0xff]  ;;  %v41_v18 = vld [vmem:[%s1098_s0 + $0xe0] sm:$0xff]  ;;  %v40_v19 = vld [vmem:[%s1098_s0 + $0xd8] sm:$0xff] }
  0x1d   :  { %658 = vmatpush3.msra.mxu1 %v96_v38  ;;  %548 = vmatpush3.msra.mxu0 %v63_v40  ;;  %v44_v20 = vld [vmem:[%s1098_s0 + $0xf8] sm:$0xff]  ;;  %v43_v21 = vld [vmem:[%s1098_s0 + $0xf0] sm:$0xff]  ;;  %v46_v23 = vld [vmem:[%s1098_s0 + $0x108] sm:$0xff] }
  0x1e   :  { %659 = vmatprep.subr.mxu1 %v95_v41  ;;  %549 = vmatprep.subr.mxu0 %v78_v42  ;;  %v47_v22 = vld [vmem:[%s1098_s0 + $0x110] sm:$0xff]  ;;  %v50_v24 = vld [vmem:[%s1098_s0 + $0x128] sm:$0xff]  ;;  %v49_v25 = vld [vmem:[%s1098_s0 + $0x120] sm:$0xff] }
  0x1f   :  { %660 = vmatpush3.msra.mxu1 %v95_v41  ;;  %550 = vmatpush3.msra.mxu0 %v62_v43  ;;  %v53_v26 = vld [vmem:[%s1098_s0 + $0x140] sm:$0xff]  ;;  %v52_v27 = vld [vmem:[%s1098_s0 + $0x138] sm:$0xff]  ;;  %v55_v29 = vld [vmem:[%s1098_s0 + $0x150] sm:$0xff] }
  0x20   :  { %661 = vmatprep.subr.mxu1 %v94_v44  ;;  %551 = vmatprep.subr.mxu0 %v77_v45  ;;  %v56_v28 = vld [vmem:[%s1098_s0 + $0x158] sm:$0xff]  ;;  %v59_v30 = vld [vmem:[%s1098_s0 + $0x170] sm:$0xff]  ;;  %v58_v31 = vld [vmem:[%s1098_s0 + $0x168] sm:$0xff] }
  0x21   :  { %173 = vmatprep.mubr.f32.mxu0 %v14_v46  ;;  %552 = vmatpush3.msra.mxu0 %v61_v47 }
  0x22   :  { %662 = vmatpush3.msra.mxu1 %v94_v44  ;;  %174 = vmatmul.mubr.f32.vlgmr.msra.gmra.mxu0 %v13_v48 }
  0x23   :  { %663 = vmatprep.subr.mxu1 %v93_v49  ;;  %665 = vmatprep.mubr.f32.mxu1 %v15_v50 }
  0x24   :  { %664 = vmatpush3.msra.mxu1 %v93_v49  ;;  %178 = vmatprep.mubr.f32.mxu0 %v17_v52 }
  0x25   :  { %666 = vmatmul.mubr.f32.vlgmr.msra.gmra.mxu1 %v18_v51 }
  0x26   :  { %668 = vmatprep.mubr.f32.mxu1 %v21_v53  ;;  %179 = vmatmul.mubr.f32.gmra.mxu0 %v16_v54 }
  0x27   :  { %183 = vmatprep.mubr.f32.mxu0 %v20_v55 }
  0x29   :  { %669 = vmatmul.mubr.f32.gmra.mxu1 %v24_v56 }
  0x2a   :  { %671 = vmatprep.mubr.f32.mxu1 %v27_v57  ;;  %184 = vmatmul.mubr.f32.gmra.mxu0 %v19_v58 }
  0x2b   :  { %188 = vmatprep.mubr.f32.mxu0 %v23_v59 }
  0x2d   :  { %672 = vmatmul.mubr.f32.gmra.mxu1 %v30_v60 }
  0x2e   :  { %674 = vmatprep.mubr.f32.mxu1 %v33_v61  ;;  %189 = vmatmul.mubr.f32.gmra.mxu0 %v22_v62 }
  0x2f   :  { %193 = vmatprep.mubr.f32.mxu0 %v26_v63 }
  0x31   :  { %675 = vmatmul.mubr.f32.gmra.mxu1 %v36_v0 }
  0x32   :  { %677 = vmatprep.mubr.f32.mxu1 %v39_v1  ;;  %194 = vmatmul.mubr.f32.gmra.mxu0 %v25_v2 }
  0x33   :  { %198 = vmatprep.mubr.f32.mxu0 %v29_v3 }
  0x35   :  { %678 = vmatmul.mubr.f32.gmra.mxu1 %v42_v4 }
  0x36   :  { %680 = vmatprep.mubr.f32.mxu1 %v45_v5  ;;  %199 = vmatmul.mubr.f32.gmra.mxu0 %v28_v6 }
  0x37   :  { %203 = vmatprep.mubr.f32.mxu0 %v32_v7 }
  0x39   :  { %681 = vmatmul.mubr.f32.gmra.mxu1 %v48_v8 }
  0x3a   :  { %683 = vmatprep.mubr.f32.mxu1 %v51_v9  ;;  %204 = vmatmul.mubr.f32.gmra.mxu0 %v31_v10 }
  0x3b   :  { %208 = vmatprep.mubr.f32.mxu0 %v35_v11 }
  0x3d   :  { %684 = vmatmul.mubr.f32.gmra.mxu1 %v54_v12 }
  0x3e   :  { %686 = vmatprep.mubr.f32.mxu1 %v57_v13  ;;  %209 = vmatmul.mubr.f32.gmra.mxu0 %v34_v14 }
  0x3f   :  { %213 = vmatprep.mubr.f32.mxu0 %v38_v15 }
  0x41   :  { %687 = vmatmul.mubr.f32.gmra.mxu1 %v60_v16 }
  0x42   :  { %214 = vmatmul.mubr.f32.gmra.mxu0 %v37_v17 }
  0x43   :  { %218 = vmatprep.mubr.f32.mxu0 %v41_v18 }
  0x46   :  { %219 = vmatmul.mubr.f32.gmra.mxu0 %v40_v19 }
  0x47   :  { %223 = vmatprep.mubr.f32.mxu0 %v44_v20 }
  0x4a   :  { %224 = vmatmul.mubr.f32.gmra.mxu0 %v43_v21 }
  0x4b   :  { %228 = vmatprep.mubr.f32.mxu0 %v47_v22 }
  0x4e   :  { %229 = vmatmul.mubr.f32.gmra.mxu0 %v46_v23 }
  0x4f   :  { %233 = vmatprep.mubr.f32.mxu0 %v50_v24 }
  0x52   :  { %234 = vmatmul.mubr.f32.gmra.mxu0 %v49_v25 }
  0x53   :  { %238 = vmatprep.mubr.f32.mxu0 %v53_v26 }
  0x56   :  { %239 = vmatmul.mubr.f32.gmra.mxu0 %v52_v27 }
  0x57   :  { %243 = vmatprep.mubr.f32.mxu0 %v56_v28 }
  0x5a   :  { %244 = vmatmul.mubr.f32.gmra.mxu0 %v55_v29 }
  0x5b   :  { %248 = vmatprep.mubr.f32.mxu0 %v59_v30 }
  0x5e   :  { %249 = vmatmul.mubr.f32.gmra.mxu0 %v58_v31 }
  0xe2   :  { %v553_v32 = vpop.f32.mrf.mxu0 }
  0xe4   :  { %v554_v33 = vpop.f32.mrf.mxu0 }
  0xe5   :  { %v667_v34 = vpop.f32.mrf.mxu1  ;;  %v555_v35 = vadd.f32 %v554_v33, %v553_v32 }
  0xe6   :  { %v556_v36 = vpop.f32.mrf.mxu0 }
  0xe7   :  { %v320_v37 = vpop.f32.mrf.mxu1 }
  0xe8   :  { %v321_v38 = vadd.f32 %v555_v35, %v320_v37  ;;  %v557_v39 = vpop.f32.mrf.mxu0 }
  0xe9   :  { %v670_v40 = vpop.f32.mrf.mxu1  ;;  %v558_v41 = vadd.f32 %v557_v39, %v556_v36 }
  0xea   :  { %400 = vst.msk [vmem:[%s1099_s2] sm:$0xff] %vm399_vm0, %v321_v38  ;;  %v559_v42 = vpop.f32.mrf.mxu0  ;;  %v453_v14 = vmul.f32 %v321_v38, %v321_v38  ;;  %v416_v19 = vsel %vm399_vm0, %v321_v38, 0.0 }
  0xeb   :  { %v326_v43 = vadd.f32 %v667_v34, %v558_v41  ;;  %v330_v45 = vpop.f32.mrf.mxu1 }
  0xec   :  { %v560_v44 = vpop.f32.mrf.mxu0  ;;  %v469_v26 = vsel %vm399_vm0, %v453_v14, 0.0 }
  0xed   :  { %401 = vst.msk [vmem:[%s1099_s2 + $0x8] sm:$0xff] %vm399_vm0, %v326_v43  ;;  %v561_v46 = vadd.f32 %v560_v44, %v559_v42  ;;  %v673_v50 = vpop.f32.mrf.mxu1  ;;  %v454_v12 = vmul.f32 %v326_v43, %v326_v43  ;;  %v417_v16 = vsel %vm399_vm0, %v326_v43, 0.0 }
  0xee   :  { %v562_v47 = vpop.f32.mrf.mxu0  ;;  %v418_v27 = vadd.f32 %v417_v16, %v416_v19 }
  0xef   :  { %v331_v48 = vadd.f32 %v561_v46, %v330_v45  ;;  %v340_v55 = vpop.f32.mrf.mxu1  ;;  %v470_v22 = vsel %vm399_vm0, %v454_v12, 0.0 }
  0xf0   :  { %v563_v49 = vpop.f32.mrf.mxu0  ;;  %v471_v34 = vadd.f32 %v470_v22, %v469_v26 }
  0xf1   :  { %402 = vst.msk [vmem:[%s1099_s2 + $0x10] sm:$0xff] %vm399_vm0, %v331_v48  ;;  %v564_v51 = vadd.f32 %v563_v49, %v562_v47  ;;  %v676_v60 = vpop.f32.mrf.mxu1  ;;  %v455_v17 = vmul.f32 %v331_v48, %v331_v48  ;;  %v419_v23 = vsel %vm399_vm0, %v331_v48, 0.0 }
  0xf2   :  { %v565_v52 = vpop.f32.mrf.mxu0  ;;  %v420_v33 = vadd.f32 %v419_v23, %v418_v27 }
  0xf3   :  { %v336_v53 = vadd.f32 %v670_v40, %v564_v51  ;;  %v350_v1 = vpop.f32.mrf.mxu1  ;;  %v472_v29 = vsel %vm399_vm0, %v455_v17, 0.0 }
  0xf4   :  { %v566_v54 = vpop.f32.mrf.mxu0  ;;  %v473_v41 = vadd.f32 %v472_v29, %v471_v34 }
  0xf5   :  { %403 = vst.msk [vmem:[%s1099_s2 + $0x18] sm:$0xff] %vm399_vm0, %v336_v53  ;;  %v567_v56 = vadd.f32 %v566_v54, %v565_v52  ;;  %v679_v6 = vpop.f32.mrf.mxu1  ;;  %v456_v24 = vmul.f32 %v336_v53, %v336_v53  ;;  %v421_v30 = vsel %vm399_vm0, %v336_v53, 0.0 }
  0xf6   :  { %v568_v57 = vpop.f32.mrf.mxu0  ;;  %v422_v42 = vadd.f32 %v421_v30, %v420_v33 }
  0xf7   :  { %v341_v58 = vadd.f32 %v567_v56, %v340_v55  ;;  %v360_v11 = vpop.f32.mrf.mxu1  ;;  %v474_v37 = vsel %vm399_vm0, %v456_v24, 0.0 }
  0xf8   :  { %v569_v59 = vpop.f32.mrf.mxu0  ;;  %v475_v49 = vadd.f32 %v474_v37, %v473_v41 }
  0xf9   :  { %404 = vst.msk [vmem:[%s1099_s2 + $0x20] sm:$0xff] %vm399_vm0, %v341_v58  ;;  %v570_v61 = vadd.f32 %v569_v59, %v568_v57  ;;  %v682_v21 = vpop.f32.mrf.mxu1  ;;  %v457_v31 = vmul.f32 %v341_v58, %v341_v58  ;;  %v423_v38 = vsel %vm399_vm0, %v341_v58, 0.0 }
  0xfa   :  { %v571_v62 = vpop.f32.mrf.mxu0  ;;  %v424_v48 = vadd.f32 %v423_v38, %v422_v42 }
  0xfb   :  { %v346_v63 = vadd.f32 %v673_v50, %v570_v61  ;;  %v370_v36 = vpop.f32.mrf.mxu1  ;;  %v476_v44 = vsel %vm399_vm0, %v457_v31, 0.0 }
  0xfc   :  { %v572_v0 = vpop.f32.mrf.mxu0  ;;  %v477_v56 = vadd.f32 %v476_v44, %v475_v49 }
  0xfd   :  { %405 = vst.msk [vmem:[%s1099_s2 + $0x28] sm:$0xff] %vm399_vm0, %v346_v63  ;;  %v573_v2 = vadd.f32 %v572_v0, %v571_v62  ;;  %v458_v39 = vmul.f32 %v346_v63, %v346_v63  ;;  %v425_v45 = vsel %vm399_vm0, %v346_v63, 0.0  ;;  %v685_v51 = vpop.f32.mrf.mxu1 }
  0xfe   :  { %v574_v3 = vpop.f32.mrf.mxu0  ;;  %v426_v57 = vadd.f32 %v425_v45, %v424_v48 }
  0xff   :  { %v351_v4 = vadd.f32 %v573_v2, %v350_v1  ;;  %v478_v52 = vsel %vm399_vm0, %v458_v39, 0.0  ;;  %v380_v2 = vpop.f32.mrf.mxu1 }
 0x100   :  { %v575_v5 = vpop.f32.mrf.mxu0  ;;  %v479_v0 = vadd.f32 %v478_v52, %v477_v56 }
 0x101   :  { %406 = vst.msk [vmem:[%s1099_s2 + $0x30] sm:$0xff] %vm399_vm0, %v351_v4  ;;  %v576_v7 = vadd.f32 %v575_v5, %v574_v3  ;;  %v459_v46 = vmul.f32 %v351_v4, %v351_v4  ;;  %v427_v53 = vsel %vm399_vm0, %v351_v4, 0.0  ;;  %v688_v17 = vpop.f32.mrf.mxu1 }
 0x102   :  { %v577_v8 = vpop.f32.mrf.mxu0  ;;  %v428_v63 = vadd.f32 %v427_v53, %v426_v57 }
 0x103   :  { %v356_v9 = vadd.f32 %v676_v60, %v576_v7  ;;  %v480_v59 = vsel %vm399_vm0, %v459_v46, 0.0 }
 0x104   :  { %v578_v10 = vpop.f32.mrf.mxu0  ;;  %v481_v7 = vadd.f32 %v480_v59, %v479_v0 }
 0x105   :  { %407 = vst.msk [vmem:[%s1099_s2 + $0x38] sm:$0xff] %vm399_vm0, %v356_v9  ;;  %v579_v13 = vadd.f32 %v578_v10, %v577_v8  ;;  %v460_v54 = vmul.f32 %v356_v9, %v356_v9  ;;  %v429_v60 = vsel %vm399_vm0, %v356_v9, 0.0 }
 0x106   :  { %v580_v15 = vpop.f32.mrf.mxu0  ;;  %v430_v8 = vadd.f32 %v429_v60, %v428_v63 }
 0x107   :  { %v361_v18 = vadd.f32 %v579_v13, %v360_v11  ;;  %v482_v3 = vsel %vm399_vm0, %v460_v54, 0.0 }
 0x108   :  { %v581_v20 = vpop.f32.mrf.mxu0 }
 0x109   :  { %408 = vst.msk [vmem:[%s1099_s2 + $0x40] sm:$0xff] %vm399_vm0, %v361_v18  ;;  %v582_v25 = vadd.f32 %v581_v20, %v580_v15  ;;  %v461_v61 = vmul.f32 %v361_v18, %v361_v18  ;;  %v431_v4 = vsel %vm399_vm0, %v361_v18, 0.0  ;;  %v483_v15 = vadd.f32 %v482_v3, %v481_v7 }
 0x10a   :  { %v583_v28 = vpop.f32.mrf.mxu0  ;;  %v432_v14 = vadd.f32 %v431_v4, %v430_v8 }
 0x10b   :  { %v366_v32 = vadd.f32 %v679_v6, %v582_v25  ;;  %v484_v10 = vsel %vm399_vm0, %v461_v61, 0.0 }
 0x10c   :  { %v584_v35 = vpop.f32.mrf.mxu0  ;;  %v485_v22 = vadd.f32 %v484_v10, %v483_v15 }
 0x10d   :  { %409 = vst.msk [vmem:[%s1099_s2 + $0x48] sm:$0xff] %vm399_vm0, %v366_v32  ;;  %v585_v40 = vadd.f32 %v584_v35, %v583_v28  ;;  %v462_v5 = vmul.f32 %v366_v32, %v366_v32  ;;  %v433_v11 = vsel %vm399_vm0, %v366_v32, 0.0  ;;  %v390_v32 = vpop.f32.mrf.mxu1 }
 0x10e   :  { %v586_v43 = vpop.f32.mrf.mxu0  ;;  %v434_v23 = vadd.f32 %v433_v11, %v432_v14 }
 0x10f   :  { %v371_v47 = vadd.f32 %v585_v40, %v370_v36  ;;  %v486_v18 = vsel %vm399_vm0, %v462_v5, 0.0 }
 0x110   :  { %v587_v50 = vpop.f32.mrf.mxu0  ;;  %v487_v30 = vadd.f32 %v486_v18, %v485_v22 }
 0x111   :  { %410 = vst.msk [vmem:[%s1099_s2 + $0x50] sm:$0xff] %vm399_vm0, %v371_v47  ;;  %v588_v55 = vadd.f32 %v587_v50, %v586_v43  ;;  %v463_v12 = vmul.f32 %v371_v47, %v371_v47  ;;  %v435_v19 = vsel %vm399_vm0, %v371_v47, 0.0 }
 0x112   :  { %v589_v58 = vpop.f32.mrf.mxu0  ;;  %v436_v29 = vadd.f32 %v435_v19, %v434_v23 }
 0x113   :  { %v376_v62 = vadd.f32 %v682_v21, %v588_v55  ;;  %v488_v25 = vsel %vm399_vm0, %v463_v12, 0.0 }
 0x114   :  { %v590_v1 = vpop.f32.mrf.mxu0  ;;  %v489_v37 = vadd.f32 %v488_v25, %v487_v30 }
 0x115   :  { %411 = vst.msk [vmem:[%s1099_s2 + $0x58] sm:$0xff] %vm399_vm0, %v376_v62  ;;  %v591_v6 = vadd.f32 %v590_v1, %v589_v58  ;;  %v464_v20 = vmul.f32 %v376_v62, %v376_v62  ;;  %v437_v26 = vsel %vm399_vm0, %v376_v62, 0.0  ;;  %v506_v1 = vlaneseq }
 0x116   :  { %v592_v9 = vpop.f32.mrf.mxu0  ;;  %v438_v38 = vadd.f32 %v437_v26, %v436_v29 }
 0x117   :  { %v381_v13 = vadd.f32 %v591_v6, %v380_v2  ;;  %v490_v33 = vsel %vm399_vm0, %v464_v20, 0.0  ;;  %v507_v6 = vshrl.u32 %v506_v1, 7 }
 0x118   :  { %v593_v16 = vpop.f32.mrf.mxu0  ;;  %v491_v44 = vadd.f32 %v490_v33, %v489_v37 }
 0x119   :  { %412 = vst.msk [vmem:[%s1099_s2 + $0x60] sm:$0xff] %vm399_vm0, %v381_v13  ;;  %v594_v21 = vadd.f32 %v593_v16, %v592_v9  ;;  %v465_v27 = vmul.f32 %v381_v13, %v381_v13  ;;  %v439_v34 = vsel %vm399_vm0, %v381_v13, 0.0  ;;  %vm509_vm1 = vcmp.eq.s32.totalorder %v507_v6, 1 }
 0x11a   :  { %v595_v24 = vpop.f32.mrf.mxu0  ;;  %v440_v43 = vadd.f32 %v439_v34, %v438_v38  ;;  %vm508_vm2 = vcmp.eq.s32.totalorder %v507_v6, 0 }
 0x11b   :  { %v386_v28 = vadd.f32 %v685_v51, %v594_v21  ;;  %v492_v40 = vsel %vm399_vm0, %v465_v27, 0.0 }
 0x11c   :  { %v596_v31 = vpop.f32.mrf.mxu0  ;;  %v493_v50 = vadd.f32 %v492_v40, %v491_v44 }
 0x11d   :  { %413 = vst.msk [vmem:[%s1099_s2 + $0x68] sm:$0xff] %vm399_vm0, %v386_v28  ;;  %v466_v35 = vmul.f32 %v386_v28, %v386_v28  ;;  %v597_v36 = vadd.f32 %v596_v31, %v595_v24  ;;  %v441_v41 = vsel %vm399_vm0, %v386_v28, 0.0 }
 0x11e   :  { %v598_v39 = vpop.f32.mrf.mxu0  ;;  %v442_v51 = vadd.f32 %v441_v41, %v440_v43 }
 0x11f   :  { %v391_v42 = vadd.f32 %v597_v36, %v390_v32  ;;  %v494_v46 = vsel %vm399_vm0, %v466_v35, 0.0 }
 0x120   :  { %v599_v45 = vpop.f32.mrf.mxu0  ;;  %v495_v55 = vadd.f32 %v494_v46, %v493_v50 }
 0x121   :  { %414 = vst.msk [vmem:[%s1099_s2 + $0x70] sm:$0xff] %vm399_vm0, %v391_v42  ;;  %v443_v47 = vsel %vm399_vm0, %v391_v42, 0.0  ;;  %v467_v48 = vmul.f32 %v391_v42, %v391_v42  ;;  %v600_v49 = vadd.f32 %v599_v45, %v598_v39 }
 0x122   :  { %v444_v54 = vadd.f32 %v443_v47, %v442_v51 }
 0x123   :  { %v496_v52 = vsel %vm399_vm0, %v467_v48, 0.0  ;;  %v396_v53 = vadd.f32 %v688_v17, %v600_v49 }
 0x124   :  { %v497_v58 = vadd.f32 %v496_v52, %v495_v55 }
 0x125   :  { %415 = vst.msk [vmem:[%s1099_s2 + $0x78] sm:$0xff] %vm399_vm0, %v396_v53  ;;  %v445_v56 = vsel %vm399_vm0, %v396_v53, 0.0  ;;  %v468_v57 = vmul.f32 %v396_v53, %v396_v53 }
 0x126   :  { %v446_v59 = vadd.f32 %v445_v56, %v444_v54 }
 0x127   :  { %v498_v60 = vsel %vm399_vm0, %v468_v57, 0.0 }
 0x128   :  { %v447_v61 = vrot.slane %v446_v59, 4  ;;  %v499_v62 = vadd.f32 %v498_v60, %v497_v58 }
 0x12a   :  { %v448_v63 = vadd.f32 %v447_v61, %v446_v59  ;;  %v500_v0 = vrot.slane %v499_v62, 4 }
 0x12c   :  { %v449_v2 = vrot.slane %v448_v63, 2  ;;  %v501_v3 = vadd.f32 %v500_v0, %v499_v62 }
 0x12e   :  { %v450_v4 = vadd.f32 %v449_v2, %v448_v63  ;;  %v502_v5 = vrot.slane %v501_v3, 2 }
 0x130   :  { %v503_v7 = vadd.f32 %v502_v5, %v501_v3  ;;  %v451_v8 = vrot.slane %v450_v4, 1 }
 0x132   :  { %v504_v9 = vrot.slane %v503_v7, 1  ;;  %v452_v11 = vadd.f32 %v451_v8, %v450_v4 }
 0x134   :  { %v505_v10 = vadd.f32 %v504_v9, %v503_v7 }
 0x136   :  { %v510_v12 = vsel %vm509_vm1, %v505_v10, 0.0 }
 0x137   :  { %v511_v13 = vsel %vm508_vm2, %v452_v11, %v510_v12 }
 0x138   :  { %512 = vst.msk [vmem:[%s1100_s3] sm:$0xff] %vm399_vm0, %v511_v13 }

// kernel: tile.73
= control target key start
LH: loop header
LB: loop body
LE: loop exit
PB: predicated region body
PF: predicated region fallthrough
CT: control target
= control target key end

     0   :  { %s64_s0 = inlined_call_operand.vmem [shape: f32[8], index: 0, kind: input, shape index: {}]   ;;  %s65_s1 = inlined_call_operand.vmem [shape: f32[64,8], index: 1, kind: output, shape index: {}]  }
   0x1   :  { %v4_v0 = vld [vmem:[%s64_s0] ss:$0 sm:$0xff] }
   0x2   :  { %5 = vst [vmem:[%s65_s1] sm:$0xff] %v4_v0  ;;  %20 = vst [vmem:[%s65_s1 + $0x8] sm:$0xff] %v4_v0 }
   0x3   :  { %21 = vst [vmem:[%s65_s1 + $0x10] sm:$0xff] %v4_v0  ;;  %22 = vst [vmem:[%s65_s1 + $0x18] sm:$0xff] %v4_v0 }
   0x4   :  { %23 = vst [vmem:[%s65_s1 + $0x20] sm:$0xff] %v4_v0  ;;  %24 = vst [vmem:[%s65_s1 + $0x28] sm:$0xff] %v4_v0 }
   0x5   :  { %25 = vst [vmem:[%s65_s1 + $0x30] sm:$0xff] %v4_v0  ;;  %26 = vst [vmem:[%s65_s1 + $0x38] sm:$0xff] %v4_v0 }

// kernel: tile.74
= control target key start
LH: loop header
LB: loop body
LE: loop exit
PB: predicated region body
PF: predicated region fallthrough
CT: control target
= control target key end

     0   :  { %vm6_vm0 = vcmask 1043458   ;;  %s11_s6 = smov 3  ;;  %s14_s7 = smov 12  ;;  %vm8_vm1 = vcmask 64512   ;;  %vm20_vm2 = vcmask 1048512   ;;  %vm32_vm3 = vcmask 982912   ;;  %s417_s0 = inlined_call_operand.vmem [shape: f32[64,8], index: 0, kind: input, shape index: {}]   ;;  %s418_s1 = inlined_call_operand.vmem [shape: f32[1,512], index: 1, kind: output, shape index: {}]  }
   0x1   :  { %v220_v0 = vld [vmem:[%s417_s0 + $0xf] ss:$16 sm:%s11_s6]   ;;  %s35_s12 = smov 3  ;;  %s38_s15 = smov 12  ;;  %vm44_vm4 = vcmask 917312   ;;  %vm56_vm5 = vcmask 851712  }
   0x2   :  { %v221_v1 = vld [vmem:[%s417_s0 + $0xf] ss:$16 sm:%s14_s7]   ;;  %v224_v3 = vld [vmem:[%s417_s0 + $0xd] ss:$16 sm:%s35_s12]   ;;  %s268_s16 = smov 120   ;;  %s23_s19 = smov 3 }
   0x3   :  { %v17_v2 = vsel %vm6_vm0, %v221_v1, %v220_v0  ;;  %v225_v4 = vld [vmem:[%s417_s0 + $0xd] ss:$16 sm:%s38_s15]   ;;  %s26_s20 = smov 12  ;;  %v222_v6 = vld [vmem:[%s417_s0 + $0xe] ss:$16 sm:%s23_s19]   ;;  %s47_s25 = smov 3 }
   0x4   :  { %18 = vrot.lane.b32.xlu0 %v17_v2, %s268_s16  ;;  %v41_v5 = vsel %vm6_vm0, %v225_v4, %v224_v3  ;;  %v223_v7 = vld [vmem:[%s417_s0 + $0xe] ss:$16 sm:%s26_s20]   ;;  %s269_s26 = smov 104   ;;  %s50_s29 = smov 12  ;;  %vm68_vm6 = vcmask 786112   ;;  %vm80_vm7 = vcmask 720512  }
   0x5   :  { %42 = vrot.lane.b32.xlu1 %v41_v5, %s269_s26  ;;  %v29_v8 = vsel %vm6_vm0, %v223_v7, %v222_v6  ;;  %v226_v9 = vld [vmem:[%s417_s0 + $0xc] ss:$16 sm:%s47_s25]   ;;  %s59_s3 = smov 3  ;;  %s62_s4 = smov 12  ;;  %vm92_vm8 = vcmask 654912   ;;  %vm104_vm9 = vcmask 589312  }
   0x6   :  { %v227_v10 = vld [vmem:[%s417_s0 + $0xc] ss:$16 sm:%s50_s29]   ;;  %s270_s5 = smov 112   ;;  %v228_v12 = vld [vmem:[%s417_s0 + $0xb] ss:$16 sm:%s59_s3]   ;;  %s71_s8 = smov 3 }
   0x7   :  { %v53_v11 = vsel %vm6_vm0, %v227_v10, %v226_v9  ;;  %v229_v13 = vld [vmem:[%s417_s0 + $0xb] ss:$16 sm:%s62_s4]   ;;  %v230_v14 = vld [vmem:[%s417_s0 + $0xa] ss:$16 sm:%s71_s8]   ;;  %s74_s13 = smov 12  ;;  %s271_s14 = smov 96  }
   0x8   :  { %30 = vrot.lane.b32.xlu0 %v29_v8, %s270_s5  ;;  %v65_v15 = vsel %vm6_vm0, %v229_v13, %v228_v12  ;;  %v231_v16 = vld [vmem:[%s417_s0 + $0xa] ss:$16 sm:%s74_s13]   ;;  %s83_s17 = smov 3  ;;  %s86_s18 = smov 12  ;;  %vm116_vm10 = vcmask 523712   ;;  %vm128_vm11 = vcmask 458112  }
   0x9   :  { %54 = vrot.lane.b32.xlu1 %v53_v11, %s271_s14  ;;  %v77_v17 = vsel %vm6_vm0, %v231_v16, %v230_v14  ;;  %v232_v18 = vld [vmem:[%s417_s0 + $0x9] ss:$16 sm:%s83_s17]   ;;  %s95_s23 = smov 3  ;;  %s272_s24 = smov 88   ;;  %vm140_vm12 = vcmask 392512   ;;  %vm152_vm13 = vcmask 326912  }
   0xa   :  { %v233_v19 = vld [vmem:[%s417_s0 + $0x9] ss:$16 sm:%s86_s18]   ;;  %v234_v20 = vld [vmem:[%s417_s0 + $0x8] ss:$16 sm:%s95_s23]   ;;  %s98_s27 = smov 12  ;;  %s107_s30 = smov 3 }
   0xb   :  { %v89_v21 = vsel %vm6_vm0, %v233_v19, %v232_v18  ;;  %v235_v22 = vld [vmem:[%s417_s0 + $0x8] ss:$16 sm:%s98_s27]   ;;  %s110_s2 = smov 12  ;;  %s273_s3 = smov 80   ;;  %v236_v23 = vld [vmem:[%s417_s0 + $0x7] ss:$16 sm:%s107_s30]  }
   0xc   :  { %66 = vrot.lane.b32.xlu0 %v65_v15, %s272_s24  ;;  %s119_s6 = smov 3  ;;  %v101_v24 = vsel %vm6_vm0, %v235_v22, %v234_v20  ;;  %v237_v25 = vld [vmem:[%s417_s0 + $0x7] ss:$16 sm:%s110_s2]   ;;  %s122_s11 = smov 12  ;;  %vm164_vm14 = vcmask 261312   ;;  %vm176_vm15 = vcmask 195712  }
   0xd   :  { %78 = vrot.lane.b32.xlu1 %v77_v17, %s273_s3  ;;  %v238_v26 = vld [vmem:[%s417_s0 + $0x6] ss:$16 sm:%s119_s6]   ;;  %s274_s12 = smov 72   ;;  %s131_s15 = smov 3  ;;  %v113_v28 = vsel %vm6_vm0, %v237_v25, %v236_v23 }
   0xe   :  { %v239_v27 = vld [vmem:[%s417_s0 + $0x6] ss:$16 sm:%s122_s11]   ;;  %s134_s16 = smov 12  ;;  %v240_v29 = vld [vmem:[%s417_s0 + $0x5] ss:$16 sm:%s131_s15]   ;;  %s143_s19 = smov 3 }
   0xf   :  { %s275_s20 = smov 64   ;;  %v241_v30 = vld [vmem:[%s417_s0 + $0x5] ss:$16 sm:%s134_s16]   ;;  %s146_s23 = smov 12  ;;  %v125_v31 = vsel %vm6_vm0, %v239_v27, %v238_v26  ;;  %v242_v32 = vld [vmem:[%s417_s0 + $0x4] ss:$16 sm:%s143_s19]  }
  0x10   :  { %90 = vrot.lane.b32.xlu0 %v89_v21, %s274_s12  ;;  %s155_s26 = smov 3  ;;  %s158_s27 = smov 12  ;;  %v243_v33 = vld [vmem:[%s417_s0 + $0x4] ss:$16 sm:%s146_s23]   ;;  %v137_v34 = vsel %vm6_vm0, %v241_v30, %v240_v29 }
  0x11   :  { %102 = vrot.lane.b32.xlu1 %v101_v24, %s275_s20  ;;  %s276_s28 = smov 56   ;;  %s167_s2 = smov 3  ;;  %v244_v35 = vld [vmem:[%s417_s0 + $0x3] ss:$16 sm:%s155_s26]   ;;  %v149_v37 = vsel %vm6_vm0, %v243_v33, %v242_v32 }
  0x12   :  { %s170_s5 = smov 12  ;;  %s277_s6 = smov 48   ;;  %v245_v36 = vld [vmem:[%s417_s0 + $0x3] ss:$16 sm:%s158_s27]   ;;  %v246_v38 = vld [vmem:[%s417_s0 + $0x2] ss:$16 sm:%s167_s2]  }
  0x13   :  { %s179_s9 = smov 3  ;;  %v247_v39 = vld [vmem:[%s417_s0 + $0x2] ss:$16 sm:%s170_s5]   ;;  %s182_s14 = smov 12  ;;  %v161_v41 = vsel %vm6_vm0, %v245_v36, %v244_v35 }
  0x14   :  { %114 = vrot.lane.b32.xlu0 %v113_v28, %s276_s28  ;;  %s2_s15 = smov 3  ;;  %s278_s16 = smov 40   ;;  %v248_v42 = vld [vmem:[%s417_s0 + $0x1] ss:$16 sm:%s179_s9]   ;;  %v173_v46 = vsel %vm6_vm0, %v247_v39, %v246_v38 }
  0x15   :  { %126 = vrot.lane.b32.xlu1 %v125_v31, %s277_s6  ;;  %v3_v40 = vld [vmem:[%s417_s0] ss:$16 sm:%s2_s15]   ;;  %s4_s19 = smov 12  ;;  %s279_s24 = smov 32  }
  0x16   :  { %v5_v43 = vld [vmem:[%s417_s0] ss:$16 sm:%s4_s19]   ;;  %v249_v44 = vld [vmem:[%s417_s0 + $0x1] ss:$16 sm:%s182_s14]   ;;  %s280_s0 = smov 24   ;;  %s281_s27 = smov 16  }
  0x17   :  { %v7_v45 = vsel %vm6_vm0, %v5_v43, %v3_v40  ;;  %v185_v47 = vsel %vm6_vm0, %v249_v44, %v248_v42  ;;  %s282_s28 = smov 8   ;;  %vm188_vm0 = vcmask 130112  }
  0x18   :  { %138 = vrot.lane.b32.xlu0 %v137_v34, %s278_s16  ;;  %9 = vst.msk [vmem:[#allocation0] ss:$8 sm:$0xf] %vm8_vm1, %v7_v45  }
  0x19   :  { %150 = vrot.lane.b32.xlu1 %v149_v37, %s279_s24 }
  0x1c   :  { %162 = vrot.lane.b32.xlu0 %v161_v41, %s280_s0 }
  0x1d   :  { %174 = vrot.lane.b32.xlu1 %v173_v46, %s281_s27 }
  0x20   :  { %186 = vrot.lane.b32.xlu0 %v185_v47, %s282_s28 }
  0x76   :  { %v19_v48 = vpop.permute.xlu0 %18  }
  0x77   :  { %21 = vst.msk [vmem:[#allocation0] ss:$8 sm:$0xf] %vm20_vm2, %v19_v48   ;;  %v43_v49 = vpop.permute.xlu1 %42  }
  0x7a   :  { %v31_v50 = vpop.permute.xlu0 %30  }
  0x7b   :  { %33 = vst.msk [vmem:[#allocation0] ss:$8 sm:$0xf] %vm32_vm3, %v31_v50   ;;  %v55_v51 = vpop.permute.xlu1 %54  }
  0x7c   :  { %45 = vst.msk [vmem:[#allocation0] ss:$8 sm:$0xf] %vm44_vm4, %v43_v49  }
  0x7d   :  { %57 = vst.msk [vmem:[#allocation0] ss:$8 sm:$0xf] %vm56_vm5, %v55_v51  }
  0x7e   :  { %v67_v52 = vpop.permute.xlu0 %66  }
  0x7f   :  { %69 = vst.msk [vmem:[#allocation0] ss:$8 sm:$0xf] %vm68_vm6, %v67_v52   ;;  %v79_v53 = vpop.permute.xlu1 %78  }
  0x80   :  { %81 = vst.msk [vmem:[#allocation0] ss:$8 sm:$0xf] %vm80_vm7, %v79_v53  }
  0x82   :  { %v91_v54 = vpop.permute.xlu0 %90  }
  0x83   :  { %93 = vst.msk [vmem:[#allocation0] ss:$8 sm:$0xf] %vm92_vm8, %v91_v54   ;;  %v103_v55 = vpop.permute.xlu1 %102  }
  0x84   :  { %105 = vst.msk [vmem:[#allocation0] ss:$8 sm:$0xf] %vm104_vm9, %v103_v55  }
  0x86   :  { %v115_v56 = vpop.permute.xlu0 %114  }
  0x87   :  { %117 = vst.msk [vmem:[#allocation0] ss:$8 sm:$0xf] %vm116_vm10, %v115_v56   ;;  %v127_v57 = vpop.permute.xlu1 %126  }
  0x88   :  { %129 = vst.msk [vmem:[#allocation0] ss:$8 sm:$0xf] %vm128_vm11, %v127_v57  }
  0x8a   :  { %v139_v58 = vpop.permute.xlu0 %138  }
  0x8b   :  { %141 = vst.msk [vmem:[#allocation0] ss:$8 sm:$0xf] %vm140_vm12, %v139_v58   ;;  %v151_v59 = vpop.permute.xlu1 %150  }
  0x8c   :  { %153 = vst.msk [vmem:[#allocation0] ss:$8 sm:$0xf] %vm152_vm13, %v151_v59  }
  0x8e   :  { %v163_v60 = vpop.permute.xlu0 %162  }
  0x8f   :  { %165 = vst.msk [vmem:[#allocation0] ss:$8 sm:$0xf] %vm164_vm14, %v163_v60   ;;  %v175_v61 = vpop.permute.xlu1 %174  }
  0x90   :  { %177 = vst.msk [vmem:[#allocation0] ss:$8 sm:$0xf] %vm176_vm15, %v175_v61  }
  0x92   :  { %v187_v62 = vpop.permute.xlu0 %186  }
  0x93   :  { %189 = vst.msk [vmem:[#allocation0] ss:$8 sm:$0xf] %vm188_vm0, %v187_v62  }
  0x9a   :  { %v194_v63 = vld [vmem:[#allocation0] sm:$0x1]  ;;  %v199_v0 = vld [vmem:[#allocation0 + $0x8] sm:$0x1]  ;;  %v205_v1 = vld [vmem:[#allocation0 + $0x10] sm:$0x1] }
  0x9b   :  { %197 = vst [vmem:[%s418_s1] sm:$0x1] %v194_v63  ;;  %250 = vst [vmem:[%s418_s1 + $0x1] sm:$0x1] %v199_v0  ;;  %v212_v2 = vld [vmem:[#allocation0 + $0x18] sm:$0x1] }
  0x9c   :  { %251 = vst [vmem:[%s418_s1 + $0x2] sm:$0x1] %v205_v1  ;;  %252 = vst [vmem:[%s418_s1 + $0x3] sm:$0x1] %v212_v2 }

// kernel: generator_forward.16
= control target key start
LH: loop header
LB: loop body
LE: loop exit
PB: predicated region body
PF: predicated region fallthrough
CT: control target
= control target key end

     0   :  { %v32_v0 = vlaneseq  ;;  %s270_s1 = inlined_call_operand.vmem [shape: f32[1,512], index: 1, kind: input, shape index: {}]   ;;  %s271_s2 = inlined_call_operand.vmem [shape: f32[1,512], index: 2, kind: input, shape index: {}]   ;;  %s272_s0 = inlined_call_operand.vmem [shape: f32[32,512], index: 0, kind: input, shape index: {}]   ;;  %s273_s3 = inlined_call_operand.vmem [shape: f32[32,512], index: 3, kind: output, shape index: {}]  }
   0x1   :  { %v30_v2 = vld [vmem:[%s270_s1] sm:$0xf]  ;;  %v15_v6 = vld [vmem:[%s272_s0 + $0x8] sm:$0xff]  ;;  %v16_v10 = vld [vmem:[%s272_s0 + $0x10] sm:$0xff] }
   0x2   :  { %v33_v1 = vshrl.u32 %v32_v0, 7  ;;  %v68_v3 = vld [vmem:[%s271_s2] sm:$0xf]  ;;  %v19_v12 = vld [vmem:[%s272_s0 + $0x28] sm:$0xff]  ;;  %v17_v17 = vld [vmem:[%s272_s0 + $0x18] sm:$0xff] }
   0x3   :  { %v14_v4 = vld [vmem:[%s272_s0] sm:$0xff]  ;;  %v20_v18 = vld [vmem:[%s272_s0 + $0x30] sm:$0xff]  ;;  %v21_v19 = vld [vmem:[%s272_s0 + $0x38] sm:$0xff] }
   0x4   :  { %v34_v5 = vsub.s32 0, %v33_v1  ;;  %v38_v7 = vsub.s32 1, %v33_v1  ;;  %v42_v8 = vsub.s32 2, %v33_v1  ;;  %v46_v9 = vsub.s32 3, %v33_v1  ;;  %v18_v11 = vld [vmem:[%s272_s0 + $0x20] sm:$0xff]  ;;  %v23_v37 = vld [vmem:[%s272_s0 + $0x48] sm:$0xff] }
   0x5   :  { %v22_v36 = vld [vmem:[%s272_s0 + $0x40] sm:$0xff]  ;;  %v24_v38 = vld [vmem:[%s272_s0 + $0x50] sm:$0xff]  ;;  %v25_v43 = vld [vmem:[%s272_s0 + $0x58] sm:$0xff] }
   0x6   :  { %v35_v13 = vrot.slane %v30_v2, %v34_v5  ;;  %v183_v14 = vrot.slane %v68_v3, %v34_v5  ;;  %v39_v15 = vrot.slane %v30_v2, %v38_v7  ;;  %v77_v16 = vrot.slane %v68_v3, %v38_v7  ;;  %v26_v44 = vld [vmem:[%s272_s0 + $0x60] sm:$0xff]  ;;  %v27_v45 = vld [vmem:[%s272_s0 + $0x68] sm:$0xff]  ;;  %v28_v50 = vld [vmem:[%s272_s0 + $0x70] sm:$0xff] }
   0x7   :  { %v43_v20 = vrot.slane %v30_v2, %v42_v8  ;;  %v81_v21 = vrot.slane %v68_v3, %v42_v8  ;;  %v47_v22 = vrot.slane %v30_v2, %v46_v9  ;;  %v85_v23 = vrot.slane %v68_v3, %v46_v9  ;;  %v29_v51 = vld [vmem:[%s272_s0 + $0x78] sm:$0xff] }
   0x8   :  { %v52_v24 = vmul.f32 %v35_v13, %v14_v4  ;;  %v53_v25 = vmul.f32 %v39_v15, %v15_v6  ;;  %v56_v26 = vmul.f32 %v35_v13, %v18_v11  ;;  %v57_v27 = vmul.f32 %v39_v15, %v19_v12 }
   0x9   :  { %v54_v28 = vmul.f32 %v43_v20, %v16_v10  ;;  %v55_v29 = vmul.f32 %v47_v22, %v17_v17  ;;  %v58_v30 = vmul.f32 %v43_v20, %v20_v18  ;;  %v59_v31 = vmul.f32 %v47_v22, %v21_v19 }
   0xa   :  { %v90_v32 = vadd.f32 %v183_v14, %v52_v24  ;;  %v91_v33 = vadd.f32 %v77_v16, %v53_v25  ;;  %v94_v34 = vadd.f32 %v183_v14, %v56_v26  ;;  %v95_v35 = vadd.f32 %v77_v16, %v57_v27 }
   0xb   :  { %v92_v39 = vadd.f32 %v81_v21, %v54_v28  ;;  %v93_v40 = vadd.f32 %v85_v23, %v55_v29  ;;  %v96_v41 = vadd.f32 %v81_v21, %v58_v30  ;;  %v97_v42 = vadd.f32 %v85_v23, %v59_v31 }
   0xc   :  { %v106_v46 = vmax.f32 %v90_v32, 0.0  ;;  %v107_v47 = vmax.f32 %v91_v33, 0.0  ;;  %v110_v48 = vmax.f32 %v94_v34, 0.0  ;;  %v111_v49 = vmax.f32 %v95_v35, 0.0 }
   0xd   :  { %v108_v52 = vmax.f32 %v92_v39, 0.0  ;;  %v109_v53 = vmax.f32 %v93_v40, 0.0  ;;  %v112_v54 = vmax.f32 %v96_v41, 0.0  ;;  %v113_v55 = vmax.f32 %v97_v42, 0.0 }
   0xe   :  { %122 = vst [vmem:[%s273_s3] sm:$0xff] %v106_v46  ;;  %123 = vst [vmem:[%s273_s3 + $0x8] sm:$0xff] %v107_v47  ;;  %v60_v56 = vmul.f32 %v35_v13, %v22_v36  ;;  %v61_v57 = vmul.f32 %v39_v15, %v23_v37  ;;  %v62_v58 = vmul.f32 %v43_v20, %v24_v38 }
   0xf   :  { %126 = vst [vmem:[%s273_s3 + $0x20] sm:$0xff] %v110_v48  ;;  %127 = vst [vmem:[%s273_s3 + $0x28] sm:$0xff] %v111_v49  ;;  %v63_v59 = vmul.f32 %v47_v22, %v25_v43  ;;  %v64_v60 = vmul.f32 %v35_v13, %v26_v44  ;;  %v65_v61 = vmul.f32 %v39_v15, %v27_v45 }
  0x10   :  { %124 = vst [vmem:[%s273_s3 + $0x10] sm:$0xff] %v108_v52  ;;  %125 = vst [vmem:[%s273_s3 + $0x18] sm:$0xff] %v109_v53  ;;  %v66_v62 = vmul.f32 %v43_v20, %v28_v50  ;;  %v67_v63 = vmul.f32 %v47_v22, %v29_v51  ;;  %v98_v0 = vadd.f32 %v183_v14, %v60_v56 }
  0x11   :  { %128 = vst [vmem:[%s273_s3 + $0x30] sm:$0xff] %v112_v54  ;;  %129 = vst [vmem:[%s273_s3 + $0x38] sm:$0xff] %v113_v55  ;;  %v99_v1 = vadd.f32 %v77_v16, %v61_v57  ;;  %v100_v2 = vadd.f32 %v81_v21, %v62_v58  ;;  %v101_v3 = vadd.f32 %v85_v23, %v63_v59 }
  0x12   :  { %v102_v4 = vadd.f32 %v183_v14, %v64_v60  ;;  %v103_v5 = vadd.f32 %v77_v16, %v65_v61  ;;  %v104_v6 = vadd.f32 %v81_v21, %v66_v62  ;;  %v105_v7 = vadd.f32 %v85_v23, %v67_v63 }
  0x13   :  { %v114_v8 = vmax.f32 %v98_v0, 0.0  ;;  %v115_v9 = vmax.f32 %v99_v1, 0.0  ;;  %v116_v10 = vmax.f32 %v100_v2, 0.0  ;;  %v117_v11 = vmax.f32 %v101_v3, 0.0 }
  0x14   :  { %v118_v12 = vmax.f32 %v102_v4, 0.0  ;;  %v119_v17 = vmax.f32 %v103_v5, 0.0  ;;  %v120_v13 = vmax.f32 %v104_v6, 0.0  ;;  %v121_v15 = vmax.f32 %v105_v7, 0.0 }
  0x15   :  { %130 = vst [vmem:[%s273_s3 + $0x40] sm:$0xff] %v114_v8  ;;  %131 = vst [vmem:[%s273_s3 + $0x48] sm:$0xff] %v115_v9 }
  0x16   :  { %132 = vst [vmem:[%s273_s3 + $0x50] sm:$0xff] %v116_v10  ;;  %133 = vst [vmem:[%s273_s3 + $0x58] sm:$0xff] %v117_v11 }
  0x17   :  { %134 = vst [vmem:[%s273_s3 + $0x60] sm:$0xff] %v118_v12  ;;  %135 = vst [vmem:[%s273_s3 + $0x68] sm:$0xff] %v119_v17 }
  0x18   :  { %136 = vst [vmem:[%s273_s3 + $0x70] sm:$0xff] %v120_v13  ;;  %137 = vst [vmem:[%s273_s3 + $0x78] sm:$0xff] %v121_v15 }

// kernel: generator_forward.15
= control target key start
LH: loop header
LB: loop body
LE: loop exit
PB: predicated region body
PF: predicated region fallthrough
CT: control target
= control target key end

     0   :  { %v1033_v0 = vmov 0.0   ;;  %vm558_vm0 = vcmask 261120   ;;  %s2316_s1 = inlined_call_operand.vmem [shape: f32[256,32], index: 1, kind: input, shape index: {}]   ;;  %s2317_s0 = inlined_call_operand.vmem [shape: f32[512,256], index: 0, kind: input, shape index: {}]   ;;  %s2318_s2 = inlined_call_operand.vmem [shape: f32[512,32], index: 2, kind: output, shape index: {0}]   ;;  %s2319_s3 = inlined_call_operand.vmem [shape: f32[8,32], index: 3, kind: output, shape index: {1}]  }
   0x1   :  { %173 = vmatprep.subr.mxu0 %v1033_v0  ;;  %v156_v1 = vld [vmem:[%s2316_s1 + $0x78] sm:$0xff]  ;;  %v155_v2 = vld [vmem:[%s2316_s1 + $0x70] sm:$0xff]  ;;  %968 = vmatprep.subr.mxu1 %v1033_v0  ;;  %v154_v3 = vld [vmem:[%s2316_s1 + $0x68] sm:$0xff] }
   0x2   :  { %174 = vmatpush1.msra.mxu0 %v156_v1  ;;  %1000 = vmatpush1.msra.mxu1 %v156_v1  ;;  %v153_v4 = vld [vmem:[%s2316_s1 + $0x60] sm:$0xff]  ;;  %v152_v5 = vld [vmem:[%s2316_s1 + $0x58] sm:$0xff]  ;;  %v151_v6 = vld [vmem:[%s2316_s1 + $0x50] sm:$0xff] }
   0x3   :  { %175 = vmatprep.subr.mxu0 %v1033_v0  ;;  %969 = vmatprep.subr.mxu1 %v1033_v0  ;;  %v150_v7 = vld [vmem:[%s2316_s1 + $0x48] sm:$0xff]  ;;  %v149_v9 = vld [vmem:[%s2316_s1 + $0x40] sm:$0xff]  ;;  %v148_v10 = vld [vmem:[%s2316_s1 + $0x38] sm:$0xff] }
   0x4   :  { %176 = vmatpush1.msra.mxu0 %v155_v2  ;;  %1001 = vmatpush1.msra.mxu1 %v155_v2  ;;  %v14_v8 = vld [vmem:[%s2317_s0 + $0x8] sm:$0xff]  ;;  %v147_v11 = vld [vmem:[%s2316_s1 + $0x30] sm:$0xff]  ;;  %v145_v13 = vld [vmem:[%s2316_s1 + $0x20] sm:$0xff] }
   0x5   :  { %177 = vmatprep.subr.mxu0 %v1033_v0  ;;  %970 = vmatprep.subr.mxu1 %v1033_v0  ;;  %v146_v12 = vld [vmem:[%s2316_s1 + $0x28] sm:$0xff]  ;;  %v144_v14 = vld [vmem:[%s2316_s1 + $0x18] sm:$0xff]  ;;  %v143_v15 = vld [vmem:[%s2316_s1 + $0x10] sm:$0xff] }
   0x6   :  { %178 = vmatpush1.msra.mxu0 %v154_v3  ;;  %1002 = vmatpush1.msra.mxu1 %v154_v3  ;;  %v142_v16 = vld [vmem:[%s2316_s1 + $0x8] sm:$0xff]  ;;  %v141_v17 = vld [vmem:[%s2316_s1] sm:$0xff]  ;;  %v172_v18 = vld [vmem:[%s2316_s1 + $0xf8] sm:$0xff] }
   0x7   :  { %179 = vmatprep.subr.mxu0 %v1033_v0  ;;  %971 = vmatprep.subr.mxu1 %v1033_v0  ;;  %v171_v19 = vld [vmem:[%s2316_s1 + $0xf0] sm:$0xff]  ;;  %v170_v20 = vld [vmem:[%s2316_s1 + $0xe8] sm:$0xff]  ;;  %v169_v21 = vld [vmem:[%s2316_s1 + $0xe0] sm:$0xff] }
   0x8   :  { %180 = vmatpush1.msra.mxu0 %v153_v4  ;;  %1003 = vmatpush1.msra.mxu1 %v153_v4  ;;  %v168_v22 = vld [vmem:[%s2316_s1 + $0xd8] sm:$0xff]  ;;  %v167_v23 = vld [vmem:[%s2316_s1 + $0xd0] sm:$0xff]  ;;  %v166_v24 = vld [vmem:[%s2316_s1 + $0xc8] sm:$0xff] }
   0x9   :  { %181 = vmatprep.subr.mxu0 %v1033_v0  ;;  %972 = vmatprep.subr.mxu1 %v1033_v0  ;;  %v165_v25 = vld [vmem:[%s2316_s1 + $0xc0] sm:$0xff]  ;;  %v164_v26 = vld [vmem:[%s2316_s1 + $0xb8] sm:$0xff]  ;;  %v163_v27 = vld [vmem:[%s2316_s1 + $0xb0] sm:$0xff] }
   0xa   :  { %182 = vmatpush1.msra.mxu0 %v152_v5  ;;  %1004 = vmatpush1.msra.mxu1 %v152_v5  ;;  %v162_v28 = vld [vmem:[%s2316_s1 + $0xa8] sm:$0xff]  ;;  %v161_v29 = vld [vmem:[%s2316_s1 + $0xa0] sm:$0xff]  ;;  %v160_v30 = vld [vmem:[%s2316_s1 + $0x98] sm:$0xff] }
   0xb   :  { %183 = vmatprep.subr.mxu0 %v1033_v0  ;;  %973 = vmatprep.subr.mxu1 %v1033_v0  ;;  %v159_v31 = vld [vmem:[%s2316_s1 + $0x90] sm:$0xff]  ;;  %v158_v32 = vld [vmem:[%s2316_s1 + $0x88] sm:$0xff]  ;;  %v157_v33 = vld [vmem:[%s2316_s1 + $0x80] sm:$0xff] }
   0xc   :  { %184 = vmatpush1.msra.mxu0 %v151_v6  ;;  %237 = vmatprep.mubr.f32.mxu0 %v14_v8  ;;  %v13_v34 = vld [vmem:[%s2317_s0] sm:$0xff]  ;;  %v16_v35 = vld [vmem:[%s2317_s0 + $0x18] sm:$0xff]  ;;  %v78_v36 = vld [vmem:[%s2317_s0 + $0x208] sm:$0xff] }
   0xd   :  { %185 = vmatprep.subr.mxu0 %v1033_v0  ;;  %1005 = vmatpush1.msra.mxu1 %v151_v6  ;;  %v77_v37 = vld [vmem:[%s2317_s0 + $0x200] sm:$0xff]  ;;  %v80_v38 = vld [vmem:[%s2317_s0 + $0x218] sm:$0xff]  ;;  %v15_v39 = vld [vmem:[%s2317_s0 + $0x10] sm:$0xff] }
   0xe   :  { %186 = vmatpush1.msra.mxu0 %v150_v7  ;;  %974 = vmatprep.subr.mxu1 %v1033_v0  ;;  %v18_v40 = vld [vmem:[%s2317_s0 + $0x28] sm:$0xff]  ;;  %v79_v41 = vld [vmem:[%s2317_s0 + $0x210] sm:$0xff]  ;;  %v17_v43 = vld [vmem:[%s2317_s0 + $0x20] sm:$0xff] }
   0xf   :  { %187 = vmatprep.subr.mxu0 %v1033_v0  ;;  %1006 = vmatpush1.msra.mxu1 %v150_v7  ;;  %v82_v42 = vld [vmem:[%s2317_s0 + $0x228] sm:$0xff]  ;;  %v20_v44 = vld [vmem:[%s2317_s0 + $0x38] sm:$0xff]  ;;  %v81_v45 = vld [vmem:[%s2317_s0 + $0x220] sm:$0xff] }
  0x10   :  { %188 = vmatpush1.msra.mxu0 %v149_v9  ;;  %975 = vmatprep.subr.mxu1 %v1033_v0  ;;  %v84_v46 = vld [vmem:[%s2317_s0 + $0x238] sm:$0xff]  ;;  %v19_v47 = vld [vmem:[%s2317_s0 + $0x30] sm:$0xff]  ;;  %v22_v48 = vld [vmem:[%s2317_s0 + $0x48] sm:$0xff] }
  0x11   :  { %189 = vmatprep.subr.mxu0 %v1033_v0  ;;  %1007 = vmatpush1.msra.mxu1 %v149_v9  ;;  %v83_v49 = vld [vmem:[%s2317_s0 + $0x230] sm:$0xff]  ;;  %v86_v50 = vld [vmem:[%s2317_s0 + $0x248] sm:$0xff]  ;;  %v21_v51 = vld [vmem:[%s2317_s0 + $0x40] sm:$0xff] }
  0x12   :  { %190 = vmatpush1.msra.mxu0 %v148_v10  ;;  %976 = vmatprep.subr.mxu1 %v1033_v0  ;;  %v24_v52 = vld [vmem:[%s2317_s0 + $0x58] sm:$0xff]  ;;  %v85_v53 = vld [vmem:[%s2317_s0 + $0x240] sm:$0xff]  ;;  %v23_v55 = vld [vmem:[%s2317_s0 + $0x50] sm:$0xff] }
  0x13   :  { %191 = vmatprep.subr.mxu0 %v1033_v0  ;;  %1008 = vmatpush1.msra.mxu1 %v148_v10  ;;  %v88_v54 = vld [vmem:[%s2317_s0 + $0x258] sm:$0xff]  ;;  %v26_v56 = vld [vmem:[%s2317_s0 + $0x68] sm:$0xff]  ;;  %v87_v57 = vld [vmem:[%s2317_s0 + $0x250] sm:$0xff] }
  0x14   :  { %192 = vmatpush1.msra.mxu0 %v147_v11  ;;  %977 = vmatprep.subr.mxu1 %v1033_v0  ;;  %v90_v58 = vld [vmem:[%s2317_s0 + $0x268] sm:$0xff]  ;;  %v25_v59 = vld [vmem:[%s2317_s0 + $0x60] sm:$0xff]  ;;  %v28_v60 = vld [vmem:[%s2317_s0 + $0x78] sm:$0xff] }
  0x15   :  { %193 = vmatprep.subr.mxu0 %v1033_v0  ;;  %1009 = vmatpush1.msra.mxu1 %v147_v11  ;;  %v89_v61 = vld [vmem:[%s2317_s0 + $0x260] sm:$0xff]  ;;  %v92_v62 = vld [vmem:[%s2317_s0 + $0x278] sm:$0xff]  ;;  %v27_v63 = vld [vmem:[%s2317_s0 + $0x70] sm:$0xff] }
  0x16   :  { %194 = vmatpush1.msra.mxu0 %v146_v12  ;;  %978 = vmatprep.subr.mxu1 %v1033_v0  ;;  %v91_v1 = vld [vmem:[%s2317_s0 + $0x270] sm:$0xff]  ;;  %v94_v2 = vld [vmem:[%s2317_s0 + $0x288] sm:$0xff]  ;;  %v29_v3 = vld [vmem:[%s2317_s0 + $0x80] sm:$0xff] }
  0x17   :  { %195 = vmatprep.subr.mxu0 %v1033_v0  ;;  %1010 = vmatpush1.msra.mxu1 %v146_v12  ;;  %v32_v4 = vld [vmem:[%s2317_s0 + $0x98] sm:$0xff]  ;;  %v93_v5 = vld [vmem:[%s2317_s0 + $0x280] sm:$0xff]  ;;  %v31_v7 = vld [vmem:[%s2317_s0 + $0x90] sm:$0xff] }
  0x18   :  { %196 = vmatpush1.msra.mxu0 %v145_v13  ;;  %979 = vmatprep.subr.mxu1 %v1033_v0  ;;  %v96_v6 = vld [vmem:[%s2317_s0 + $0x298] sm:$0xff]  ;;  %v34_v8 = vld [vmem:[%s2317_s0 + $0xa8] sm:$0xff]  ;;  %v95_v9 = vld [vmem:[%s2317_s0 + $0x290] sm:$0xff] }
  0x19   :  { %197 = vmatprep.subr.mxu0 %v1033_v0  ;;  %1011 = vmatpush1.msra.mxu1 %v145_v13  ;;  %v98_v10 = vld [vmem:[%s2317_s0 + $0x2a8] sm:$0xff]  ;;  %v33_v11 = vld [vmem:[%s2317_s0 + $0xa0] sm:$0xff]  ;;  %v36_v12 = vld [vmem:[%s2317_s0 + $0xb8] sm:$0xff] }
  0x1a   :  { %198 = vmatpush1.msra.mxu0 %v144_v14  ;;  %980 = vmatprep.subr.mxu1 %v1033_v0  ;;  %v97_v13 = vld [vmem:[%s2317_s0 + $0x2a0] sm:$0xff] }
  0x1b   :  { %199 = vmatprep.subr.mxu0 %v1033_v0  ;;  %1012 = vmatpush1.msra.mxu1 %v144_v14  ;;  %v100_v14 = vld [vmem:[%s2317_s0 + $0x2b8] sm:$0xff] }
  0x1c   :  { %200 = vmatpush1.msra.mxu0 %v143_v15  ;;  %981 = vmatprep.subr.mxu1 %v1033_v0 }
  0x1d   :  { %201 = vmatprep.subr.mxu0 %v1033_v0  ;;  %1013 = vmatpush1.msra.mxu1 %v143_v15  ;;  %v35_v15 = vld [vmem:[%s2317_s0 + $0xb0] sm:$0xff] }
  0x1e   :  { %202 = vmatpush1.msra.mxu0 %v142_v16  ;;  %982 = vmatprep.subr.mxu1 %v1033_v0 }
  0x1f   :  { %203 = vmatprep.subr.mxu0 %v1033_v0  ;;  %1014 = vmatpush1.msra.mxu1 %v142_v16  ;;  %v38_v16 = vld [vmem:[%s2317_s0 + $0xc8] sm:$0xff] }
  0x20   :  { %204 = vmatpush1.msra.mxu0 %v141_v17  ;;  %983 = vmatprep.subr.mxu1 %v1033_v0 }
  0x21   :  { %205 = vmatprep.subr.mxu0 %v1033_v0  ;;  %1015 = vmatpush1.msra.mxu1 %v141_v17  ;;  %v99_v17 = vld [vmem:[%s2317_s0 + $0x2b0] sm:$0xff] }
  0x22   :  { %206 = vmatpush2.msra.mxu0 %v172_v18  ;;  %984 = vmatprep.subr.mxu1 %v1033_v0 }
  0x23   :  { %207 = vmatprep.subr.mxu0 %v1033_v0  ;;  %1016 = vmatpush2.msra.mxu1 %v172_v18  ;;  %v102_v18 = vld [vmem:[%s2317_s0 + $0x2c8] sm:$0xff] }
  0x24   :  { %208 = vmatpush2.msra.mxu0 %v171_v19  ;;  %985 = vmatprep.subr.mxu1 %v1033_v0 }
  0x25   :  { %209 = vmatprep.subr.mxu0 %v1033_v0  ;;  %1017 = vmatpush2.msra.mxu1 %v171_v19  ;;  %v37_v19 = vld [vmem:[%s2317_s0 + $0xc0] sm:$0xff] }
  0x26   :  { %210 = vmatpush2.msra.mxu0 %v170_v20  ;;  %986 = vmatprep.subr.mxu1 %v1033_v0 }
  0x27   :  { %211 = vmatprep.subr.mxu0 %v1033_v0  ;;  %1018 = vmatpush2.msra.mxu1 %v170_v20  ;;  %v40_v20 = vld [vmem:[%s2317_s0 + $0xd8] sm:$0xff] }
  0x28   :  { %212 = vmatpush2.msra.mxu0 %v169_v21  ;;  %987 = vmatprep.subr.mxu1 %v1033_v0 }
  0x29   :  { %213 = vmatprep.subr.mxu0 %v1033_v0  ;;  %1019 = vmatpush2.msra.mxu1 %v169_v21  ;;  %v101_v21 = vld [vmem:[%s2317_s0 + $0x2c0] sm:$0xff] }
  0x2a   :  { %214 = vmatpush2.msra.mxu0 %v168_v22  ;;  %988 = vmatprep.subr.mxu1 %v1033_v0 }
  0x2b   :  { %215 = vmatprep.subr.mxu0 %v1033_v0  ;;  %1020 = vmatpush2.msra.mxu1 %v168_v22  ;;  %v104_v22 = vld [vmem:[%s2317_s0 + $0x2d8] sm:$0xff] }
  0x2c   :  { %216 = vmatpush2.msra.mxu0 %v167_v23  ;;  %989 = vmatprep.subr.mxu1 %v1033_v0 }
  0x2d   :  { %217 = vmatprep.subr.mxu0 %v1033_v0  ;;  %1021 = vmatpush2.msra.mxu1 %v167_v23  ;;  %v39_v23 = vld [vmem:[%s2317_s0 + $0xd0] sm:$0xff] }
  0x2e   :  { %218 = vmatpush2.msra.mxu0 %v166_v24  ;;  %990 = vmatprep.subr.mxu1 %v1033_v0 }
  0x2f   :  { %219 = vmatprep.subr.mxu0 %v1033_v0  ;;  %1022 = vmatpush2.msra.mxu1 %v166_v24  ;;  %v42_v24 = vld [vmem:[%s2317_s0 + $0xe8] sm:$0xff] }
  0x30   :  { %220 = vmatpush2.msra.mxu0 %v165_v25  ;;  %991 = vmatprep.subr.mxu1 %v1033_v0 }
  0x31   :  { %221 = vmatprep.subr.mxu0 %v1033_v0  ;;  %1023 = vmatpush2.msra.mxu1 %v165_v25  ;;  %v103_v25 = vld [vmem:[%s2317_s0 + $0x2d0] sm:$0xff] }
  0x32   :  { %222 = vmatpush2.msra.mxu0 %v164_v26  ;;  %992 = vmatprep.subr.mxu1 %v1033_v0 }
  0x33   :  { %223 = vmatprep.subr.mxu0 %v1033_v0  ;;  %1024 = vmatpush2.msra.mxu1 %v164_v26  ;;  %v106_v26 = vld [vmem:[%s2317_s0 + $0x2e8] sm:$0xff] }
  0x34   :  { %224 = vmatpush2.msra.mxu0 %v163_v27  ;;  %993 = vmatprep.subr.mxu1 %v1033_v0 }
  0x35   :  { %225 = vmatprep.subr.mxu0 %v1033_v0  ;;  %1025 = vmatpush2.msra.mxu1 %v163_v27  ;;  %v41_v27 = vld [vmem:[%s2317_s0 + $0xe0] sm:$0xff] }
  0x36   :  { %226 = vmatpush2.msra.mxu0 %v162_v28  ;;  %994 = vmatprep.subr.mxu1 %v1033_v0 }
  0x37   :  { %227 = vmatprep.subr.mxu0 %v1033_v0  ;;  %1026 = vmatpush2.msra.mxu1 %v162_v28  ;;  %v44_v28 = vld [vmem:[%s2317_s0 + $0xf8] sm:$0xff] }
  0x38   :  { %228 = vmatpush2.msra.mxu0 %v161_v29  ;;  %995 = vmatprep.subr.mxu1 %v1033_v0 }
  0x39   :  { %229 = vmatprep.subr.mxu0 %v1033_v0  ;;  %1027 = vmatpush2.msra.mxu1 %v161_v29  ;;  %v105_v29 = vld [vmem:[%s2317_s0 + $0x2e0] sm:$0xff] }
  0x3a   :  { %230 = vmatpush2.msra.mxu0 %v160_v30  ;;  %996 = vmatprep.subr.mxu1 %v1033_v0 }
  0x3b   :  { %231 = vmatprep.subr.mxu0 %v1033_v0  ;;  %1028 = vmatpush2.msra.mxu1 %v160_v30  ;;  %v108_v30 = vld [vmem:[%s2317_s0 + $0x2f8] sm:$0xff] }
  0x3c   :  { %232 = vmatpush2.msra.mxu0 %v159_v31  ;;  %997 = vmatprep.subr.mxu1 %v1033_v0 }
  0x3d   :  { %233 = vmatprep.subr.mxu0 %v1033_v0  ;;  %1029 = vmatpush2.msra.mxu1 %v159_v31  ;;  %v43_v31 = vld [vmem:[%s2317_s0 + $0xf0] sm:$0xff] }
  0x3e   :  { %234 = vmatpush2.msra.mxu0 %v158_v32  ;;  %998 = vmatprep.subr.mxu1 %v1033_v0 }
  0x3f   :  { %235 = vmatprep.subr.mxu0 %v1033_v0  ;;  %1030 = vmatpush2.msra.mxu1 %v158_v32  ;;  %v46_v32 = vld [vmem:[%s2317_s0 + $0x108] sm:$0xff] }
  0x40   :  { %236 = vmatpush2.msra.mxu0 %v157_v33  ;;  %999 = vmatprep.subr.mxu1 %v1033_v0  ;;  %v30_v0 = vld [vmem:[%s2317_s0 + $0x88] sm:$0xff] }
  0x41   :  { %238 = vmatmul.mubr.f32.vlgmr.msra.gmra.mxu0 %v13_v34  ;;  %1031 = vmatpush2.msra.mxu1 %v157_v33  ;;  %v107_v33 = vld [vmem:[%s2317_s0 + $0x2f0] sm:$0xff]  ;;  %v110_v34 = vld [vmem:[%s2317_s0 + $0x308] sm:$0xff] }
  0x42   :  { %242 = vmatprep.mubr.f32.mxu0 %v16_v35  ;;  %397 = vmatprep.mubr.f32.mxu1 %v78_v36  ;;  %v45_v35 = vld [vmem:[%s2317_s0 + $0x100] sm:$0xff]  ;;  %v48_v36 = vld [vmem:[%s2317_s0 + $0x118] sm:$0xff] }
  0x43   :  { %398 = vmatmul.mubr.f32.vlgmr.msra.gmra.mxu1 %v77_v37  ;;  %v109_v37 = vld [vmem:[%s2317_s0 + $0x300] sm:$0xff] }
  0x44   :  { %402 = vmatprep.mubr.f32.mxu1 %v80_v38  ;;  %v112_v38 = vld [vmem:[%s2317_s0 + $0x318] sm:$0xff] }
  0x45   :  { %243 = vmatmul.mubr.f32.gmra.mxu0 %v15_v39  ;;  %v47_v39 = vld [vmem:[%s2317_s0 + $0x110] sm:$0xff] }
  0x46   :  { %247 = vmatprep.mubr.f32.mxu0 %v18_v40  ;;  %v50_v40 = vld [vmem:[%s2317_s0 + $0x128] sm:$0xff] }
  0x47   :  { %403 = vmatmul.mubr.f32.gmra.mxu1 %v79_v41  ;;  %v111_v41 = vld [vmem:[%s2317_s0 + $0x310] sm:$0xff] }
  0x48   :  { %407 = vmatprep.mubr.f32.mxu1 %v82_v42  ;;  %v114_v42 = vld [vmem:[%s2317_s0 + $0x328] sm:$0xff] }
  0x49   :  { %248 = vmatmul.mubr.f32.gmra.mxu0 %v17_v43  ;;  %v49_v43 = vld [vmem:[%s2317_s0 + $0x120] sm:$0xff] }
  0x4a   :  { %252 = vmatprep.mubr.f32.mxu0 %v20_v44  ;;  %v52_v44 = vld [vmem:[%s2317_s0 + $0x138] sm:$0xff] }
  0x4b   :  { %408 = vmatmul.mubr.f32.gmra.mxu1 %v81_v45  ;;  %v113_v45 = vld [vmem:[%s2317_s0 + $0x320] sm:$0xff] }
  0x4c   :  { %412 = vmatprep.mubr.f32.mxu1 %v84_v46  ;;  %v116_v46 = vld [vmem:[%s2317_s0 + $0x338] sm:$0xff] }
  0x4d   :  { %253 = vmatmul.mubr.f32.gmra.mxu0 %v19_v47  ;;  %v51_v47 = vld [vmem:[%s2317_s0 + $0x130] sm:$0xff] }
  0x4e   :  { %257 = vmatprep.mubr.f32.mxu0 %v22_v48  ;;  %v54_v48 = vld [vmem:[%s2317_s0 + $0x148] sm:$0xff] }
  0x4f   :  { %413 = vmatmul.mubr.f32.gmra.mxu1 %v83_v49  ;;  %v115_v49 = vld [vmem:[%s2317_s0 + $0x330] sm:$0xff] }
  0x50   :  { %417 = vmatprep.mubr.f32.mxu1 %v86_v50  ;;  %v118_v50 = vld [vmem:[%s2317_s0 + $0x348] sm:$0xff] }
  0x51   :  { %258 = vmatmul.mubr.f32.gmra.mxu0 %v21_v51  ;;  %v53_v51 = vld [vmem:[%s2317_s0 + $0x140] sm:$0xff] }
  0x52   :  { %262 = vmatprep.mubr.f32.mxu0 %v24_v52  ;;  %v56_v52 = vld [vmem:[%s2317_s0 + $0x158] sm:$0xff] }
  0x53   :  { %418 = vmatmul.mubr.f32.gmra.mxu1 %v85_v53  ;;  %v117_v53 = vld [vmem:[%s2317_s0 + $0x340] sm:$0xff] }
  0x54   :  { %422 = vmatprep.mubr.f32.mxu1 %v88_v54  ;;  %v120_v54 = vld [vmem:[%s2317_s0 + $0x358] sm:$0xff] }
  0x55   :  { %263 = vmatmul.mubr.f32.gmra.mxu0 %v23_v55  ;;  %v55_v55 = vld [vmem:[%s2317_s0 + $0x150] sm:$0xff] }
  0x56   :  { %267 = vmatprep.mubr.f32.mxu0 %v26_v56  ;;  %v58_v56 = vld [vmem:[%s2317_s0 + $0x168] sm:$0xff] }
  0x57   :  { %423 = vmatmul.mubr.f32.gmra.mxu1 %v87_v57  ;;  %v119_v57 = vld [vmem:[%s2317_s0 + $0x350] sm:$0xff] }
  0x58   :  { %427 = vmatprep.mubr.f32.mxu1 %v90_v58  ;;  %v122_v58 = vld [vmem:[%s2317_s0 + $0x368] sm:$0xff] }
  0x59   :  { %268 = vmatmul.mubr.f32.gmra.mxu0 %v25_v59  ;;  %v57_v59 = vld [vmem:[%s2317_s0 + $0x160] sm:$0xff] }
  0x5a   :  { %272 = vmatprep.mubr.f32.mxu0 %v28_v60  ;;  %v60_v60 = vld [vmem:[%s2317_s0 + $0x178] sm:$0xff] }
  0x5b   :  { %428 = vmatmul.mubr.f32.gmra.mxu1 %v89_v61  ;;  %v121_v61 = vld [vmem:[%s2317_s0 + $0x360] sm:$0xff] }
  0x5c   :  { %432 = vmatprep.mubr.f32.mxu1 %v92_v62  ;;  %v124_v62 = vld [vmem:[%s2317_s0 + $0x378] sm:$0xff] }
  0x5d   :  { %273 = vmatmul.mubr.f32.gmra.mxu0 %v27_v63  ;;  %v59_v63 = vld [vmem:[%s2317_s0 + $0x170] sm:$0xff] }
  0x5e   :  { %277 = vmatprep.mubr.f32.mxu0 %v30_v0  ;;  %v62_v0 = vld [vmem:[%s2317_s0 + $0x188] sm:$0xff] }
  0x5f   :  { %433 = vmatmul.mubr.f32.gmra.mxu1 %v91_v1  ;;  %v123_v1 = vld [vmem:[%s2317_s0 + $0x370] sm:$0xff] }
  0x60   :  { %437 = vmatprep.mubr.f32.mxu1 %v94_v2  ;;  %v126_v2 = vld [vmem:[%s2317_s0 + $0x388] sm:$0xff] }
  0x61   :  { %278 = vmatmul.mubr.f32.gmra.mxu0 %v29_v3  ;;  %v61_v3 = vld [vmem:[%s2317_s0 + $0x180] sm:$0xff] }
  0x62   :  { %282 = vmatprep.mubr.f32.mxu0 %v32_v4  ;;  %v64_v4 = vld [vmem:[%s2317_s0 + $0x198] sm:$0xff] }
  0x63   :  { %438 = vmatmul.mubr.f32.gmra.mxu1 %v93_v5  ;;  %v125_v5 = vld [vmem:[%s2317_s0 + $0x380] sm:$0xff] }
  0x64   :  { %442 = vmatprep.mubr.f32.mxu1 %v96_v6  ;;  %v128_v6 = vld [vmem:[%s2317_s0 + $0x398] sm:$0xff] }
  0x65   :  { %283 = vmatmul.mubr.f32.gmra.mxu0 %v31_v7  ;;  %v63_v7 = vld [vmem:[%s2317_s0 + $0x190] sm:$0xff] }
  0x66   :  { %287 = vmatprep.mubr.f32.mxu0 %v34_v8  ;;  %v66_v8 = vld [vmem:[%s2317_s0 + $0x1a8] sm:$0xff] }
  0x67   :  { %443 = vmatmul.mubr.f32.gmra.mxu1 %v95_v9  ;;  %v127_v9 = vld [vmem:[%s2317_s0 + $0x390] sm:$0xff] }
  0x68   :  { %447 = vmatprep.mubr.f32.mxu1 %v98_v10  ;;  %v130_v10 = vld [vmem:[%s2317_s0 + $0x3a8] sm:$0xff] }
  0x69   :  { %288 = vmatmul.mubr.f32.gmra.mxu0 %v33_v11  ;;  %v65_v11 = vld [vmem:[%s2317_s0 + $0x1a0] sm:$0xff] }
  0x6a   :  { %292 = vmatprep.mubr.f32.mxu0 %v36_v12  ;;  %v68_v12 = vld [vmem:[%s2317_s0 + $0x1b8] sm:$0xff] }
  0x6b   :  { %448 = vmatmul.mubr.f32.gmra.mxu1 %v97_v13  ;;  %v129_v13 = vld [vmem:[%s2317_s0 + $0x3a0] sm:$0xff] }
  0x6c   :  { %452 = vmatprep.mubr.f32.mxu1 %v100_v14  ;;  %v132_v14 = vld [vmem:[%s2317_s0 + $0x3b8] sm:$0xff] }
  0x6d   :  { %293 = vmatmul.mubr.f32.gmra.mxu0 %v35_v15  ;;  %v67_v15 = vld [vmem:[%s2317_s0 + $0x1b0] sm:$0xff] }
  0x6e   :  { %297 = vmatprep.mubr.f32.mxu0 %v38_v16  ;;  %v70_v16 = vld [vmem:[%s2317_s0 + $0x1c8] sm:$0xff] }
  0x6f   :  { %453 = vmatmul.mubr.f32.gmra.mxu1 %v99_v17  ;;  %v131_v17 = vld [vmem:[%s2317_s0 + $0x3b0] sm:$0xff] }
  0x70   :  { %457 = vmatprep.mubr.f32.mxu1 %v102_v18  ;;  %v134_v18 = vld [vmem:[%s2317_s0 + $0x3c8] sm:$0xff] }
  0x71   :  { %298 = vmatmul.mubr.f32.gmra.mxu0 %v37_v19  ;;  %v69_v19 = vld [vmem:[%s2317_s0 + $0x1c0] sm:$0xff] }
  0x72   :  { %302 = vmatprep.mubr.f32.mxu0 %v40_v20  ;;  %v72_v20 = vld [vmem:[%s2317_s0 + $0x1d8] sm:$0xff] }
  0x73   :  { %458 = vmatmul.mubr.f32.gmra.mxu1 %v101_v21  ;;  %v133_v21 = vld [vmem:[%s2317_s0 + $0x3c0] sm:$0xff] }
  0x74   :  { %462 = vmatprep.mubr.f32.mxu1 %v104_v22  ;;  %v136_v22 = vld [vmem:[%s2317_s0 + $0x3d8] sm:$0xff] }
  0x75   :  { %303 = vmatmul.mubr.f32.gmra.mxu0 %v39_v23  ;;  %v71_v23 = vld [vmem:[%s2317_s0 + $0x1d0] sm:$0xff] }
  0x76   :  { %307 = vmatprep.mubr.f32.mxu0 %v42_v24  ;;  %v74_v24 = vld [vmem:[%s2317_s0 + $0x1e8] sm:$0xff] }
  0x77   :  { %463 = vmatmul.mubr.f32.gmra.mxu1 %v103_v25  ;;  %v135_v25 = vld [vmem:[%s2317_s0 + $0x3d0] sm:$0xff] }
  0x78   :  { %467 = vmatprep.mubr.f32.mxu1 %v106_v26  ;;  %v138_v26 = vld [vmem:[%s2317_s0 + $0x3e8] sm:$0xff] }
  0x79   :  { %308 = vmatmul.mubr.f32.gmra.mxu0 %v41_v27  ;;  %v73_v27 = vld [vmem:[%s2317_s0 + $0x1e0] sm:$0xff] }
  0x7a   :  { %312 = vmatprep.mubr.f32.mxu0 %v44_v28  ;;  %v76_v28 = vld [vmem:[%s2317_s0 + $0x1f8] sm:$0xff] }
  0x7b   :  { %468 = vmatmul.mubr.f32.gmra.mxu1 %v105_v29  ;;  %v137_v29 = vld [vmem:[%s2317_s0 + $0x3e0] sm:$0xff] }
  0x7c   :  { %472 = vmatprep.mubr.f32.mxu1 %v108_v30  ;;  %v140_v30 = vld [vmem:[%s2317_s0 + $0x3f8] sm:$0xff] }
  0x7d   :  { %313 = vmatmul.mubr.f32.gmra.mxu0 %v43_v31  ;;  %v75_v31 = vld [vmem:[%s2317_s0 + $0x1f0] sm:$0xff] }
  0x7e   :  { %317 = vmatprep.mubr.f32.mxu0 %v46_v32  ;;  %v139_v32 = vld [vmem:[%s2317_s0 + $0x3f0] sm:$0xff] }
  0x7f   :  { %473 = vmatmul.mubr.f32.gmra.mxu1 %v107_v33 }
  0x80   :  { %477 = vmatprep.mubr.f32.mxu1 %v110_v34 }
  0x81   :  { %318 = vmatmul.mubr.f32.gmra.mxu0 %v45_v35 }
  0x82   :  { %322 = vmatprep.mubr.f32.mxu0 %v48_v36 }
  0x83   :  { %478 = vmatmul.mubr.f32.gmra.mxu1 %v109_v37 }
  0x84   :  { %482 = vmatprep.mubr.f32.mxu1 %v112_v38 }
  0x85   :  { %323 = vmatmul.mubr.f32.gmra.mxu0 %v47_v39 }
  0x86   :  { %327 = vmatprep.mubr.f32.mxu0 %v50_v40 }
  0x87   :  { %483 = vmatmul.mubr.f32.gmra.mxu1 %v111_v41 }
  0x88   :  { %487 = vmatprep.mubr.f32.mxu1 %v114_v42 }
  0x89   :  { %328 = vmatmul.mubr.f32.gmra.mxu0 %v49_v43 }
  0x8a   :  { %332 = vmatprep.mubr.f32.mxu0 %v52_v44 }
  0x8b   :  { %488 = vmatmul.mubr.f32.gmra.mxu1 %v113_v45 }
  0x8c   :  { %492 = vmatprep.mubr.f32.mxu1 %v116_v46 }
  0x8d   :  { %333 = vmatmul.mubr.f32.gmra.mxu0 %v51_v47 }
  0x8e   :  { %337 = vmatprep.mubr.f32.mxu0 %v54_v48 }
  0x8f   :  { %493 = vmatmul.mubr.f32.gmra.mxu1 %v115_v49 }
  0x90   :  { %497 = vmatprep.mubr.f32.mxu1 %v118_v50 }
  0x91   :  { %338 = vmatmul.mubr.f32.gmra.mxu0 %v53_v51 }
  0x92   :  { %342 = vmatprep.mubr.f32.mxu0 %v56_v52 }
  0x93   :  { %498 = vmatmul.mubr.f32.gmra.mxu1 %v117_v53 }
  0x94   :  { %502 = vmatprep.mubr.f32.mxu1 %v120_v54 }
  0x95   :  { %343 = vmatmul.mubr.f32.gmra.mxu0 %v55_v55 }
  0x96   :  { %347 = vmatprep.mubr.f32.mxu0 %v58_v56 }
  0x97   :  { %503 = vmatmul.mubr.f32.gmra.mxu1 %v119_v57 }
  0x98   :  { %507 = vmatprep.mubr.f32.mxu1 %v122_v58 }
  0x99   :  { %348 = vmatmul.mubr.f32.gmra.mxu0 %v57_v59 }
  0x9a   :  { %352 = vmatprep.mubr.f32.mxu0 %v60_v60 }
  0x9b   :  { %508 = vmatmul.mubr.f32.gmra.mxu1 %v121_v61 }
  0x9c   :  { %512 = vmatprep.mubr.f32.mxu1 %v124_v62 }
  0x9d   :  { %353 = vmatmul.mubr.f32.gmra.mxu0 %v59_v63 }
  0x9e   :  { %357 = vmatprep.mubr.f32.mxu0 %v62_v0 }
  0x9f   :  { %513 = vmatmul.mubr.f32.gmra.mxu1 %v123_v1 }
  0xa0   :  { %517 = vmatprep.mubr.f32.mxu1 %v126_v2 }
  0xa1   :  { %358 = vmatmul.mubr.f32.gmra.mxu0 %v61_v3 }
  0xa2   :  { %362 = vmatprep.mubr.f32.mxu0 %v64_v4 }
  0xa3   :  { %518 = vmatmul.mubr.f32.gmra.mxu1 %v125_v5 }
  0xa4   :  { %522 = vmatprep.mubr.f32.mxu1 %v128_v6 }
  0xa5   :  { %363 = vmatmul.mubr.f32.gmra.mxu0 %v63_v7 }
  0xa6   :  { %367 = vmatprep.mubr.f32.mxu0 %v66_v8 }
  0xa7   :  { %523 = vmatmul.mubr.f32.gmra.mxu1 %v127_v9 }
  0xa8   :  { %527 = vmatprep.mubr.f32.mxu1 %v130_v10 }
  0xa9   :  { %368 = vmatmul.mubr.f32.gmra.mxu0 %v65_v11 }
  0xaa   :  { %372 = vmatprep.mubr.f32.mxu0 %v68_v12 }
  0xab   :  { %528 = vmatmul.mubr.f32.gmra.mxu1 %v129_v13 }
  0xac   :  { %532 = vmatprep.mubr.f32.mxu1 %v132_v14 }
  0xad   :  { %373 = vmatmul.mubr.f32.gmra.mxu0 %v67_v15 }
  0xae   :  { %377 = vmatprep.mubr.f32.mxu0 %v70_v16 }
  0xaf   :  { %533 = vmatmul.mubr.f32.gmra.mxu1 %v131_v17 }
  0xb0   :  { %537 = vmatprep.mubr.f32.mxu1 %v134_v18 }
  0xb1   :  { %378 = vmatmul.mubr.f32.gmra.mxu0 %v69_v19 }
  0xb2   :  { %382 = vmatprep.mubr.f32.mxu0 %v72_v20 }
  0xb3   :  { %538 = vmatmul.mubr.f32.gmra.mxu1 %v133_v21 }
  0xb4   :  { %542 = vmatprep.mubr.f32.mxu1 %v136_v22 }
  0xb5   :  { %383 = vmatmul.mubr.f32.gmra.mxu0 %v71_v23 }
  0xb6   :  { %387 = vmatprep.mubr.f32.mxu0 %v74_v24 }
  0xb7   :  { %543 = vmatmul.mubr.f32.gmra.mxu1 %v135_v25 }
  0xb8   :  { %547 = vmatprep.mubr.f32.mxu1 %v138_v26 }
  0xb9   :  { %388 = vmatmul.mubr.f32.gmra.mxu0 %v73_v27 }
  0xba   :  { %392 = vmatprep.mubr.f32.mxu0 %v76_v28 }
  0xbb   :  { %548 = vmatmul.mubr.f32.gmra.mxu1 %v137_v29 }
  0xbc   :  { %552 = vmatprep.mubr.f32.mxu1 %v140_v30 }
  0xbd   :  { %393 = vmatmul.mubr.f32.gmra.mxu0 %v75_v31 }
  0xbf   :  { %553 = vmatmul.mubr.f32.gmra.mxu1 %v139_v32 }
 0x101   :  { %v1598_v33 = vpop.f32.mrf.mxu0 }
 0x102   :  { %559 = vst.msk [vmem:[%s2318_s2] sm:$0xff] %vm558_vm0, %v1598_v33 }
 0x103   :  { %v241_v34 = vpop.f32.mrf.mxu0  ;;  %v1605_v35 = vpop.f32.mrf.mxu1 }
 0x104   :  { %591 = vst.msk [vmem:[%s2318_s2 + $0x100] sm:$0xff] %vm558_vm0, %v1605_v35  ;;  %v756_v34 = vmul.f32 %v1598_v33, %v1598_v33 }
 0x105   :  { %v1612_v36 = vpop.f32.mrf.mxu0  ;;  %v401_v37 = vpop.f32.mrf.mxu1 }
 0x106   :  { %560 = vst.msk [vmem:[%s2318_s2 + $0x8] sm:$0xff] %vm558_vm0, %v1612_v36  ;;  %v757_v30 = vmul.f32 %v1612_v36, %v1612_v36  ;;  %v624_v37 = vsel %vm558_vm0, %v1612_v36, 0.0 }
 0x107   :  { %v246_v38 = vpop.f32.mrf.mxu0  ;;  %v1619_v39 = vpop.f32.mrf.mxu1 }
 0x108   :  { %592 = vst.msk [vmem:[%s2318_s2 + $0x108] sm:$0xff] %vm558_vm0, %v1619_v39 }
 0x109   :  { %v1626_v40 = vpop.f32.mrf.mxu0  ;;  %v406_v41 = vpop.f32.mrf.mxu1 }
 0x10a   :  { %561 = vst.msk [vmem:[%s2318_s2 + $0x10] sm:$0xff] %vm558_vm0, %v1626_v40  ;;  %v758_v38 = vmul.f32 %v1626_v40, %v1626_v40  ;;  %v626_v36 = vsel %vm558_vm0, %v1626_v40, 0.0 }
 0x10b   :  { %v251_v42 = vpop.f32.mrf.mxu0  ;;  %v1633_v43 = vpop.f32.mrf.mxu1 }
 0x10c   :  { %593 = vst.msk [vmem:[%s2318_s2 + $0x110] sm:$0xff] %vm558_vm0, %v1633_v43 }
 0x10d   :  { %v1640_v44 = vpop.f32.mrf.mxu0  ;;  %v411_v45 = vpop.f32.mrf.mxu1 }
 0x10e   :  { %562 = vst.msk [vmem:[%s2318_s2 + $0x18] sm:$0xff] %vm558_vm0, %v1640_v44  ;;  %v623_v45 = vsel %vm558_vm0, %v1598_v33, 0.0  ;;  %v820_v33 = vsel %vm558_vm0, %v756_v34, 0.0  ;;  %v628_v40 = vsel %vm558_vm0, %v1640_v44, 0.0 }
 0x10f   :  { %v256_v46 = vpop.f32.mrf.mxu0  ;;  %v1647_v47 = vpop.f32.mrf.mxu1 }
 0x110   :  { %594 = vst.msk [vmem:[%s2318_s2 + $0x118] sm:$0xff] %vm558_vm0, %v1647_v47  ;;  %v821_v46 = vsel %vm558_vm0, %v757_v30, 0.0 }
 0x111   :  { %v1654_v48 = vpop.f32.mrf.mxu0  ;;  %v416_v49 = vpop.f32.mrf.mxu1 }
 0x112   :  { %563 = vst.msk [vmem:[%s2318_s2 + $0x20] sm:$0xff] %vm558_vm0, %v1654_v48  ;;  %v759_v49 = vmul.f32 %v1640_v44, %v1640_v44 }
 0x113   :  { %v261_v50 = vpop.f32.mrf.mxu0  ;;  %v1661_v51 = vpop.f32.mrf.mxu1 }
 0x114   :  { %595 = vst.msk [vmem:[%s2318_s2 + $0x120] sm:$0xff] %vm558_vm0, %v1661_v51  ;;  %v625_v50 = vadd.f32 %v624_v37, %v623_v45 }
 0x115   :  { %v1668_v52 = vpop.f32.mrf.mxu0  ;;  %v421_v53 = vpop.f32.mrf.mxu1 }
 0x116   :  { %564 = vst.msk [vmem:[%s2318_s2 + $0x28] sm:$0xff] %vm558_vm0, %v1668_v52  ;;  %v761_v44 = vmul.f32 %v1668_v52, %v1668_v52 }
 0x117   :  { %v266_v54 = vpop.f32.mrf.mxu0  ;;  %v1675_v55 = vpop.f32.mrf.mxu1 }
 0x118   :  { %596 = vst.msk [vmem:[%s2318_s2 + $0x128] sm:$0xff] %vm558_vm0, %v1675_v55 }
 0x119   :  { %v1682_v56 = vpop.f32.mrf.mxu0  ;;  %v426_v57 = vpop.f32.mrf.mxu1 }
 0x11a   :  { %565 = vst.msk [vmem:[%s2318_s2 + $0x30] sm:$0xff] %vm558_vm0, %v1682_v56  ;;  %v823_v57 = vsel %vm558_vm0, %v758_v38, 0.0  ;;  %v634_v30 = vsel %vm558_vm0, %v1682_v56, 0.0 }
 0x11b   :  { %v271_v58 = vpop.f32.mrf.mxu0  ;;  %v1689_v59 = vpop.f32.mrf.mxu1 }
 0x11c   :  { %597 = vst.msk [vmem:[%s2318_s2 + $0x130] sm:$0xff] %vm558_vm0, %v1689_v59  ;;  %v760_v58 = vmul.f32 %v1654_v48, %v1654_v48 }
 0x11d   :  { %v1696_v60 = vpop.f32.mrf.mxu0  ;;  %v431_v61 = vpop.f32.mrf.mxu1 }
 0x11e   :  { %566 = vst.msk [vmem:[%s2318_s2 + $0x38] sm:$0xff] %vm558_vm0, %v1696_v60  ;;  %v822_v61 = vadd.f32 %v821_v46, %v820_v33  ;;  %v636_v45 = vsel %vm558_vm0, %v1696_v60, 0.0 }
 0x11f   :  { %v276_v62 = vpop.f32.mrf.mxu0  ;;  %v1703_v63 = vpop.f32.mrf.mxu1 }
 0x120   :  { %598 = vst.msk [vmem:[%s2318_s2 + $0x138] sm:$0xff] %vm558_vm0, %v1703_v63  ;;  %v627_v62 = vadd.f32 %v626_v36, %v625_v50 }
 0x121   :  { %v1710_v0 = vpop.f32.mrf.mxu0  ;;  %v436_v1 = vpop.f32.mrf.mxu1 }
 0x122   :  { %567 = vst.msk [vmem:[%s2318_s2 + $0x40] sm:$0xff] %vm558_vm0, %v1710_v0  ;;  %v638_v33 = vsel %vm558_vm0, %v1710_v0, 0.0 }
 0x123   :  { %v281_v2 = vpop.f32.mrf.mxu0  ;;  %v1717_v3 = vpop.f32.mrf.mxu1 }
 0x124   :  { %599 = vst.msk [vmem:[%s2318_s2 + $0x140] sm:$0xff] %vm558_vm0, %v1717_v3 }
 0x125   :  { %v1724_v4 = vpop.f32.mrf.mxu0  ;;  %v441_v5 = vpop.f32.mrf.mxu1 }
 0x126   :  { %568 = vst.msk [vmem:[%s2318_s2 + $0x48] sm:$0xff] %vm558_vm0, %v1724_v4  ;;  %v825_v5 = vsel %vm558_vm0, %v759_v49, 0.0 }
 0x127   :  { %v286_v6 = vpop.f32.mrf.mxu0  ;;  %v1731_v7 = vpop.f32.mrf.mxu1 }
 0x128   :  { %600 = vst.msk [vmem:[%s2318_s2 + $0x148] sm:$0xff] %vm558_vm0, %v1731_v7  ;;  %v630_v6 = vsel %vm558_vm0, %v1654_v48, 0.0  ;;  %v762_v48 = vmul.f32 %v1682_v56, %v1682_v56  ;;  %v764_v56 = vmul.f32 %v1710_v0, %v1710_v0 }
 0x129   :  { %v1738_v8 = vpop.f32.mrf.mxu0  ;;  %v446_v9 = vpop.f32.mrf.mxu1 }
 0x12a   :  { %569 = vst.msk [vmem:[%s2318_s2 + $0x50] sm:$0xff] %vm558_vm0, %v1738_v8  ;;  %v824_v9 = vadd.f32 %v823_v57, %v822_v61  ;;  %v766_v0 = vmul.f32 %v1738_v8, %v1738_v8 }
 0x12b   :  { %v291_v10 = vpop.f32.mrf.mxu0  ;;  %v1745_v11 = vpop.f32.mrf.mxu1 }
 0x12c   :  { %601 = vst.msk [vmem:[%s2318_s2 + $0x150] sm:$0xff] %vm558_vm0, %v1745_v11  ;;  %v629_v10 = vadd.f32 %v628_v40, %v627_v62  ;;  %v835_v62 = vsel %vm558_vm0, %v764_v56, 0.0 }
 0x12d   :  { %v1752_v12 = vpop.f32.mrf.mxu0  ;;  %v451_v13 = vpop.f32.mrf.mxu1 }
 0x12e   :  { %570 = vst.msk [vmem:[%s2318_s2 + $0x58] sm:$0xff] %vm558_vm0, %v1752_v12 }
 0x12f   :  { %v296_v14 = vpop.f32.mrf.mxu0  ;;  %v1759_v15 = vpop.f32.mrf.mxu1 }
 0x130   :  { %602 = vst.msk [vmem:[%s2318_s2 + $0x158] sm:$0xff] %vm558_vm0, %v1759_v15 }
 0x131   :  { %v1766_v16 = vpop.f32.mrf.mxu0  ;;  %v456_v17 = vpop.f32.mrf.mxu1 }
 0x132   :  { %571 = vst.msk [vmem:[%s2318_s2 + $0x60] sm:$0xff] %vm558_vm0, %v1766_v16  ;;  %v827_v17 = vsel %vm558_vm0, %v760_v58, 0.0 }
 0x133   :  { %v301_v18 = vpop.f32.mrf.mxu0  ;;  %v1773_v19 = vpop.f32.mrf.mxu1 }
 0x134   :  { %603 = vst.msk [vmem:[%s2318_s2 + $0x160] sm:$0xff] %vm558_vm0, %v1773_v19  ;;  %v632_v18 = vsel %vm558_vm0, %v1668_v52, 0.0  ;;  %v763_v52 = vmul.f32 %v1696_v60, %v1696_v60  ;;  %v765_v60 = vmul.f32 %v1724_v4, %v1724_v4 }
 0x135   :  { %v1780_v20 = vpop.f32.mrf.mxu0  ;;  %v461_v21 = vpop.f32.mrf.mxu1 }
 0x136   :  { %572 = vst.msk [vmem:[%s2318_s2 + $0x68] sm:$0xff] %vm558_vm0, %v1780_v20  ;;  %v826_v21 = vadd.f32 %v825_v5, %v824_v9 }
 0x137   :  { %v306_v22 = vpop.f32.mrf.mxu0  ;;  %v1787_v23 = vpop.f32.mrf.mxu1 }
 0x138   :  { %604 = vst.msk [vmem:[%s2318_s2 + $0x168] sm:$0xff] %vm558_vm0, %v1787_v23  ;;  %v631_v22 = vadd.f32 %v630_v6, %v629_v10  ;;  %v837_v10 = vsel %vm558_vm0, %v765_v60, 0.0 }
 0x139   :  { %v1794_v24 = vpop.f32.mrf.mxu0  ;;  %v466_v25 = vpop.f32.mrf.mxu1 }
 0x13a   :  { %573 = vst.msk [vmem:[%s2318_s2 + $0x70] sm:$0xff] %vm558_vm0, %v1794_v24  ;;  %v633_v34 = vadd.f32 %v632_v18, %v631_v22  ;;  %v839_v22 = vsel %vm558_vm0, %v766_v0, 0.0 }
 0x13b   :  { %v311_v26 = vpop.f32.mrf.mxu0  ;;  %v1801_v27 = vpop.f32.mrf.mxu1 }
 0x13c   :  { %605 = vst.msk [vmem:[%s2318_s2 + $0x170] sm:$0xff] %vm558_vm0, %v1801_v27  ;;  %v635_v36 = vadd.f32 %v634_v30, %v633_v34 }
 0x13d   :  { %v1808_v28 = vpop.f32.mrf.mxu0  ;;  %v471_v29 = vpop.f32.mrf.mxu1 }
 0x13e   :  { %574 = vst.msk [vmem:[%s2318_s2 + $0x78] sm:$0xff] %vm558_vm0, %v1808_v28  ;;  %v829_v29 = vsel %vm558_vm0, %v761_v44, 0.0  ;;  %v637_v40 = vadd.f32 %v636_v45, %v635_v36 }
 0x13f   :  { %v316_v31 = vpop.f32.mrf.mxu0  ;;  %v1817_v32 = vpop.f32.mrf.mxu1 }
 0x140   :  { %606 = vst.msk [vmem:[%s2318_s2 + $0x178] sm:$0xff] %vm558_vm0, %v1817_v32  ;;  %v828_v31 = vadd.f32 %v827_v17, %v826_v21  ;;  %v639_v6 = vadd.f32 %v638_v33, %v637_v40 }
 0x141   :  { %v1830_v41 = vpop.f32.mrf.mxu0  ;;  %v476_v42 = vpop.f32.mrf.mxu1 }
 0x142   :  { %575 = vst.msk [vmem:[%s2318_s2 + $0x80] sm:$0xff] %vm558_vm0, %v1830_v41  ;;  %v831_v42 = vsel %vm558_vm0, %v762_v48, 0.0  ;;  %v830_v46 = vadd.f32 %v829_v29, %v828_v31 }
 0x143   :  { %v321_v53 = vpop.f32.mrf.mxu0  ;;  %v1844_v54 = vpop.f32.mrf.mxu1 }
 0x144   :  { %607 = vst.msk [vmem:[%s2318_s2 + $0x180] sm:$0xff] %vm558_vm0, %v1844_v54  ;;  %v833_v53 = vsel %vm558_vm0, %v763_v52, 0.0  ;;  %v832_v57 = vadd.f32 %v831_v42, %v830_v46 }
 0x145   :  { %v1857_v1 = vpop.f32.mrf.mxu0  ;;  %v481_v2 = vpop.f32.mrf.mxu1 }
 0x146   :  { %576 = vst.msk [vmem:[%s2318_s2 + $0x88] sm:$0xff] %vm558_vm0, %v1857_v1  ;;  %v640_v2 = vsel %vm558_vm0, %v1724_v4, 0.0  ;;  %v834_v5 = vadd.f32 %v833_v53, %v832_v57  ;;  %v767_v4 = vmul.f32 %v1752_v12, %v1752_v12 }
 0x147   :  { %v326_v13 = vpop.f32.mrf.mxu0  ;;  %v1869_v14 = vpop.f32.mrf.mxu1  ;;  %v641_v18 = vadd.f32 %v640_v2, %v639_v6 }
 0x148   :  { %608 = vst.msk [vmem:[%s2318_s2 + $0x188] sm:$0xff] %vm558_vm0, %v1869_v14  ;;  %v642_v13 = vsel %vm558_vm0, %v1738_v8, 0.0  ;;  %v836_v17 = vadd.f32 %v835_v62, %v834_v5  ;;  %v768_v8 = vmul.f32 %v1766_v16, %v1766_v16  ;;  %v841_v34 = vsel %vm558_vm0, %v767_v4, 0.0 }
 0x149   :  { %v1881_v25 = vpop.f32.mrf.mxu0  ;;  %v486_v26 = vpop.f32.mrf.mxu1  ;;  %v643_v30 = vadd.f32 %v642_v13, %v641_v18 }
 0x14a   :  { %577 = vst.msk [vmem:[%s2318_s2 + $0x90] sm:$0xff] %vm558_vm0, %v1881_v25  ;;  %v644_v26 = vsel %vm558_vm0, %v1752_v12, 0.0  ;;  %v838_v29 = vadd.f32 %v837_v10, %v836_v17  ;;  %v769_v12 = vmul.f32 %v1780_v20, %v1780_v20  ;;  %v843_v36 = vsel %vm558_vm0, %v768_v8, 0.0 }
 0x14b   :  { %v331_v37 = vpop.f32.mrf.mxu0  ;;  %v1893_v38 = vpop.f32.mrf.mxu1  ;;  %v645_v45 = vadd.f32 %v644_v26, %v643_v30 }
 0x14c   :  { %609 = vst.msk [vmem:[%s2318_s2 + $0x190] sm:$0xff] %vm558_vm0, %v1893_v38  ;;  %v646_v37 = vsel %vm558_vm0, %v1766_v16, 0.0  ;;  %v840_v42 = vadd.f32 %v839_v22, %v838_v29  ;;  %v770_v16 = vmul.f32 %v1794_v24, %v1794_v24  ;;  %v845_v40 = vsel %vm558_vm0, %v769_v12, 0.0 }
 0x14d   :  { %v1905_v49 = vpop.f32.mrf.mxu0  ;;  %v491_v50 = vpop.f32.mrf.mxu1  ;;  %v647_v33 = vadd.f32 %v646_v37, %v645_v45 }
 0x14e   :  { %578 = vst.msk [vmem:[%s2318_s2 + $0x98] sm:$0xff] %vm558_vm0, %v1905_v49  ;;  %v648_v50 = vsel %vm558_vm0, %v1780_v20, 0.0  ;;  %v842_v53 = vadd.f32 %v841_v34, %v840_v42  ;;  %v771_v20 = vmul.f32 %v1808_v28, %v1808_v28  ;;  %v847_v6 = vsel %vm558_vm0, %v770_v16, 0.0 }
 0x14f   :  { %v336_v58 = vpop.f32.mrf.mxu0  ;;  %v1917_v61 = vpop.f32.mrf.mxu1  ;;  %v649_v2 = vadd.f32 %v648_v50, %v647_v33 }
 0x150   :  { %610 = vst.msk [vmem:[%s2318_s2 + $0x198] sm:$0xff] %vm558_vm0, %v1917_v61  ;;  %v650_v58 = vsel %vm558_vm0, %v1794_v24, 0.0  ;;  %v844_v62 = vadd.f32 %v843_v36, %v842_v53  ;;  %v772_v24 = vmul.f32 %v1830_v41, %v1830_v41  ;;  %v849_v18 = vsel %vm558_vm0, %v771_v20, 0.0 }
 0x151   :  { %v1929_v44 = vpop.f32.mrf.mxu0  ;;  %v496_v9 = vpop.f32.mrf.mxu1  ;;  %v651_v13 = vadd.f32 %v650_v58, %v649_v2 }
 0x152   :  { %579 = vst.msk [vmem:[%s2318_s2 + $0xa0] sm:$0xff] %vm558_vm0, %v1929_v44  ;;  %v652_v9 = vsel %vm558_vm0, %v1808_v28, 0.0  ;;  %v846_v10 = vadd.f32 %v845_v40, %v844_v62  ;;  %v773_v28 = vmul.f32 %v1857_v1, %v1857_v1  ;;  %v851_v30 = vsel %vm558_vm0, %v772_v24, 0.0 }
 0x153   :  { %v341_v48 = vpop.f32.mrf.mxu0  ;;  %v1941_v21 = vpop.f32.mrf.mxu1  ;;  %v653_v26 = vadd.f32 %v652_v9, %v651_v13 }
 0x154   :  { %611 = vst.msk [vmem:[%s2318_s2 + $0x1a0] sm:$0xff] %vm558_vm0, %v1941_v21  ;;  %v654_v48 = vsel %vm558_vm0, %v1830_v41, 0.0  ;;  %v848_v22 = vadd.f32 %v847_v6, %v846_v10  ;;  %v774_v41 = vmul.f32 %v1881_v25, %v1881_v25  ;;  %v853_v45 = vsel %vm558_vm0, %v773_v28, 0.0 }
 0x155   :  { %v1953_v52 = vpop.f32.mrf.mxu0  ;;  %v501_v31 = vpop.f32.mrf.mxu1  ;;  %v655_v37 = vadd.f32 %v654_v48, %v653_v26 }
 0x156   :  { %580 = vst.msk [vmem:[%s2318_s2 + $0xa8] sm:$0xff] %vm558_vm0, %v1953_v52  ;;  %v656_v31 = vsel %vm558_vm0, %v1857_v1, 0.0  ;;  %v850_v34 = vadd.f32 %v849_v18, %v848_v22  ;;  %v775_v1 = vmul.f32 %v1905_v49, %v1905_v49  ;;  %v855_v33 = vsel %vm558_vm0, %v774_v41, 0.0 }
 0x157   :  { %v346_v56 = vpop.f32.mrf.mxu0  ;;  %v1965_v46 = vpop.f32.mrf.mxu1  ;;  %v657_v50 = vadd.f32 %v656_v31, %v655_v37 }
 0x158   :  { %612 = vst.msk [vmem:[%s2318_s2 + $0x1a8] sm:$0xff] %vm558_vm0, %v1965_v46  ;;  %v658_v56 = vsel %vm558_vm0, %v1881_v25, 0.0  ;;  %v852_v36 = vadd.f32 %v851_v30, %v850_v34  ;;  %v776_v25 = vmul.f32 %v1929_v44, %v1929_v44  ;;  %v857_v2 = vsel %vm558_vm0, %v775_v1, 0.0 }
 0x159   :  { %v1977_v60 = vpop.f32.mrf.mxu0  ;;  %v506_v57 = vpop.f32.mrf.mxu1  ;;  %v659_v58 = vadd.f32 %v658_v56, %v657_v50 }
 0x15a   :  { %581 = vst.msk [vmem:[%s2318_s2 + $0xb0] sm:$0xff] %vm558_vm0, %v1977_v60  ;;  %v660_v57 = vsel %vm558_vm0, %v1905_v49, 0.0  ;;  %v854_v40 = vadd.f32 %v853_v45, %v852_v36  ;;  %v777_v49 = vmul.f32 %v1953_v52, %v1953_v52  ;;  %v859_v13 = vsel %vm558_vm0, %v776_v25, 0.0 }
 0x15b   :  { %v351_v0 = vpop.f32.mrf.mxu0  ;;  %v1989_v5 = vpop.f32.mrf.mxu1  ;;  %v661_v9 = vadd.f32 %v660_v57, %v659_v58 }
 0x15c   :  { %613 = vst.msk [vmem:[%s2318_s2 + $0x1b0] sm:$0xff] %vm558_vm0, %v1989_v5  ;;  %v662_v0 = vsel %vm558_vm0, %v1929_v44, 0.0  ;;  %v856_v6 = vadd.f32 %v855_v33, %v854_v40  ;;  %v778_v44 = vmul.f32 %v1977_v60, %v1977_v60  ;;  %v861_v26 = vsel %vm558_vm0, %v777_v49, 0.0 }
 0x15d   :  { %v354_v4 = vpop.f32.mrf.mxu0  ;;  %v511_v17 = vpop.f32.mrf.mxu1  ;;  %v663_v48 = vadd.f32 %v662_v0, %v661_v9 }
 0x15e   :  { %582 = vst.msk [vmem:[%s2318_s2 + $0xb8] sm:$0xff] %vm558_vm0, %v354_v4  ;;  %v664_v17 = vsel %vm558_vm0, %v1953_v52, 0.0  ;;  %v858_v18 = vadd.f32 %v857_v2, %v856_v6  ;;  %v779_v30 = vmul.f32 %v354_v4, %v354_v4  ;;  %v863_v37 = vsel %vm558_vm0, %v778_v44, 0.0 }
 0x15f   :  { %v356_v8 = vpop.f32.mrf.mxu0  ;;  %v2010_v29 = vpop.f32.mrf.mxu1  ;;  %v665_v31 = vadd.f32 %v664_v17, %v663_v48 }
 0x160   :  { %614 = vst.msk [vmem:[%s2318_s2 + $0x1b8] sm:$0xff] %vm558_vm0, %v2010_v29  ;;  %v666_v8 = vsel %vm558_vm0, %v1977_v60, 0.0  ;;  %v860_v52 = vadd.f32 %v859_v13, %v858_v18  ;;  %v865_v50 = vsel %vm558_vm0, %v779_v30, 0.0 }
 0x161   :  { %v359_v12 = vpop.f32.mrf.mxu0  ;;  %v516_v42 = vpop.f32.mrf.mxu1  ;;  %v667_v56 = vadd.f32 %v666_v8, %v665_v31 }
 0x162   :  { %583 = vst.msk [vmem:[%s2318_s2 + $0xc0] sm:$0xff] %vm558_vm0, %v359_v12  ;;  %v668_v42 = vsel %vm558_vm0, %v354_v4, 0.0  ;;  %v780_v45 = vmul.f32 %v359_v12, %v359_v12  ;;  %v862_v60 = vadd.f32 %v861_v26, %v860_v52 }
 0x163   :  { %v361_v16 = vpop.f32.mrf.mxu0  ;;  %v2031_v53 = vpop.f32.mrf.mxu1  ;;  %v669_v57 = vadd.f32 %v668_v42, %v667_v56 }
 0x164   :  { %615 = vst.msk [vmem:[%s2318_s2 + $0x1c0] sm:$0xff] %vm558_vm0, %v2031_v53  ;;  %v670_v16 = vsel %vm558_vm0, %v359_v12, 0.0  ;;  %v864_v4 = vadd.f32 %v863_v37, %v862_v60  ;;  %v867_v58 = vsel %vm558_vm0, %v780_v45, 0.0 }
 0x165   :  { %v364_v20 = vpop.f32.mrf.mxu0  ;;  %v521_v62 = vpop.f32.mrf.mxu1  ;;  %v671_v0 = vadd.f32 %v670_v16, %v669_v57 }
 0x166   :  { %584 = vst.msk [vmem:[%s2318_s2 + $0xc8] sm:$0xff] %vm558_vm0, %v364_v20  ;;  %v781_v33 = vmul.f32 %v364_v20, %v364_v20  ;;  %v672_v62 = vsel %vm558_vm0, %v364_v20, 0.0  ;;  %v866_v12 = vadd.f32 %v865_v50, %v864_v4 }
 0x167   :  { %v366_v24 = vpop.f32.mrf.mxu0  ;;  %v2052_v10 = vpop.f32.mrf.mxu1  ;;  %v673_v17 = vadd.f32 %v672_v62, %v671_v0 }
 0x168   :  { %616 = vst.msk [vmem:[%s2318_s2 + $0x1c8] sm:$0xff] %vm558_vm0, %v2052_v10  ;;  %v869_v9 = vsel %vm558_vm0, %v781_v33, 0.0  ;;  %v868_v20 = vadd.f32 %v867_v58, %v866_v12 }
 0x169   :  { %v369_v28 = vpop.f32.mrf.mxu0  ;;  %v526_v22 = vpop.f32.mrf.mxu1 }
 0x16a   :  { %585 = vst.msk [vmem:[%s2318_s2 + $0xd0] sm:$0xff] %vm558_vm0, %v369_v28  ;;  %v782_v2 = vmul.f32 %v369_v28, %v369_v28  ;;  %v674_v24 = vsel %vm558_vm0, %v369_v28, 0.0  ;;  %v870_v28 = vadd.f32 %v869_v9, %v868_v20  ;;  %v788_v20 = vmul.f32 %v1605_v35, %v1605_v35 }
 0x16b   :  { %v371_v41 = vpop.f32.mrf.mxu0  ;;  %v2071_v34 = vpop.f32.mrf.mxu1  ;;  %v675_v8 = vadd.f32 %v674_v24, %v673_v17 }
 0x16c   :  { %617 = vst.msk [vmem:[%s2318_s2 + $0x1d0] sm:$0xff] %vm558_vm0, %v2071_v34  ;;  %v871_v48 = vsel %vm558_vm0, %v782_v2, 0.0 }
 0x16d   :  { %v374_v1 = vpop.f32.mrf.mxu0  ;;  %v531_v36 = vpop.f32.mrf.mxu1  ;;  %v872_v42 = vadd.f32 %v871_v48, %v870_v28 }
 0x16e   :  { %586 = vst.msk [vmem:[%s2318_s2 + $0xd8] sm:$0xff] %vm558_vm0, %v374_v1  ;;  %v783_v13 = vmul.f32 %v374_v1, %v374_v1  ;;  %v676_v22 = vsel %vm558_vm0, %v374_v1, 0.0 }
 0x16f   :  { %v376_v25 = vpop.f32.mrf.mxu0  ;;  %v2086_v40 = vpop.f32.mrf.mxu1  ;;  %v677_v45 = vadd.f32 %v676_v22, %v675_v8  ;;  %v686_v8 = vsel %vm558_vm0, %v1605_v35, 0.0  ;;  %v790_v35 = vmul.f32 %v1633_v43, %v1633_v43 }
 0x170   :  { %618 = vst.msk [vmem:[%s2318_s2 + $0x1d8] sm:$0xff] %vm558_vm0, %v2086_v40  ;;  %v873_v31 = vsel %vm558_vm0, %v783_v13, 0.0 }
 0x171   :  { %v379_v49 = vpop.f32.mrf.mxu0  ;;  %v536_v6 = vpop.f32.mrf.mxu1  ;;  %v874_v50 = vadd.f32 %v873_v31, %v872_v42  ;;  %v883_v42 = vsel %vm558_vm0, %v788_v20, 0.0 }
 0x172   :  { %587 = vst.msk [vmem:[%s2318_s2 + $0xe0] sm:$0xff] %vm558_vm0, %v379_v49  ;;  %v784_v26 = vmul.f32 %v379_v49, %v379_v49  ;;  %v678_v41 = vsel %vm558_vm0, %v379_v49, 0.0 }
 0x173   :  { %v381_v44 = vpop.f32.mrf.mxu0  ;;  %v2101_v18 = vpop.f32.mrf.mxu1  ;;  %v679_v16 = vadd.f32 %v678_v41, %v677_v45  ;;  %v688_v45 = vsel %vm558_vm0, %v1619_v39, 0.0 }
 0x174   :  { %619 = vst.msk [vmem:[%s2318_s2 + $0x1e0] sm:$0xff] %vm558_vm0, %v2101_v18  ;;  %v875_v1 = vsel %vm558_vm0, %v784_v26, 0.0 }
 0x175   :  { %v384_v30 = vpop.f32.mrf.mxu0  ;;  %v541_v52 = vpop.f32.mrf.mxu1  ;;  %v876_v62 = vadd.f32 %v875_v1, %v874_v50  ;;  %v690_v50 = vsel %vm558_vm0, %v1633_v43, 0.0  ;;  %v694_v43 = vsel %vm558_vm0, %v1661_v51, 0.0 }
 0x176   :  { %588 = vst.msk [vmem:[%s2318_s2 + $0xe8] sm:$0xff] %vm558_vm0, %v384_v30  ;;  %v785_v37 = vmul.f32 %v384_v30, %v384_v30  ;;  %v680_v36 = vsel %vm558_vm0, %v384_v30, 0.0  ;;  %v789_v30 = vmul.f32 %v1619_v39, %v1619_v39  ;;  %v692_v39 = vsel %vm558_vm0, %v1647_v47, 0.0 }
 0x177   :  { %v386_v60 = vpop.f32.mrf.mxu0  ;;  %v2116_v56 = vpop.f32.mrf.mxu1  ;;  %v681_v2 = vadd.f32 %v680_v36, %v679_v16  ;;  %v791_v16 = vmul.f32 %v1647_v47, %v1647_v47  ;;  %v696_v47 = vsel %vm558_vm0, %v1675_v55, 0.0 }
 0x178   :  { %620 = vst.msk [vmem:[%s2318_s2 + $0x1e8] sm:$0xff] %vm558_vm0, %v2116_v56  ;;  %v877_v57 = vsel %vm558_vm0, %v785_v37, 0.0  ;;  %v885_v36 = vsel %vm558_vm0, %v789_v30, 0.0 }
 0x179   :  { %v389_v33 = vpop.f32.mrf.mxu0  ;;  %v546_v4 = vpop.f32.mrf.mxu1  ;;  %v878_v6 = vadd.f32 %v877_v57, %v876_v62  ;;  %v887_v57 = vsel %vm558_vm0, %v790_v35, 0.0  ;;  %v798_v35 = vmul.f32 %v1745_v11, %v1745_v11 }
 0x17a   :  { %589 = vst.msk [vmem:[%s2318_s2 + $0xf0] sm:$0xff] %vm558_vm0, %v389_v33  ;;  %v682_v25 = vsel %vm558_vm0, %v389_v33, 0.0  ;;  %v786_v58 = vmul.f32 %v389_v33, %v389_v33 }
 0x17b   :  { %v391_v12 = vpop.f32.mrf.mxu0  ;;  %v2131_v0 = vpop.f32.mrf.mxu1  ;;  %v683_v9 = vadd.f32 %v682_v25, %v681_v2  ;;  %v792_v25 = vmul.f32 %v1661_v51, %v1661_v51  ;;  %v889_v2 = vsel %vm558_vm0, %v791_v16, 0.0  ;;  %v698_v51 = vsel %vm558_vm0, %v1689_v59, 0.0 }
 0x17c   :  { %v879_v49 = vsel %vm558_vm0, %v786_v58, 0.0  ;;  %621 = vst.msk [vmem:[%s2318_s2 + $0x1f0] sm:$0xff] %vm558_vm0, %v2131_v0  ;;  %v793_v12 = vmul.f32 %v1675_v55, %v1675_v55  ;;  %v700_v55 = vsel %vm558_vm0, %v1703_v63, 0.0 }
 0x17d   :  { %v394_v24 = vpop.f32.mrf.mxu0  ;;  %v551_v13 = vpop.f32.mrf.mxu1  ;;  %v880_v48 = vadd.f32 %v879_v49, %v878_v6 }
 0x17e   :  { %590 = vst.msk [vmem:[%s2318_s2 + $0xf8] sm:$0xff] %vm558_vm0, %v394_v24  ;;  %v684_v17 = vsel %vm558_vm0, %v394_v24, 0.0  ;;  %v787_v44 = vmul.f32 %v394_v24, %v394_v24  ;;  %v794_v24 = vmul.f32 %v1689_v59, %v1689_v59  ;;  %v702_v59 = vsel %vm558_vm0, %v1717_v3, 0.0 }
 0x17f   :  { %v685_v22 = vadd.f32 %v684_v17, %v683_v9  ;;  %v396_v26 = vpop.f32.mrf.mxu0  ;;  %v2146_v28 = vpop.f32.mrf.mxu1  ;;  %v891_v9 = vsel %vm558_vm0, %v792_v25, 0.0  ;;  %v893_v17 = vsel %vm558_vm0, %v793_v12, 0.0 }
 0x180   :  { %v881_v52 = vsel %vm558_vm0, %v787_v44, 0.0  ;;  %622 = vst.msk [vmem:[%s2318_s2 + $0x1f8] sm:$0xff] %vm558_vm0, %v2146_v28  ;;  %v795_v44 = vmul.f32 %v1703_v63, %v1703_v63  ;;  %v895_v26 = vsel %vm558_vm0, %v794_v24, 0.0  ;;  %v704_v63 = vsel %vm558_vm0, %v1731_v7, 0.0 }
 0x181   :  { %v687_v31 = vadd.f32 %v686_v8, %v685_v22  ;;  %v882_v41 = vadd.f32 %v881_v52, %v880_v48  ;;  %v556_v37 = vpop.f32.mrf.mxu1  ;;  %v796_v8 = vmul.f32 %v1717_v3, %v1717_v3  ;;  %v706_v3 = vsel %vm558_vm0, %v1745_v11, 0.0 }
 0x182   :  { %v710_v11 = vsel %vm558_vm0, %v1773_v19, 0.0  ;;  %v803_v24 = vmul.f32 %v1817_v32, %v1817_v32 }
 0x183   :  { %v689_v60 = vadd.f32 %v688_v45, %v687_v31  ;;  %v884_v1 = vadd.f32 %v883_v42, %v882_v41  ;;  %v897_v31 = vsel %vm558_vm0, %v795_v44, 0.0  ;;  %v797_v41 = vmul.f32 %v1731_v7, %v1731_v7 }
 0x184   :  { %v899_v45 = vsel %vm558_vm0, %v796_v8, 0.0  ;;  %v708_v7 = vsel %vm558_vm0, %v1759_v15, 0.0 }
 0x185   :  { %v691_v33 = vadd.f32 %v690_v50, %v689_v60  ;;  %v886_v4 = vadd.f32 %v885_v36, %v884_v1  ;;  %v901_v36 = vsel %vm558_vm0, %v797_v41, 0.0  ;;  %v799_v50 = vmul.f32 %v1759_v15, %v1759_v15 }
 0x186   :  { %v712_v15 = vsel %vm558_vm0, %v1787_v23, 0.0 }
 0x187   :  { %v693_v58 = vadd.f32 %v692_v39, %v691_v33  ;;  %v888_v62 = vadd.f32 %v887_v57, %v886_v4  ;;  %v903_v4 = vsel %vm558_vm0, %v798_v35, 0.0  ;;  %v800_v57 = vmul.f32 %v1773_v19, %v1773_v19 }
 0x188   :  { %v714_v19 = vsel %vm558_vm0, %v1801_v27, 0.0  ;;  %v808_v35 = vmul.f32 %v1941_v21, %v1941_v21 }
 0x189   :  { %v695_v49 = vadd.f32 %v694_v43, %v693_v58  ;;  %v890_v6 = vadd.f32 %v889_v2, %v888_v62  ;;  %v905_v58 = vsel %vm558_vm0, %v799_v50, 0.0  ;;  %v801_v62 = vmul.f32 %v1787_v23, %v1787_v23 }
 0x18a   :  { %v907_v12 = vsel %vm558_vm0, %v800_v57, 0.0  ;;  %v716_v23 = vsel %vm558_vm0, %v1817_v32, 0.0  ;;  %v720_v32 = vsel %vm558_vm0, %v1869_v14, 0.0 }
 0x18b   :  { %v697_v13 = vadd.f32 %v696_v47, %v695_v49  ;;  %v892_v20 = vadd.f32 %v891_v9, %v890_v6  ;;  %v802_v49 = vmul.f32 %v1801_v27, %v1801_v27  ;;  %v909_v47 = vsel %vm558_vm0, %v801_v62, 0.0 }
 0x18c   :  { %v718_v27 = vsel %vm558_vm0, %v1844_v54, 0.0 }
 0x18d   :  { %v699_v48 = vadd.f32 %v698_v51, %v697_v13  ;;  %v894_v22 = vadd.f32 %v893_v17, %v892_v20  ;;  %v911_v17 = vsel %vm558_vm0, %v802_v49, 0.0  ;;  %v804_v51 = vmul.f32 %v1844_v54, %v1844_v54 }
 0x18e   :  { %v722_v54 = vsel %vm558_vm0, %v1893_v38, 0.0  ;;  %v813_v49 = vmul.f32 %v2052_v10, %v2052_v10 }
 0x18f   :  { %v701_v30 = vadd.f32 %v700_v55, %v699_v48  ;;  %v896_v52 = vadd.f32 %v895_v26, %v894_v22  ;;  %v913_v22 = vsel %vm558_vm0, %v803_v24, 0.0  ;;  %v805_v26 = vmul.f32 %v1869_v14, %v1869_v14 }
 0x190   :  { %v724_v14 = vsel %vm558_vm0, %v1917_v61, 0.0 }
 0x191   :  { %v898_v37 = vadd.f32 %v897_v31, %v896_v52  ;;  %v703_v42 = vadd.f32 %v702_v59, %v701_v30  ;;  %v915_v30 = vsel %vm558_vm0, %v804_v51, 0.0  ;;  %v806_v52 = vmul.f32 %v1893_v38, %v1893_v38 }
 0x192   :  { %v917_v41 = vsel %vm558_vm0, %v805_v26, 0.0  ;;  %v726_v38 = vsel %vm558_vm0, %v1941_v21, 0.0  ;;  %v730_v21 = vsel %vm558_vm0, %v1989_v5, 0.0 }
 0x193   :  { %v705_v60 = vadd.f32 %v704_v63, %v703_v42  ;;  %v900_v1 = vadd.f32 %v899_v45, %v898_v37  ;;  %v807_v37 = vmul.f32 %v1917_v61, %v1917_v61  ;;  %v919_v63 = vsel %vm558_vm0, %v806_v52, 0.0 }
 0x194   :  { %v728_v61 = vsel %vm558_vm0, %v1965_v46, 0.0  ;;  %v818_v52 = vmul.f32 %v2131_v0, %v2131_v0 }
 0x195   :  { %v707_v16 = vadd.f32 %v706_v3, %v705_v60  ;;  %v902_v33 = vadd.f32 %v901_v36, %v900_v1  ;;  %v921_v36 = vsel %vm558_vm0, %v807_v37, 0.0  ;;  %v809_v3 = vmul.f32 %v1965_v46, %v1965_v46 }
 0x196   :  { %v732_v46 = vsel %vm558_vm0, %v2010_v29, 0.0  ;;  %v748_v37 = vsel %vm558_vm0, %v2146_v28, 0.0 }
 0x197   :  { %v709_v39 = vadd.f32 %v708_v7, %v707_v16  ;;  %v904_v25 = vadd.f32 %v903_v4, %v902_v33  ;;  %v923_v33 = vsel %vm558_vm0, %v808_v35, 0.0  ;;  %v810_v4 = vmul.f32 %v1989_v5, %v1989_v5 }
 0x198   :  { %v734_v5 = vsel %vm558_vm0, %v2031_v53, 0.0 }
 0x199   :  { %v711_v2 = vadd.f32 %v710_v11, %v709_v39  ;;  %v906_v43 = vadd.f32 %v905_v58, %v904_v25  ;;  %v925_v39 = vsel %vm558_vm0, %v809_v3, 0.0  ;;  %v811_v25 = vmul.f32 %v2010_v29, %v2010_v29 }
 0x19a   :  { %v927_v62 = vsel %vm558_vm0, %v810_v4, 0.0  ;;  %v736_v29 = vsel %vm558_vm0, %v2052_v10, 0.0  ;;  %v740_v10 = vsel %vm558_vm0, %v2086_v40, 0.0  ;;  %v953_v3 = vlaneseq }
 0x19b   :  { %v713_v6 = vadd.f32 %v712_v15, %v711_v2  ;;  %v908_v9 = vadd.f32 %v907_v12, %v906_v43  ;;  %v812_v2 = vmul.f32 %v2031_v53, %v2031_v53  ;;  %v929_v15 = vsel %vm558_vm0, %v811_v25, 0.0 }
 0x19c   :  { %v738_v53 = vsel %vm558_vm0, %v2071_v34, 0.0 }
 0x19d   :  { %v715_v13 = vadd.f32 %v714_v19, %v713_v6  ;;  %v910_v20 = vadd.f32 %v909_v47, %v908_v9  ;;  %v931_v47 = vsel %vm558_vm0, %v812_v2, 0.0  ;;  %v814_v19 = vmul.f32 %v2071_v34, %v2071_v34 }
 0x19e   :  { %v742_v34 = vsel %vm558_vm0, %v2101_v18, 0.0 }
 0x19f   :  { %v717_v44 = vadd.f32 %v716_v23, %v715_v13  ;;  %v912_v48 = vadd.f32 %v911_v17, %v910_v20  ;;  %v933_v20 = vsel %vm558_vm0, %v813_v49, 0.0  ;;  %v815_v17 = vmul.f32 %v2086_v40, %v2086_v40 }
 0x1a0   :  { %v744_v40 = vsel %vm558_vm0, %v2116_v56, 0.0 }
 0x1a1   :  { %v719_v55 = vadd.f32 %v718_v27, %v717_v44  ;;  %v914_v8 = vadd.f32 %v913_v22, %v912_v48  ;;  %v935_v44 = vsel %vm558_vm0, %v814_v19, 0.0  ;;  %v816_v48 = vmul.f32 %v2101_v18, %v2101_v18 }
 0x1a2   :  { %v937_v26 = vsel %vm558_vm0, %v815_v17, 0.0 }
 0x1a3   :  { %v916_v31 = vadd.f32 %v915_v30, %v914_v8  ;;  %v721_v59 = vadd.f32 %v720_v32, %v719_v55  ;;  %v817_v55 = vmul.f32 %v2116_v56, %v2116_v56  ;;  %v939_v32 = vsel %vm558_vm0, %v816_v48, 0.0 }
 0x1a4   :  { %v943_v56 = vsel %vm558_vm0, %v818_v52, 0.0 }
 0x1a5   :  { %v918_v42 = vadd.f32 %v917_v41, %v916_v31  ;;  %v723_v45 = vadd.f32 %v722_v54, %v721_v59  ;;  %v819_v31 = vmul.f32 %v2146_v28, %v2146_v28  ;;  %v941_v18 = vsel %vm558_vm0, %v817_v55, 0.0 }
 0x1a6   :  { %v746_v54 = vsel %vm558_vm0, %v2131_v0, 0.0 }
 0x1a7   :  { %v920_v60 = vadd.f32 %v919_v63, %v918_v42  ;;  %v725_v1 = vadd.f32 %v724_v14, %v723_v45  ;;  %v945_v63 = vsel %vm558_vm0, %v819_v31, 0.0 }
 0x1a9   :  { %v922_v50 = vadd.f32 %v921_v36, %v920_v60  ;;  %v727_v16 = vadd.f32 %v726_v38, %v725_v1 }
 0x1ab   :  { %v924_v7 = vadd.f32 %v923_v33, %v922_v50  ;;  %v729_v57 = vadd.f32 %v728_v61, %v727_v16  ;;  %v954_v61 = vshrl.u32 %v953_v3, 7 }
 0x1ad   :  { %v926_v58 = vadd.f32 %v925_v39, %v924_v7  ;;  %v731_v11 = vadd.f32 %v730_v21, %v729_v57  ;;  %vm956_vm1 = vcmp.eq.s32.totalorder %v954_v61, 1  ;;  %vm955_vm2 = vcmp.eq.s32.totalorder %v954_v61, 0 }
 0x1af   :  { %v928_v43 = vadd.f32 %v927_v62, %v926_v58  ;;  %v733_v12 = vadd.f32 %v732_v46, %v731_v11 }
 0x1b1   :  { %v930_v6 = vadd.f32 %v929_v15, %v928_v43  ;;  %v735_v9 = vadd.f32 %v734_v5, %v733_v12 }
 0x1b3   :  { %v932_v24 = vadd.f32 %v931_v47, %v930_v6  ;;  %v737_v13 = vadd.f32 %v736_v29, %v735_v9 }
 0x1b5   :  { %v934_v23 = vadd.f32 %v933_v20, %v932_v24  ;;  %v739_v51 = vadd.f32 %v738_v53, %v737_v13 }
 0x1b7   :  { %v936_v22 = vadd.f32 %v935_v44, %v934_v23  ;;  %v741_v27 = vadd.f32 %v740_v10, %v739_v51 }
 0x1b9   :  { %v938_v8 = vadd.f32 %v937_v26, %v936_v22  ;;  %v743_v30 = vadd.f32 %v742_v34, %v741_v27 }
 0x1bb   :  { %v940_v59 = vadd.f32 %v939_v32, %v938_v8  ;;  %v745_v41 = vadd.f32 %v744_v40, %v743_v30 }
 0x1bd   :  { %v942_v42 = vadd.f32 %v941_v18, %v940_v59  ;;  %v747_v45 = vadd.f32 %v746_v54, %v745_v41 }
 0x1bf   :  { %v944_v14 = vadd.f32 %v943_v56, %v942_v42  ;;  %v749_v35 = vadd.f32 %v748_v37, %v747_v45 }
 0x1c1   :  { %v750_v60 = vrot.slane %v749_v35, 4  ;;  %v946_v1 = vadd.f32 %v945_v63, %v944_v14 }
 0x1c3   :  { %v751_v36 = vadd.f32 %v750_v60, %v749_v35  ;;  %v947_v38 = vrot.slane %v946_v1, 4 }
 0x1c5   :  { %v752_v50 = vrot.slane %v751_v36, 2  ;;  %v948_v16 = vadd.f32 %v947_v38, %v946_v1 }
 0x1c7   :  { %v753_v33 = vadd.f32 %v752_v50, %v751_v36  ;;  %v949_v0 = vrot.slane %v948_v16, 2 }
 0x1c9   :  { %v950_v4 = vadd.f32 %v949_v0, %v948_v16  ;;  %v754_v28 = vrot.slane %v753_v33, 1 }
 0x1cb   :  { %v951_v7 = vrot.slane %v950_v4, 1  ;;  %v755_v39 = vadd.f32 %v754_v28, %v753_v33 }
 0x1cd   :  { %v952_v57 = vadd.f32 %v951_v7, %v950_v4 }
 0x1cf   :  { %v957_v21 = vsel %vm956_vm1, %v952_v57, 0.0 }
 0x1d0   :  { %v958_v25 = vsel %vm955_vm2, %v755_v39, %v957_v21 }
 0x1d1   :  { %959 = vst.msk [vmem:[%s2319_s3] sm:$0xff] %vm558_vm0, %v958_v25 }

// kernel: generator_forward.17
= control target key start
LH: loop header
LB: loop body
LE: loop exit
PB: predicated region body
PF: predicated region fallthrough
CT: control target
= control target key end

     0   :  { %s2007_s9 = smov 0   ;;  %s2469_s0 = inlined_call_operand.vmem [shape: f32[2048,128], index: 0, kind: input, shape index: {}]   ;;  %s2470_s1 = inlined_call_operand.vmem [shape: f32[128,12], index: 1, kind: input, shape index: {}]   ;;  %s2471_s2 = inlined_call_operand.vmem [shape: f32[2048,12], index: 2, kind: output, shape index: {}]  }
   0x1 LB: > { %s1309_s10 = sadd.s32 4294967295, %s1990_s9   ;;  %p1313_p0 = scmp.ge.s32.totalorder %s1990_s9, 1  ;;  %s1990_s9 = sphi %s2007_s9, %s12_s9  }
   0x2   : > { %p113_p1 = scmp.lt.s32.totalorder %s1990_s9, 3 }
   0x4   : > { %p114_p2 = pnand %p1313_p0, %p113_p1 }
   0x5   : > { %s1314_s27 = sshll.u32 (!%p114_p2), %s1309_s10, 7 }
   0x6   : > { %117 = sbr.rel (%p114_p2) target bundleno = 380 (0x17c), region = 28  ;;  %p136_p3 = scmp.lt.s32.totalorder (!%p114_p2), %s1314_s27, 255 }
   0xb   : > { %v290_v0 = vld [vmem:[%s2470_s1 + $0x78] sm:$0xff]  ;;  %v289_v1 = vld [vmem:[%s2470_s1 + $0x70] sm:$0xff]  ;;  %v288_v2 = vld [vmem:[%s2470_s1 + $0x68] sm:$0xff]  ;;  %s2473_s27 = smov (!%p136_p3, %s1314_s27), 255  ;;  %vm1124_vm0 = vcmask 97280  }
   0xc   : > { %1464 = vmatprep.subr.mxu0 %v290_v0  ;;  %1688 = vmatprep.subr.mxu1 %v290_v0  ;;  %v287_v3 = vld [vmem:[%s2470_s1 + $0x60] sm:$0xff]  ;;  %v286_v4 = vld [vmem:[%s2470_s1 + $0x58] sm:$0xff]  ;;  %v285_v5 = vld [vmem:[%s2470_s1 + $0x50] sm:$0xff]  ;;  %s1315_s13 = sshll.u32 %s2473_s27, 3 }
   0xd   : > { %1465 = vmatpush3.msra.mxu0 %v290_v0  ;;  %1704 = vmatpush3.msra.mxu1 %v290_v0  ;;  %v284_v6 = vld [vmem:[%s2470_s1 + $0x48] sm:$0xff]  ;;  %v283_v7 = vld [vmem:[%s2470_s1 + $0x40] sm:$0xff]  ;;  %v282_v8 = vld [vmem:[%s2470_s1 + $0x38] sm:$0xff]  ;;  %s2070_s18 = scalar_lea.vmem %s2469_s0, %s1315_s13  ;;  %s2208_s23 = scalar_lea.vmem %s2471_s2, %s1315_s13 }
   0xe   : > { %1466 = vmatprep.subr.mxu0 %v289_v1  ;;  %1689 = vmatprep.subr.mxu1 %v289_v1  ;;  %v281_v9 = vld [vmem:[%s2470_s1 + $0x30] sm:$0xff]  ;;  %v280_v10 = vld [vmem:[%s2470_s1 + $0x28] sm:$0xff]  ;;  %v279_v11 = vld [vmem:[%s2470_s1 + $0x20] sm:$0xff] }
   0xf   : > { %1467 = vmatpush3.msra.mxu0 %v289_v1  ;;  %1705 = vmatpush3.msra.mxu1 %v289_v1  ;;  %v278_v12 = vld [vmem:[%s2470_s1 + $0x18] sm:$0xff]  ;;  %v277_v13 = vld [vmem:[%s2470_s1 + $0x10] sm:$0xff]  ;;  %v276_v14 = vld [vmem:[%s2470_s1 + $0x8] sm:$0xff] }
  0x10   : > { %1468 = vmatprep.subr.mxu0 %v288_v2  ;;  %1690 = vmatprep.subr.mxu1 %v288_v2  ;;  %v275_v15 = vld [vmem:[%s2470_s1] sm:$0xff]  ;;  %v148_v18 = vld [vmem:[%s2070_s18 + $0x8] sm:$0xff]  ;;  %v149_v20 = vld [vmem:[%s2070_s18 + $0x10] sm:$0xff] }
  0x11   : > { %1469 = vmatpush3.msra.mxu0 %v288_v2  ;;  %1706 = vmatpush3.msra.mxu1 %v288_v2  ;;  %v147_v16 = vld [vmem:[%s2070_s18] sm:$0xff]  ;;  %v212_v19 = vld [vmem:[%s2070_s18 + $0x208] sm:$0xff]  ;;  %v213_v21 = vld [vmem:[%s2070_s18 + $0x210] sm:$0xff] }
  0x12   : > { %1470 = vmatprep.subr.mxu0 %v287_v3  ;;  %1691 = vmatprep.subr.mxu1 %v287_v3  ;;  %v211_v17 = vld [vmem:[%s2070_s18 + $0x200] sm:$0xff]  ;;  %v150_v22 = vld [vmem:[%s2070_s18 + $0x18] sm:$0xff]  ;;  %v152_v26 = vld [vmem:[%s2070_s18 + $0x28] sm:$0xff] }
  0x13   : > { %1471 = vmatpush3.msra.mxu0 %v287_v3  ;;  %1707 = vmatpush3.msra.mxu1 %v287_v3  ;;  %v214_v23 = vld [vmem:[%s2070_s18 + $0x218] sm:$0xff]  ;;  %v151_v24 = vld [vmem:[%s2070_s18 + $0x20] sm:$0xff]  ;;  %v216_v27 = vld [vmem:[%s2070_s18 + $0x228] sm:$0xff] }
  0x14   : > { %1472 = vmatprep.subr.mxu0 %v286_v4  ;;  %1692 = vmatprep.subr.mxu1 %v286_v4  ;;  %v215_v25 = vld [vmem:[%s2070_s18 + $0x220] sm:$0xff]  ;;  %v153_v28 = vld [vmem:[%s2070_s18 + $0x30] sm:$0xff]  ;;  %v154_v30 = vld [vmem:[%s2070_s18 + $0x38] sm:$0xff] }
  0x15   : > { %1473 = vmatpush3.msra.mxu0 %v286_v4  ;;  %1708 = vmatpush3.msra.mxu1 %v286_v4  ;;  %v217_v29 = vld [vmem:[%s2070_s18 + $0x230] sm:$0xff]  ;;  %v218_v31 = vld [vmem:[%s2070_s18 + $0x238] sm:$0xff]  ;;  %v155_v32 = vld [vmem:[%s2070_s18 + $0x40] sm:$0xff] }
  0x16   : > { %1474 = vmatprep.subr.mxu0 %v285_v5  ;;  %1693 = vmatprep.subr.mxu1 %v285_v5  ;;  %v219_v33 = vld [vmem:[%s2070_s18 + $0x240] sm:$0xff]  ;;  %v156_v34 = vld [vmem:[%s2070_s18 + $0x48] sm:$0xff]  ;;  %v157_v36 = vld [vmem:[%s2070_s18 + $0x50] sm:$0xff] }
  0x17   : > { %1475 = vmatpush3.msra.mxu0 %v285_v5  ;;  %1709 = vmatpush3.msra.mxu1 %v285_v5  ;;  %v220_v35 = vld [vmem:[%s2070_s18 + $0x248] sm:$0xff]  ;;  %v221_v37 = vld [vmem:[%s2070_s18 + $0x250] sm:$0xff]  ;;  %v158_v38 = vld [vmem:[%s2070_s18 + $0x58] sm:$0xff] }
  0x18   : > { %1476 = vmatprep.subr.mxu0 %v284_v6  ;;  %1694 = vmatprep.subr.mxu1 %v284_v6  ;;  %v222_v39 = vld [vmem:[%s2070_s18 + $0x258] sm:$0xff]  ;;  %v159_v40 = vld [vmem:[%s2070_s18 + $0x60] sm:$0xff]  ;;  %v160_v42 = vld [vmem:[%s2070_s18 + $0x68] sm:$0xff] }
  0x19   : > { %1477 = vmatpush3.msra.mxu0 %v284_v6  ;;  %1710 = vmatpush3.msra.mxu1 %v284_v6  ;;  %v223_v41 = vld [vmem:[%s2070_s18 + $0x260] sm:$0xff]  ;;  %v224_v43 = vld [vmem:[%s2070_s18 + $0x268] sm:$0xff]  ;;  %v161_v44 = vld [vmem:[%s2070_s18 + $0x70] sm:$0xff] }
  0x1a   : > { %1478 = vmatprep.subr.mxu0 %v283_v7  ;;  %1695 = vmatprep.subr.mxu1 %v283_v7  ;;  %v225_v45 = vld [vmem:[%s2070_s18 + $0x270] sm:$0xff]  ;;  %v162_v46 = vld [vmem:[%s2070_s18 + $0x78] sm:$0xff]  ;;  %v163_v48 = vld [vmem:[%s2070_s18 + $0x80] sm:$0xff] }
  0x1b   : > { %1479 = vmatpush3.msra.mxu0 %v283_v7  ;;  %1711 = vmatpush3.msra.mxu1 %v283_v7  ;;  %v226_v47 = vld [vmem:[%s2070_s18 + $0x278] sm:$0xff]  ;;  %v227_v49 = vld [vmem:[%s2070_s18 + $0x280] sm:$0xff]  ;;  %v164_v50 = vld [vmem:[%s2070_s18 + $0x88] sm:$0xff] }
  0x1c   : > { %1480 = vmatprep.subr.mxu0 %v282_v8  ;;  %1696 = vmatprep.subr.mxu1 %v282_v8  ;;  %v228_v51 = vld [vmem:[%s2070_s18 + $0x288] sm:$0xff]  ;;  %v165_v52 = vld [vmem:[%s2070_s18 + $0x90] sm:$0xff]  ;;  %v166_v54 = vld [vmem:[%s2070_s18 + $0x98] sm:$0xff] }
  0x1d   : > { %1481 = vmatpush3.msra.mxu0 %v282_v8  ;;  %1712 = vmatpush3.msra.mxu1 %v282_v8  ;;  %v229_v53 = vld [vmem:[%s2070_s18 + $0x290] sm:$0xff]  ;;  %v230_v55 = vld [vmem:[%s2070_s18 + $0x298] sm:$0xff]  ;;  %v167_v56 = vld [vmem:[%s2070_s18 + $0xa0] sm:$0xff] }
  0x1e   : > { %1482 = vmatprep.subr.mxu0 %v281_v9  ;;  %1697 = vmatprep.subr.mxu1 %v281_v9  ;;  %v231_v57 = vld [vmem:[%s2070_s18 + $0x2a0] sm:$0xff]  ;;  %v168_v58 = vld [vmem:[%s2070_s18 + $0xa8] sm:$0xff]  ;;  %v169_v60 = vld [vmem:[%s2070_s18 + $0xb0] sm:$0xff] }
  0x1f   : > { %1483 = vmatpush3.msra.mxu0 %v281_v9  ;;  %1713 = vmatpush3.msra.mxu1 %v281_v9  ;;  %v232_v59 = vld [vmem:[%s2070_s18 + $0x2a8] sm:$0xff]  ;;  %v233_v61 = vld [vmem:[%s2070_s18 + $0x2b0] sm:$0xff]  ;;  %v170_v62 = vld [vmem:[%s2070_s18 + $0xb8] sm:$0xff] }
  0x20   : > { %1484 = vmatprep.subr.mxu0 %v280_v10  ;;  %1698 = vmatprep.subr.mxu1 %v280_v10  ;;  %v234_v63 = vld [vmem:[%s2070_s18 + $0x2b8] sm:$0xff]  ;;  %v171_v0 = vld [vmem:[%s2070_s18 + $0xc0] sm:$0xff]  ;;  %v172_v2 = vld [vmem:[%s2070_s18 + $0xc8] sm:$0xff] }
  0x21   : > { %1485 = vmatpush3.msra.mxu0 %v280_v10  ;;  %1714 = vmatpush3.msra.mxu1 %v280_v10  ;;  %v235_v1 = vld [vmem:[%s2070_s18 + $0x2c0] sm:$0xff]  ;;  %v236_v3 = vld [vmem:[%s2070_s18 + $0x2c8] sm:$0xff]  ;;  %v173_v4 = vld [vmem:[%s2070_s18 + $0xd0] sm:$0xff] }
  0x22   : > { %1486 = vmatprep.subr.mxu0 %v279_v11  ;;  %1699 = vmatprep.subr.mxu1 %v279_v11  ;;  %v237_v5 = vld [vmem:[%s2070_s18 + $0x2d0] sm:$0xff]  ;;  %v174_v6 = vld [vmem:[%s2070_s18 + $0xd8] sm:$0xff]  ;;  %v175_v8 = vld [vmem:[%s2070_s18 + $0xe0] sm:$0xff] }
  0x23   : > { %1487 = vmatpush3.msra.mxu0 %v279_v11  ;;  %1715 = vmatpush3.msra.mxu1 %v279_v11  ;;  %v238_v7 = vld [vmem:[%s2070_s18 + $0x2d8] sm:$0xff]  ;;  %v239_v9 = vld [vmem:[%s2070_s18 + $0x2e0] sm:$0xff]  ;;  %v176_v10 = vld [vmem:[%s2070_s18 + $0xe8] sm:$0xff] }
  0x24   : > { %1488 = vmatprep.subr.mxu0 %v278_v12  ;;  %1700 = vmatprep.subr.mxu1 %v278_v12  ;;  %v240_v11 = vld [vmem:[%s2070_s18 + $0x2e8] sm:$0xff] }
  0x25   : > { %1489 = vmatpush3.msra.mxu0 %v278_v12  ;;  %1716 = vmatpush3.msra.mxu1 %v278_v12  ;;  %v177_v12 = vld [vmem:[%s2070_s18 + $0xf0] sm:$0xff] }
  0x26   : > { %1490 = vmatprep.subr.mxu0 %v277_v13  ;;  %1701 = vmatprep.subr.mxu1 %v277_v13 }
  0x27   : > { %1491 = vmatpush3.msra.mxu0 %v277_v13  ;;  %1717 = vmatpush3.msra.mxu1 %v277_v13  ;;  %v241_v13 = vld [vmem:[%s2070_s18 + $0x2f0] sm:$0xff] }
  0x28   : > { %1492 = vmatprep.subr.mxu0 %v276_v14  ;;  %1702 = vmatprep.subr.mxu1 %v276_v14 }
  0x29   : > { %1493 = vmatpush3.msra.mxu0 %v276_v14  ;;  %1718 = vmatpush3.msra.mxu1 %v276_v14  ;;  %v178_v14 = vld [vmem:[%s2070_s18 + $0xf8] sm:$0xff] }
  0x2a   : > { %1494 = vmatprep.subr.mxu0 %v275_v15  ;;  %1703 = vmatprep.subr.mxu1 %v275_v15 }
  0x2b   : > { %1495 = vmatpush3.msra.mxu0 %v275_v15  ;;  %1719 = vmatpush3.msra.mxu1 %v275_v15  ;;  %v242_v15 = vld [vmem:[%s2070_s18 + $0x2f8] sm:$0xff] }
  0x2c   : > { %1496 = vmatprep.mubr.f32.mxu0 %v147_v16  ;;  %1592 = vmatprep.mubr.f32.mxu1 %v211_v17  ;;  %v179_v16 = vld [vmem:[%s2070_s18 + $0x100] sm:$0xff] }
  0x2d   : > { %1497 = vmatmul.mubr.f32.vlgmr.msra.gmra.mxu0 %v148_v18  ;;  %1593 = vmatmul.mubr.f32.vlgmr.msra.gmra.mxu1 %v212_v19  ;;  %v243_v17 = vld [vmem:[%s2070_s18 + $0x300] sm:$0xff]  ;;  %v180_v18 = vld [vmem:[%s2070_s18 + $0x108] sm:$0xff] }
  0x2e   : > { %1499 = vmatprep.mubr.f32.mxu0 %v149_v20  ;;  %1595 = vmatprep.mubr.f32.mxu1 %v213_v21  ;;  %v244_v19 = vld [vmem:[%s2070_s18 + $0x308] sm:$0xff]  ;;  %v181_v20 = vld [vmem:[%s2070_s18 + $0x110] sm:$0xff] }
  0x2f   : > { %v245_v21 = vld [vmem:[%s2070_s18 + $0x310] sm:$0xff] }
  0x31   : > { %1500 = vmatmul.mubr.f32.gmra.mxu0 %v150_v22  ;;  %1596 = vmatmul.mubr.f32.gmra.mxu1 %v214_v23  ;;  %v182_v22 = vld [vmem:[%s2070_s18 + $0x118] sm:$0xff] }
  0x32   : > { %1502 = vmatprep.mubr.f32.mxu0 %v151_v24  ;;  %1598 = vmatprep.mubr.f32.mxu1 %v215_v25  ;;  %v246_v23 = vld [vmem:[%s2070_s18 + $0x318] sm:$0xff]  ;;  %v183_v24 = vld [vmem:[%s2070_s18 + $0x120] sm:$0xff] }
  0x33   : > { %v247_v25 = vld [vmem:[%s2070_s18 + $0x320] sm:$0xff] }
  0x35   : > { %1503 = vmatmul.mubr.f32.gmra.mxu0 %v152_v26  ;;  %1599 = vmatmul.mubr.f32.gmra.mxu1 %v216_v27  ;;  %v184_v26 = vld [vmem:[%s2070_s18 + $0x128] sm:$0xff] }
  0x36   : > { %1505 = vmatprep.mubr.f32.mxu0 %v153_v28  ;;  %1601 = vmatprep.mubr.f32.mxu1 %v217_v29  ;;  %v248_v27 = vld [vmem:[%s2070_s18 + $0x328] sm:$0xff]  ;;  %v185_v28 = vld [vmem:[%s2070_s18 + $0x130] sm:$0xff] }
  0x37   : > { %v249_v29 = vld [vmem:[%s2070_s18 + $0x330] sm:$0xff] }
  0x39   : > { %1506 = vmatmul.mubr.f32.gmra.mxu0 %v154_v30  ;;  %1602 = vmatmul.mubr.f32.gmra.mxu1 %v218_v31  ;;  %v186_v30 = vld [vmem:[%s2070_s18 + $0x138] sm:$0xff] }
  0x3a   : > { %1508 = vmatprep.mubr.f32.mxu0 %v155_v32  ;;  %1604 = vmatprep.mubr.f32.mxu1 %v219_v33  ;;  %v250_v31 = vld [vmem:[%s2070_s18 + $0x338] sm:$0xff]  ;;  %v187_v32 = vld [vmem:[%s2070_s18 + $0x140] sm:$0xff] }
  0x3b   : > { %v251_v33 = vld [vmem:[%s2070_s18 + $0x340] sm:$0xff] }
  0x3d   : > { %1509 = vmatmul.mubr.f32.gmra.mxu0 %v156_v34  ;;  %1605 = vmatmul.mubr.f32.gmra.mxu1 %v220_v35  ;;  %v188_v34 = vld [vmem:[%s2070_s18 + $0x148] sm:$0xff] }
  0x3e   : > { %1511 = vmatprep.mubr.f32.mxu0 %v157_v36  ;;  %1607 = vmatprep.mubr.f32.mxu1 %v221_v37  ;;  %v252_v35 = vld [vmem:[%s2070_s18 + $0x348] sm:$0xff]  ;;  %v189_v36 = vld [vmem:[%s2070_s18 + $0x150] sm:$0xff] }
  0x3f   : > { %v253_v37 = vld [vmem:[%s2070_s18 + $0x350] sm:$0xff] }
  0x41   : > { %1512 = vmatmul.mubr.f32.gmra.mxu0 %v158_v38  ;;  %1608 = vmatmul.mubr.f32.gmra.mxu1 %v222_v39  ;;  %v190_v38 = vld [vmem:[%s2070_s18 + $0x158] sm:$0xff] }
  0x42   : > { %1514 = vmatprep.mubr.f32.mxu0 %v159_v40  ;;  %1610 = vmatprep.mubr.f32.mxu1 %v223_v41  ;;  %v254_v39 = vld [vmem:[%s2070_s18 + $0x358] sm:$0xff]  ;;  %v191_v40 = vld [vmem:[%s2070_s18 + $0x160] sm:$0xff] }
  0x43   : > { %v255_v41 = vld [vmem:[%s2070_s18 + $0x360] sm:$0xff] }
  0x45   : > { %1515 = vmatmul.mubr.f32.gmra.mxu0 %v160_v42  ;;  %1611 = vmatmul.mubr.f32.gmra.mxu1 %v224_v43  ;;  %v192_v42 = vld [vmem:[%s2070_s18 + $0x168] sm:$0xff] }
  0x46   : > { %1517 = vmatprep.mubr.f32.mxu0 %v161_v44  ;;  %1613 = vmatprep.mubr.f32.mxu1 %v225_v45  ;;  %v256_v43 = vld [vmem:[%s2070_s18 + $0x368] sm:$0xff]  ;;  %v193_v44 = vld [vmem:[%s2070_s18 + $0x170] sm:$0xff] }
  0x47   : > { %v257_v45 = vld [vmem:[%s2070_s18 + $0x370] sm:$0xff] }
  0x49   : > { %1518 = vmatmul.mubr.f32.gmra.mxu0 %v162_v46  ;;  %1614 = vmatmul.mubr.f32.gmra.mxu1 %v226_v47  ;;  %v194_v46 = vld [vmem:[%s2070_s18 + $0x178] sm:$0xff] }
  0x4a   : > { %1520 = vmatprep.mubr.f32.mxu0 %v163_v48  ;;  %1616 = vmatprep.mubr.f32.mxu1 %v227_v49  ;;  %v258_v47 = vld [vmem:[%s2070_s18 + $0x378] sm:$0xff]  ;;  %v195_v48 = vld [vmem:[%s2070_s18 + $0x180] sm:$0xff] }
  0x4b   : > { %v259_v49 = vld [vmem:[%s2070_s18 + $0x380] sm:$0xff] }
  0x4d   : > { %1521 = vmatmul.mubr.f32.gmra.mxu0 %v164_v50  ;;  %1617 = vmatmul.mubr.f32.gmra.mxu1 %v228_v51  ;;  %v196_v50 = vld [vmem:[%s2070_s18 + $0x188] sm:$0xff] }
  0x4e   : > { %1523 = vmatprep.mubr.f32.mxu0 %v165_v52  ;;  %1619 = vmatprep.mubr.f32.mxu1 %v229_v53  ;;  %v260_v51 = vld [vmem:[%s2070_s18 + $0x388] sm:$0xff]  ;;  %v197_v52 = vld [vmem:[%s2070_s18 + $0x190] sm:$0xff] }
  0x4f   : > { %v261_v53 = vld [vmem:[%s2070_s18 + $0x390] sm:$0xff] }
  0x51   : > { %1524 = vmatmul.mubr.f32.gmra.mxu0 %v166_v54  ;;  %1620 = vmatmul.mubr.f32.gmra.mxu1 %v230_v55  ;;  %v198_v54 = vld [vmem:[%s2070_s18 + $0x198] sm:$0xff] }
  0x52   : > { %1526 = vmatprep.mubr.f32.mxu0 %v167_v56  ;;  %1622 = vmatprep.mubr.f32.mxu1 %v231_v57  ;;  %v262_v55 = vld [vmem:[%s2070_s18 + $0x398] sm:$0xff]  ;;  %v199_v56 = vld [vmem:[%s2070_s18 + $0x1a0] sm:$0xff] }
  0x53   : > { %v263_v57 = vld [vmem:[%s2070_s18 + $0x3a0] sm:$0xff] }
  0x55   : > { %1527 = vmatmul.mubr.f32.gmra.mxu0 %v168_v58  ;;  %1623 = vmatmul.mubr.f32.gmra.mxu1 %v232_v59  ;;  %v200_v58 = vld [vmem:[%s2070_s18 + $0x1a8] sm:$0xff] }
  0x56   : > { %1529 = vmatprep.mubr.f32.mxu0 %v169_v60  ;;  %1625 = vmatprep.mubr.f32.mxu1 %v233_v61  ;;  %v264_v59 = vld [vmem:[%s2070_s18 + $0x3a8] sm:$0xff]  ;;  %v201_v60 = vld [vmem:[%s2070_s18 + $0x1b0] sm:$0xff] }
  0x57   : > { %v265_v61 = vld [vmem:[%s2070_s18 + $0x3b0] sm:$0xff] }
  0x59   : > { %1530 = vmatmul.mubr.f32.gmra.mxu0 %v170_v62  ;;  %1626 = vmatmul.mubr.f32.gmra.mxu1 %v234_v63  ;;  %v202_v62 = vld [vmem:[%s2070_s18 + $0x1b8] sm:$0xff] }
  0x5a   : > { %1532 = vmatprep.mubr.f32.mxu0 %v171_v0  ;;  %1628 = vmatprep.mubr.f32.mxu1 %v235_v1  ;;  %v266_v63 = vld [vmem:[%s2070_s18 + $0x3b8] sm:$0xff]  ;;  %v203_v0 = vld [vmem:[%s2070_s18 + $0x1c0] sm:$0xff] }
  0x5b   : > { %v267_v1 = vld [vmem:[%s2070_s18 + $0x3c0] sm:$0xff] }
  0x5d   : > { %1533 = vmatmul.mubr.f32.gmra.mxu0 %v172_v2  ;;  %1629 = vmatmul.mubr.f32.gmra.mxu1 %v236_v3  ;;  %v204_v2 = vld [vmem:[%s2070_s18 + $0x1c8] sm:$0xff] }
  0x5e   : > { %1535 = vmatprep.mubr.f32.mxu0 %v173_v4  ;;  %1631 = vmatprep.mubr.f32.mxu1 %v237_v5  ;;  %v268_v3 = vld [vmem:[%s2070_s18 + $0x3c8] sm:$0xff]  ;;  %v205_v4 = vld [vmem:[%s2070_s18 + $0x1d0] sm:$0xff] }
  0x5f   : > { %v269_v5 = vld [vmem:[%s2070_s18 + $0x3d0] sm:$0xff] }
  0x61   : > { %1536 = vmatmul.mubr.f32.gmra.mxu0 %v174_v6  ;;  %1632 = vmatmul.mubr.f32.gmra.mxu1 %v238_v7  ;;  %v206_v6 = vld [vmem:[%s2070_s18 + $0x1d8] sm:$0xff] }
  0x62   : > { %1538 = vmatprep.mubr.f32.mxu0 %v175_v8  ;;  %1634 = vmatprep.mubr.f32.mxu1 %v239_v9  ;;  %v270_v7 = vld [vmem:[%s2070_s18 + $0x3d8] sm:$0xff]  ;;  %v207_v8 = vld [vmem:[%s2070_s18 + $0x1e0] sm:$0xff] }
  0x63   : > { %v271_v9 = vld [vmem:[%s2070_s18 + $0x3e0] sm:$0xff] }
  0x65   : > { %1539 = vmatmul.mubr.f32.gmra.mxu0 %v176_v10  ;;  %1635 = vmatmul.mubr.f32.gmra.mxu1 %v240_v11  ;;  %v208_v10 = vld [vmem:[%s2070_s18 + $0x1e8] sm:$0xff] }
  0x66   : > { %1541 = vmatprep.mubr.f32.mxu0 %v177_v12  ;;  %1637 = vmatprep.mubr.f32.mxu1 %v241_v13  ;;  %v272_v11 = vld [vmem:[%s2070_s18 + $0x3e8] sm:$0xff]  ;;  %v209_v12 = vld [vmem:[%s2070_s18 + $0x1f0] sm:$0xff] }
  0x67   : > { %v273_v13 = vld [vmem:[%s2070_s18 + $0x3f0] sm:$0xff] }
  0x69   : > { %1542 = vmatmul.mubr.f32.gmra.mxu0 %v178_v14  ;;  %1638 = vmatmul.mubr.f32.gmra.mxu1 %v242_v15  ;;  %v210_v14 = vld [vmem:[%s2070_s18 + $0x1f8] sm:$0xff] }
  0x6a   : > { %1544 = vmatprep.mubr.f32.mxu0 %v179_v16  ;;  %1640 = vmatprep.mubr.f32.mxu1 %v243_v17  ;;  %v274_v15 = vld [vmem:[%s2070_s18 + $0x3f8] sm:$0xff] }
  0x6d   : > { %1545 = vmatmul.mubr.f32.gmra.mxu0 %v180_v18  ;;  %1641 = vmatmul.mubr.f32.gmra.mxu1 %v244_v19 }
  0x6e   : > { %1547 = vmatprep.mubr.f32.mxu0 %v181_v20  ;;  %1643 = vmatprep.mubr.f32.mxu1 %v245_v21 }
  0x71   : > { %1548 = vmatmul.mubr.f32.gmra.mxu0 %v182_v22  ;;  %1644 = vmatmul.mubr.f32.gmra.mxu1 %v246_v23 }
  0x72   : > { %1550 = vmatprep.mubr.f32.mxu0 %v183_v24  ;;  %1646 = vmatprep.mubr.f32.mxu1 %v247_v25 }
  0x75   : > { %1551 = vmatmul.mubr.f32.gmra.mxu0 %v184_v26  ;;  %1647 = vmatmul.mubr.f32.gmra.mxu1 %v248_v27 }
  0x76   : > { %1553 = vmatprep.mubr.f32.mxu0 %v185_v28  ;;  %1649 = vmatprep.mubr.f32.mxu1 %v249_v29 }
  0x79   : > { %1554 = vmatmul.mubr.f32.gmra.mxu0 %v186_v30  ;;  %1650 = vmatmul.mubr.f32.gmra.mxu1 %v250_v31 }
  0x7a   : > { %1556 = vmatprep.mubr.f32.mxu0 %v187_v32  ;;  %1652 = vmatprep.mubr.f32.mxu1 %v251_v33 }
  0x7d   : > { %1557 = vmatmul.mubr.f32.gmra.mxu0 %v188_v34  ;;  %1653 = vmatmul.mubr.f32.gmra.mxu1 %v252_v35 }
  0x7e   : > { %1559 = vmatprep.mubr.f32.mxu0 %v189_v36  ;;  %1655 = vmatprep.mubr.f32.mxu1 %v253_v37 }
  0x81   : > { %1560 = vmatmul.mubr.f32.gmra.mxu0 %v190_v38  ;;  %1656 = vmatmul.mubr.f32.gmra.mxu1 %v254_v39 }
  0x82   : > { %1562 = vmatprep.mubr.f32.mxu0 %v191_v40  ;;  %1658 = vmatprep.mubr.f32.mxu1 %v255_v41 }
  0x85   : > { %1563 = vmatmul.mubr.f32.gmra.mxu0 %v192_v42  ;;  %1659 = vmatmul.mubr.f32.gmra.mxu1 %v256_v43 }
  0x86   : > { %1565 = vmatprep.mubr.f32.mxu0 %v193_v44  ;;  %1661 = vmatprep.mubr.f32.mxu1 %v257_v45 }
  0x89   : > { %1566 = vmatmul.mubr.f32.gmra.mxu0 %v194_v46  ;;  %1662 = vmatmul.mubr.f32.gmra.mxu1 %v258_v47 }
  0x8a   : > { %1568 = vmatprep.mubr.f32.mxu0 %v195_v48  ;;  %1664 = vmatprep.mubr.f32.mxu1 %v259_v49 }
  0x8d   : > { %1569 = vmatmul.mubr.f32.gmra.mxu0 %v196_v50  ;;  %1665 = vmatmul.mubr.f32.gmra.mxu1 %v260_v51 }
  0x8e   : > { %1571 = vmatprep.mubr.f32.mxu0 %v197_v52  ;;  %1667 = vmatprep.mubr.f32.mxu1 %v261_v53 }
  0x91   : > { %1572 = vmatmul.mubr.f32.gmra.mxu0 %v198_v54  ;;  %1668 = vmatmul.mubr.f32.gmra.mxu1 %v262_v55 }
  0x92   : > { %1574 = vmatprep.mubr.f32.mxu0 %v199_v56  ;;  %1670 = vmatprep.mubr.f32.mxu1 %v263_v57 }
  0x95   : > { %1575 = vmatmul.mubr.f32.gmra.mxu0 %v200_v58  ;;  %1671 = vmatmul.mubr.f32.gmra.mxu1 %v264_v59 }
  0x96   : > { %1577 = vmatprep.mubr.f32.mxu0 %v201_v60  ;;  %1673 = vmatprep.mubr.f32.mxu1 %v265_v61 }
  0x99   : > { %1578 = vmatmul.mubr.f32.gmra.mxu0 %v202_v62  ;;  %1674 = vmatmul.mubr.f32.gmra.mxu1 %v266_v63 }
  0x9a   : > { %1580 = vmatprep.mubr.f32.mxu0 %v203_v0  ;;  %1676 = vmatprep.mubr.f32.mxu1 %v267_v1 }
  0x9d   : > { %1581 = vmatmul.mubr.f32.gmra.mxu0 %v204_v2  ;;  %1677 = vmatmul.mubr.f32.gmra.mxu1 %v268_v3 }
  0x9e   : > { %1583 = vmatprep.mubr.f32.mxu0 %v205_v4  ;;  %1679 = vmatprep.mubr.f32.mxu1 %v269_v5 }
  0xa1   : > { %1584 = vmatmul.mubr.f32.gmra.mxu0 %v206_v6  ;;  %1680 = vmatmul.mubr.f32.gmra.mxu1 %v270_v7 }
  0xa2   : > { %1586 = vmatprep.mubr.f32.mxu0 %v207_v8  ;;  %1682 = vmatprep.mubr.f32.mxu1 %v271_v9 }
  0xa5   : > { %1587 = vmatmul.mubr.f32.gmra.mxu0 %v208_v10  ;;  %1683 = vmatmul.mubr.f32.gmra.mxu1 %v272_v11 }
  0xa6   : > { %1589 = vmatprep.mubr.f32.mxu0 %v209_v12  ;;  %1685 = vmatprep.mubr.f32.mxu1 %v273_v13 }
  0xa9   : > { %1590 = vmatmul.mubr.f32.gmra.mxu0 %v210_v14  ;;  %1686 = vmatmul.mubr.f32.gmra.mxu1 %v274_v15 }
  0xed   : > { %v1498_v16 = vpop.f32.mrf.mxu0  ;;  %v1594_v17 = vpop.f32.mrf.mxu1 }
  0xee   : > { %1728 = vtanh.f32 %v1498_v16 }
  0xef   : > { %1730 = vtanh.f32 %v1594_v17  ;;  %v357_v18 = vpop.f32.mrf.mxu0  ;;  %v677_v19 = vpop.f32.mrf.mxu1 }
  0xf0   : > { %1732 = vtanh.f32 %v357_v18 }
  0xf1   : > { %1734 = vtanh.f32 %v677_v19  ;;  %v1501_v20 = vpop.f32.mrf.mxu0  ;;  %v1597_v21 = vpop.f32.mrf.mxu1 }
  0xf2   : > { %1736 = vtanh.f32 %v1501_v20 }
  0xf3   : > { %1738 = vtanh.f32 %v1597_v21  ;;  %v367_v22 = vpop.f32.mrf.mxu0  ;;  %v687_v23 = vpop.f32.mrf.mxu1 }
  0xf4   : > { %1740 = vtanh.f32 %v367_v22 }
  0xf5   : > { %1742 = vtanh.f32 %v687_v23  ;;  %v1504_v24 = vpop.f32.mrf.mxu0  ;;  %v1600_v25 = vpop.f32.mrf.mxu1 }
  0xf6   : > { %1744 = vtanh.f32 %v1504_v24 }
  0xf7   : > { %1746 = vtanh.f32 %v1600_v25  ;;  %v377_v26 = vpop.f32.mrf.mxu0  ;;  %v697_v27 = vpop.f32.mrf.mxu1 }
  0xf8   : > { %1748 = vtanh.f32 %v377_v26 }
  0xf9   : > { %1750 = vtanh.f32 %v697_v27  ;;  %v1507_v28 = vpop.f32.mrf.mxu0  ;;  %v1603_v29 = vpop.f32.mrf.mxu1 }
  0xfa   : > { %1752 = vtanh.f32 %v1507_v28 }
  0xfb   : > { %v1729_v30 = vpop.eup %1728  ;;  %1754 = vtanh.f32 %v1603_v29  ;;  %v387_v31 = vpop.f32.mrf.mxu0 }
  0xfc   : > { %v707_v32 = vpop.f32.mrf.mxu1  ;;  %v1731_v33 = vpop.eup %1730  ;;  %1126 = vst.msk [vmem:[%s2208_s23 + $0x8] sm:$0xff] %vm1124_vm0, %v1729_v30  ;;  %1756 = vtanh.f32 %v387_v31 }
  0xfd   : > { %v1733_v34 = vpop.eup %1732  ;;  %1190 = vst.msk [vmem:[%s2208_s23 + $0x208] sm:$0xff] %vm1124_vm0, %v1731_v33  ;;  %1758 = vtanh.f32 %v707_v32  ;;  %v1510_v35 = vpop.f32.mrf.mxu0 }
  0xfe   : > { %v1606_v36 = vpop.f32.mrf.mxu1  ;;  %v1735_v37 = vpop.eup %1734  ;;  %1125 = vst.msk [vmem:[%s2208_s23] sm:$0xff] %vm1124_vm0, %v1733_v34  ;;  %1760 = vtanh.f32 %v1510_v35 }
  0xff   : > { %v1737_v38 = vpop.eup %1736  ;;  %1189 = vst.msk [vmem:[%s2208_s23 + $0x200] sm:$0xff] %vm1124_vm0, %v1735_v37  ;;  %1762 = vtanh.f32 %v1606_v36  ;;  %v397_v39 = vpop.f32.mrf.mxu0 }
 0x100   : > { %v717_v40 = vpop.f32.mrf.mxu1  ;;  %v1739_v41 = vpop.eup %1738  ;;  %1128 = vst.msk [vmem:[%s2208_s23 + $0x18] sm:$0xff] %vm1124_vm0, %v1737_v38  ;;  %1764 = vtanh.f32 %v397_v39 }
 0x101   : > { %v1741_v42 = vpop.eup %1740  ;;  %1192 = vst.msk [vmem:[%s2208_s23 + $0x218] sm:$0xff] %vm1124_vm0, %v1739_v41  ;;  %1766 = vtanh.f32 %v717_v40  ;;  %v1513_v43 = vpop.f32.mrf.mxu0 }
 0x102   : > { %v1609_v44 = vpop.f32.mrf.mxu1  ;;  %v1743_v45 = vpop.eup %1742  ;;  %1127 = vst.msk [vmem:[%s2208_s23 + $0x10] sm:$0xff] %vm1124_vm0, %v1741_v42  ;;  %1768 = vtanh.f32 %v1513_v43 }
 0x103   : > { %v1745_v46 = vpop.eup %1744  ;;  %1191 = vst.msk [vmem:[%s2208_s23 + $0x210] sm:$0xff] %vm1124_vm0, %v1743_v45  ;;  %1770 = vtanh.f32 %v1609_v44  ;;  %v407_v47 = vpop.f32.mrf.mxu0 }
 0x104   : > { %v727_v48 = vpop.f32.mrf.mxu1  ;;  %v1747_v49 = vpop.eup %1746  ;;  %1130 = vst.msk [vmem:[%s2208_s23 + $0x28] sm:$0xff] %vm1124_vm0, %v1745_v46  ;;  %1772 = vtanh.f32 %v407_v47 }
 0x105   : > { %v1749_v50 = vpop.eup %1748  ;;  %1194 = vst.msk [vmem:[%s2208_s23 + $0x228] sm:$0xff] %vm1124_vm0, %v1747_v49  ;;  %1774 = vtanh.f32 %v727_v48  ;;  %v1516_v51 = vpop.f32.mrf.mxu0 }
 0x106   : > { %v1612_v52 = vpop.f32.mrf.mxu1  ;;  %v1751_v53 = vpop.eup %1750  ;;  %1129 = vst.msk [vmem:[%s2208_s23 + $0x20] sm:$0xff] %vm1124_vm0, %v1749_v50  ;;  %1776 = vtanh.f32 %v1516_v51 }
 0x107   : > { %v1753_v54 = vpop.eup %1752  ;;  %1193 = vst.msk [vmem:[%s2208_s23 + $0x220] sm:$0xff] %vm1124_vm0, %v1751_v53  ;;  %1778 = vtanh.f32 %v1612_v52  ;;  %v417_v55 = vpop.f32.mrf.mxu0 }
 0x108   : > { %v737_v56 = vpop.f32.mrf.mxu1  ;;  %v1755_v57 = vpop.eup %1754  ;;  %1132 = vst.msk [vmem:[%s2208_s23 + $0x38] sm:$0xff] %vm1124_vm0, %v1753_v54  ;;  %1780 = vtanh.f32 %v417_v55 }
 0x109   : > { %v1757_v58 = vpop.eup %1756  ;;  %1196 = vst.msk [vmem:[%s2208_s23 + $0x238] sm:$0xff] %vm1124_vm0, %v1755_v57  ;;  %1782 = vtanh.f32 %v737_v56  ;;  %v1519_v59 = vpop.f32.mrf.mxu0 }
 0x10a   : > { %v1615_v60 = vpop.f32.mrf.mxu1  ;;  %v1759_v61 = vpop.eup %1758  ;;  %1131 = vst.msk [vmem:[%s2208_s23 + $0x30] sm:$0xff] %vm1124_vm0, %v1757_v58  ;;  %1784 = vtanh.f32 %v1519_v59 }
 0x10b   : > { %v1761_v62 = vpop.eup %1760  ;;  %1195 = vst.msk [vmem:[%s2208_s23 + $0x230] sm:$0xff] %vm1124_vm0, %v1759_v61  ;;  %1786 = vtanh.f32 %v1615_v60  ;;  %v427_v63 = vpop.f32.mrf.mxu0 }
 0x10c   : > { %v747_v0 = vpop.f32.mrf.mxu1  ;;  %v1763_v1 = vpop.eup %1762  ;;  %1134 = vst.msk [vmem:[%s2208_s23 + $0x48] sm:$0xff] %vm1124_vm0, %v1761_v62  ;;  %1788 = vtanh.f32 %v427_v63 }
 0x10d   : > { %v1765_v2 = vpop.eup %1764  ;;  %1198 = vst.msk [vmem:[%s2208_s23 + $0x248] sm:$0xff] %vm1124_vm0, %v1763_v1  ;;  %1790 = vtanh.f32 %v747_v0  ;;  %v1522_v3 = vpop.f32.mrf.mxu0 }
 0x10e   : > { %v1618_v4 = vpop.f32.mrf.mxu1  ;;  %v1767_v5 = vpop.eup %1766  ;;  %1133 = vst.msk [vmem:[%s2208_s23 + $0x40] sm:$0xff] %vm1124_vm0, %v1765_v2  ;;  %1792 = vtanh.f32 %v1522_v3 }
 0x10f   : > { %v1769_v6 = vpop.eup %1768  ;;  %1197 = vst.msk [vmem:[%s2208_s23 + $0x240] sm:$0xff] %vm1124_vm0, %v1767_v5  ;;  %1794 = vtanh.f32 %v1618_v4  ;;  %v437_v7 = vpop.f32.mrf.mxu0 }
 0x110   : > { %v757_v8 = vpop.f32.mrf.mxu1  ;;  %v1771_v9 = vpop.eup %1770  ;;  %1136 = vst.msk [vmem:[%s2208_s23 + $0x58] sm:$0xff] %vm1124_vm0, %v1769_v6  ;;  %1796 = vtanh.f32 %v437_v7 }
 0x111   : > { %v1773_v10 = vpop.eup %1772  ;;  %1200 = vst.msk [vmem:[%s2208_s23 + $0x258] sm:$0xff] %vm1124_vm0, %v1771_v9  ;;  %1798 = vtanh.f32 %v757_v8  ;;  %v1525_v11 = vpop.f32.mrf.mxu0 }
 0x112   : > { %v1621_v12 = vpop.f32.mrf.mxu1  ;;  %v1775_v13 = vpop.eup %1774  ;;  %1135 = vst.msk [vmem:[%s2208_s23 + $0x50] sm:$0xff] %vm1124_vm0, %v1773_v10  ;;  %1800 = vtanh.f32 %v1525_v11 }
 0x113   : > { %v1777_v14 = vpop.eup %1776  ;;  %1199 = vst.msk [vmem:[%s2208_s23 + $0x250] sm:$0xff] %vm1124_vm0, %v1775_v13  ;;  %1802 = vtanh.f32 %v1621_v12  ;;  %v447_v15 = vpop.f32.mrf.mxu0 }
 0x114   : > { %v767_v16 = vpop.f32.mrf.mxu1  ;;  %v1779_v17 = vpop.eup %1778  ;;  %1138 = vst.msk [vmem:[%s2208_s23 + $0x68] sm:$0xff] %vm1124_vm0, %v1777_v14  ;;  %1804 = vtanh.f32 %v447_v15 }
 0x115   : > { %v1781_v18 = vpop.eup %1780  ;;  %1202 = vst.msk [vmem:[%s2208_s23 + $0x268] sm:$0xff] %vm1124_vm0, %v1779_v17  ;;  %1806 = vtanh.f32 %v767_v16  ;;  %v1528_v19 = vpop.f32.mrf.mxu0 }
 0x116   : > { %v1624_v20 = vpop.f32.mrf.mxu1  ;;  %v1783_v21 = vpop.eup %1782  ;;  %1137 = vst.msk [vmem:[%s2208_s23 + $0x60] sm:$0xff] %vm1124_vm0, %v1781_v18  ;;  %1808 = vtanh.f32 %v1528_v19 }
 0x117   : > { %v1785_v22 = vpop.eup %1784  ;;  %1201 = vst.msk [vmem:[%s2208_s23 + $0x260] sm:$0xff] %vm1124_vm0, %v1783_v21  ;;  %1810 = vtanh.f32 %v1624_v20  ;;  %v457_v23 = vpop.f32.mrf.mxu0 }
 0x118   : > { %v777_v24 = vpop.f32.mrf.mxu1  ;;  %v1787_v25 = vpop.eup %1786  ;;  %1140 = vst.msk [vmem:[%s2208_s23 + $0x78] sm:$0xff] %vm1124_vm0, %v1785_v22  ;;  %1812 = vtanh.f32 %v457_v23 }
 0x119   : > { %v1789_v26 = vpop.eup %1788  ;;  %1204 = vst.msk [vmem:[%s2208_s23 + $0x278] sm:$0xff] %vm1124_vm0, %v1787_v25  ;;  %1814 = vtanh.f32 %v777_v24  ;;  %v1531_v27 = vpop.f32.mrf.mxu0 }
 0x11a   : > { %v1627_v28 = vpop.f32.mrf.mxu1  ;;  %v1791_v29 = vpop.eup %1790  ;;  %1139 = vst.msk [vmem:[%s2208_s23 + $0x70] sm:$0xff] %vm1124_vm0, %v1789_v26  ;;  %1816 = vtanh.f32 %v1531_v27 }
 0x11b   : > { %v1793_v30 = vpop.eup %1792  ;;  %1203 = vst.msk [vmem:[%s2208_s23 + $0x270] sm:$0xff] %vm1124_vm0, %v1791_v29  ;;  %1818 = vtanh.f32 %v1627_v28  ;;  %v467_v31 = vpop.f32.mrf.mxu0 }
 0x11c   : > { %v787_v32 = vpop.f32.mrf.mxu1  ;;  %v1795_v33 = vpop.eup %1794  ;;  %1142 = vst.msk [vmem:[%s2208_s23 + $0x88] sm:$0xff] %vm1124_vm0, %v1793_v30  ;;  %1820 = vtanh.f32 %v467_v31 }
 0x11d   : > { %v1797_v34 = vpop.eup %1796  ;;  %1206 = vst.msk [vmem:[%s2208_s23 + $0x288] sm:$0xff] %vm1124_vm0, %v1795_v33  ;;  %1822 = vtanh.f32 %v787_v32  ;;  %v1534_v35 = vpop.f32.mrf.mxu0 }
 0x11e   : > { %v1630_v36 = vpop.f32.mrf.mxu1  ;;  %v1799_v37 = vpop.eup %1798  ;;  %1141 = vst.msk [vmem:[%s2208_s23 + $0x80] sm:$0xff] %vm1124_vm0, %v1797_v34  ;;  %1824 = vtanh.f32 %v1534_v35 }
 0x11f   : > { %v1801_v38 = vpop.eup %1800  ;;  %1205 = vst.msk [vmem:[%s2208_s23 + $0x280] sm:$0xff] %vm1124_vm0, %v1799_v37  ;;  %1826 = vtanh.f32 %v1630_v36  ;;  %v477_v39 = vpop.f32.mrf.mxu0 }
 0x120   : > { %v797_v40 = vpop.f32.mrf.mxu1  ;;  %v1803_v41 = vpop.eup %1802  ;;  %1144 = vst.msk [vmem:[%s2208_s23 + $0x98] sm:$0xff] %vm1124_vm0, %v1801_v38  ;;  %1828 = vtanh.f32 %v477_v39 }
 0x121   : > { %v1805_v42 = vpop.eup %1804  ;;  %1208 = vst.msk [vmem:[%s2208_s23 + $0x298] sm:$0xff] %vm1124_vm0, %v1803_v41  ;;  %1830 = vtanh.f32 %v797_v40  ;;  %v1537_v43 = vpop.f32.mrf.mxu0 }
 0x122   : > { %v1633_v44 = vpop.f32.mrf.mxu1  ;;  %v1807_v45 = vpop.eup %1806  ;;  %1143 = vst.msk [vmem:[%s2208_s23 + $0x90] sm:$0xff] %vm1124_vm0, %v1805_v42  ;;  %1832 = vtanh.f32 %v1537_v43 }
 0x123   : > { %v1809_v46 = vpop.eup %1808  ;;  %1207 = vst.msk [vmem:[%s2208_s23 + $0x290] sm:$0xff] %vm1124_vm0, %v1807_v45  ;;  %1834 = vtanh.f32 %v1633_v44  ;;  %v487_v47 = vpop.f32.mrf.mxu0 }
 0x124   : > { %v807_v48 = vpop.f32.mrf.mxu1  ;;  %v1811_v49 = vpop.eup %1810  ;;  %1146 = vst.msk [vmem:[%s2208_s23 + $0xa8] sm:$0xff] %vm1124_vm0, %v1809_v46  ;;  %1836 = vtanh.f32 %v487_v47 }
 0x125   : > { %v1813_v50 = vpop.eup %1812  ;;  %1210 = vst.msk [vmem:[%s2208_s23 + $0x2a8] sm:$0xff] %vm1124_vm0, %v1811_v49  ;;  %1838 = vtanh.f32 %v807_v48  ;;  %v1540_v51 = vpop.f32.mrf.mxu0 }
 0x126   : > { %v1636_v52 = vpop.f32.mrf.mxu1  ;;  %v1815_v53 = vpop.eup %1814  ;;  %1145 = vst.msk [vmem:[%s2208_s23 + $0xa0] sm:$0xff] %vm1124_vm0, %v1813_v50  ;;  %1840 = vtanh.f32 %v1540_v51 }
 0x127   : > { %v1817_v54 = vpop.eup %1816  ;;  %1209 = vst.msk [vmem:[%s2208_s23 + $0x2a0] sm:$0xff] %vm1124_vm0, %v1815_v53  ;;  %1842 = vtanh.f32 %v1636_v52  ;;  %v497_v55 = vpop.f32.mrf.mxu0 }
 0x128   : > { %v817_v56 = vpop.f32.mrf.mxu1  ;;  %v1819_v57 = vpop.eup %1818  ;;  %1148 = vst.msk [vmem:[%s2208_s23 + $0xb8] sm:$0xff] %vm1124_vm0, %v1817_v54  ;;  %1844 = vtanh.f32 %v497_v55 }
 0x129   : > { %v1821_v58 = vpop.eup %1820  ;;  %1212 = vst.msk [vmem:[%s2208_s23 + $0x2b8] sm:$0xff] %vm1124_vm0, %v1819_v57  ;;  %1846 = vtanh.f32 %v817_v56  ;;  %v1543_v59 = vpop.f32.mrf.mxu0 }
 0x12a   : > { %v1639_v60 = vpop.f32.mrf.mxu1  ;;  %v1823_v61 = vpop.eup %1822  ;;  %1147 = vst.msk [vmem:[%s2208_s23 + $0xb0] sm:$0xff] %vm1124_vm0, %v1821_v58  ;;  %1848 = vtanh.f32 %v1543_v59 }
 0x12b   : > { %v1825_v62 = vpop.eup %1824  ;;  %1211 = vst.msk [vmem:[%s2208_s23 + $0x2b0] sm:$0xff] %vm1124_vm0, %v1823_v61  ;;  %1850 = vtanh.f32 %v1639_v60  ;;  %v507_v63 = vpop.f32.mrf.mxu0 }
 0x12c   : > { %v827_v0 = vpop.f32.mrf.mxu1  ;;  %v1827_v1 = vpop.eup %1826  ;;  %1150 = vst.msk [vmem:[%s2208_s23 + $0xc8] sm:$0xff] %vm1124_vm0, %v1825_v62  ;;  %1852 = vtanh.f32 %v507_v63 }
 0x12d   : > { %v1829_v2 = vpop.eup %1828  ;;  %1214 = vst.msk [vmem:[%s2208_s23 + $0x2c8] sm:$0xff] %vm1124_vm0, %v1827_v1  ;;  %1854 = vtanh.f32 %v827_v0  ;;  %v1546_v3 = vpop.f32.mrf.mxu0 }
 0x12e   : > { %v1642_v4 = vpop.f32.mrf.mxu1  ;;  %v1831_v5 = vpop.eup %1830  ;;  %1149 = vst.msk [vmem:[%s2208_s23 + $0xc0] sm:$0xff] %vm1124_vm0, %v1829_v2  ;;  %1856 = vtanh.f32 %v1546_v3 }
 0x12f   : > { %v1833_v6 = vpop.eup %1832  ;;  %1213 = vst.msk [vmem:[%s2208_s23 + $0x2c0] sm:$0xff] %vm1124_vm0, %v1831_v5  ;;  %1858 = vtanh.f32 %v1642_v4  ;;  %v517_v7 = vpop.f32.mrf.mxu0 }
 0x130   : > { %v837_v8 = vpop.f32.mrf.mxu1  ;;  %v1835_v9 = vpop.eup %1834  ;;  %1152 = vst.msk [vmem:[%s2208_s23 + $0xd8] sm:$0xff] %vm1124_vm0, %v1833_v6  ;;  %1860 = vtanh.f32 %v517_v7 }
 0x131   : > { %v1837_v10 = vpop.eup %1836  ;;  %1216 = vst.msk [vmem:[%s2208_s23 + $0x2d8] sm:$0xff] %vm1124_vm0, %v1835_v9  ;;  %1862 = vtanh.f32 %v837_v8  ;;  %v1549_v11 = vpop.f32.mrf.mxu0 }
 0x132   : > { %v1645_v12 = vpop.f32.mrf.mxu1  ;;  %v1839_v13 = vpop.eup %1838  ;;  %1151 = vst.msk [vmem:[%s2208_s23 + $0xd0] sm:$0xff] %vm1124_vm0, %v1837_v10  ;;  %1864 = vtanh.f32 %v1549_v11 }
 0x133   : > { %v1841_v14 = vpop.eup %1840  ;;  %1215 = vst.msk [vmem:[%s2208_s23 + $0x2d0] sm:$0xff] %vm1124_vm0, %v1839_v13  ;;  %1866 = vtanh.f32 %v1645_v12  ;;  %v527_v15 = vpop.f32.mrf.mxu0 }
 0x134   : > { %v847_v16 = vpop.f32.mrf.mxu1  ;;  %v1843_v17 = vpop.eup %1842  ;;  %1154 = vst.msk [vmem:[%s2208_s23 + $0xe8] sm:$0xff] %vm1124_vm0, %v1841_v14  ;;  %1868 = vtanh.f32 %v527_v15 }
 0x135   : > { %v1845_v18 = vpop.eup %1844  ;;  %1218 = vst.msk [vmem:[%s2208_s23 + $0x2e8] sm:$0xff] %vm1124_vm0, %v1843_v17  ;;  %1870 = vtanh.f32 %v847_v16  ;;  %v1552_v19 = vpop.f32.mrf.mxu0 }
 0x136   : > { %v1648_v20 = vpop.f32.mrf.mxu1  ;;  %v1847_v21 = vpop.eup %1846  ;;  %1153 = vst.msk [vmem:[%s2208_s23 + $0xe0] sm:$0xff] %vm1124_vm0, %v1845_v18  ;;  %1872 = vtanh.f32 %v1552_v19 }
 0x137   : > { %v1849_v22 = vpop.eup %1848  ;;  %1217 = vst.msk [vmem:[%s2208_s23 + $0x2e0] sm:$0xff] %vm1124_vm0, %v1847_v21  ;;  %1874 = vtanh.f32 %v1648_v20  ;;  %v537_v23 = vpop.f32.mrf.mxu0 }
 0x138   : > { %v857_v24 = vpop.f32.mrf.mxu1  ;;  %v1851_v25 = vpop.eup %1850  ;;  %1156 = vst.msk [vmem:[%s2208_s23 + $0xf8] sm:$0xff] %vm1124_vm0, %v1849_v22  ;;  %1876 = vtanh.f32 %v537_v23 }
 0x139   : > { %v1853_v26 = vpop.eup %1852  ;;  %1220 = vst.msk [vmem:[%s2208_s23 + $0x2f8] sm:$0xff] %vm1124_vm0, %v1851_v25  ;;  %1878 = vtanh.f32 %v857_v24  ;;  %v1555_v27 = vpop.f32.mrf.mxu0 }
 0x13a   : > { %v1651_v28 = vpop.f32.mrf.mxu1  ;;  %v1855_v29 = vpop.eup %1854  ;;  %1155 = vst.msk [vmem:[%s2208_s23 + $0xf0] sm:$0xff] %vm1124_vm0, %v1853_v26  ;;  %1880 = vtanh.f32 %v1555_v27 }
 0x13b   : > { %v1857_v30 = vpop.eup %1856  ;;  %1219 = vst.msk [vmem:[%s2208_s23 + $0x2f0] sm:$0xff] %vm1124_vm0, %v1855_v29  ;;  %1882 = vtanh.f32 %v1651_v28  ;;  %v547_v31 = vpop.f32.mrf.mxu0 }
 0x13c   : > { %v867_v32 = vpop.f32.mrf.mxu1  ;;  %v1859_v33 = vpop.eup %1858  ;;  %1158 = vst.msk [vmem:[%s2208_s23 + $0x108] sm:$0xff] %vm1124_vm0, %v1857_v30  ;;  %1884 = vtanh.f32 %v547_v31 }
 0x13d   : > { %v1861_v34 = vpop.eup %1860  ;;  %1222 = vst.msk [vmem:[%s2208_s23 + $0x308] sm:$0xff] %vm1124_vm0, %v1859_v33  ;;  %1886 = vtanh.f32 %v867_v32  ;;  %v1558_v35 = vpop.f32.mrf.mxu0 }
 0x13e   : > { %v1654_v36 = vpop.f32.mrf.mxu1  ;;  %v1863_v37 = vpop.eup %1862  ;;  %1157 = vst.msk [vmem:[%s2208_s23 + $0x100] sm:$0xff] %vm1124_vm0, %v1861_v34  ;;  %1888 = vtanh.f32 %v1558_v35 }
 0x13f   : > { %v1865_v38 = vpop.eup %1864  ;;  %1221 = vst.msk [vmem:[%s2208_s23 + $0x300] sm:$0xff] %vm1124_vm0, %v1863_v37  ;;  %1890 = vtanh.f32 %v1654_v36  ;;  %v557_v39 = vpop.f32.mrf.mxu0 }
 0x140   : > { %v877_v40 = vpop.f32.mrf.mxu1  ;;  %v1867_v41 = vpop.eup %1866  ;;  %1160 = vst.msk [vmem:[%s2208_s23 + $0x118] sm:$0xff] %vm1124_vm0, %v1865_v38  ;;  %1892 = vtanh.f32 %v557_v39 }
 0x141   : > { %v1869_v42 = vpop.eup %1868  ;;  %1224 = vst.msk [vmem:[%s2208_s23 + $0x318] sm:$0xff] %vm1124_vm0, %v1867_v41  ;;  %1894 = vtanh.f32 %v877_v40  ;;  %v1561_v43 = vpop.f32.mrf.mxu0 }
 0x142   : > { %v1657_v44 = vpop.f32.mrf.mxu1  ;;  %v1871_v45 = vpop.eup %1870  ;;  %1159 = vst.msk [vmem:[%s2208_s23 + $0x110] sm:$0xff] %vm1124_vm0, %v1869_v42  ;;  %1896 = vtanh.f32 %v1561_v43 }
 0x143   : > { %v1873_v46 = vpop.eup %1872  ;;  %1223 = vst.msk [vmem:[%s2208_s23 + $0x310] sm:$0xff] %vm1124_vm0, %v1871_v45  ;;  %1898 = vtanh.f32 %v1657_v44  ;;  %v567_v47 = vpop.f32.mrf.mxu0 }
 0x144   : > { %v887_v48 = vpop.f32.mrf.mxu1  ;;  %v1875_v49 = vpop.eup %1874  ;;  %1162 = vst.msk [vmem:[%s2208_s23 + $0x128] sm:$0xff] %vm1124_vm0, %v1873_v46  ;;  %1900 = vtanh.f32 %v567_v47 }
 0x145   : > { %v1877_v50 = vpop.eup %1876  ;;  %1226 = vst.msk [vmem:[%s2208_s23 + $0x328] sm:$0xff] %vm1124_vm0, %v1875_v49  ;;  %1902 = vtanh.f32 %v887_v48  ;;  %v1564_v51 = vpop.f32.mrf.mxu0 }
 0x146   : > { %v1660_v52 = vpop.f32.mrf.mxu1  ;;  %v1879_v53 = vpop.eup %1878  ;;  %1161 = vst.msk [vmem:[%s2208_s23 + $0x120] sm:$0xff] %vm1124_vm0, %v1877_v50  ;;  %1904 = vtanh.f32 %v1564_v51 }
 0x147   : > { %v1881_v54 = vpop.eup %1880  ;;  %1225 = vst.msk [vmem:[%s2208_s23 + $0x320] sm:$0xff] %vm1124_vm0, %v1879_v53  ;;  %1906 = vtanh.f32 %v1660_v52  ;;  %v577_v55 = vpop.f32.mrf.mxu0 }
 0x148   : > { %v897_v56 = vpop.f32.mrf.mxu1  ;;  %v1883_v57 = vpop.eup %1882  ;;  %1164 = vst.msk [vmem:[%s2208_s23 + $0x138] sm:$0xff] %vm1124_vm0, %v1881_v54  ;;  %1908 = vtanh.f32 %v577_v55 }
 0x149   : > { %v1885_v58 = vpop.eup %1884  ;;  %1228 = vst.msk [vmem:[%s2208_s23 + $0x338] sm:$0xff] %vm1124_vm0, %v1883_v57  ;;  %1910 = vtanh.f32 %v897_v56  ;;  %v1567_v59 = vpop.f32.mrf.mxu0 }
 0x14a   : > { %v1663_v60 = vpop.f32.mrf.mxu1  ;;  %v1887_v61 = vpop.eup %1886  ;;  %1163 = vst.msk [vmem:[%s2208_s23 + $0x130] sm:$0xff] %vm1124_vm0, %v1885_v58  ;;  %1912 = vtanh.f32 %v1567_v59 }
 0x14b   : > { %v1889_v62 = vpop.eup %1888  ;;  %1227 = vst.msk [vmem:[%s2208_s23 + $0x330] sm:$0xff] %vm1124_vm0, %v1887_v61  ;;  %1914 = vtanh.f32 %v1663_v60  ;;  %v587_v63 = vpop.f32.mrf.mxu0 }
 0x14c   : > { %v907_v0 = vpop.f32.mrf.mxu1  ;;  %v1891_v1 = vpop.eup %1890  ;;  %1166 = vst.msk [vmem:[%s2208_s23 + $0x148] sm:$0xff] %vm1124_vm0, %v1889_v62  ;;  %1916 = vtanh.f32 %v587_v63 }
 0x14d   : > { %v1893_v2 = vpop.eup %1892  ;;  %1230 = vst.msk [vmem:[%s2208_s23 + $0x348] sm:$0xff] %vm1124_vm0, %v1891_v1  ;;  %1918 = vtanh.f32 %v907_v0  ;;  %v1570_v3 = vpop.f32.mrf.mxu0 }
 0x14e   : > { %v1666_v4 = vpop.f32.mrf.mxu1  ;;  %v1895_v5 = vpop.eup %1894  ;;  %1165 = vst.msk [vmem:[%s2208_s23 + $0x140] sm:$0xff] %vm1124_vm0, %v1893_v2  ;;  %1920 = vtanh.f32 %v1570_v3 }
 0x14f   : > { %v1897_v6 = vpop.eup %1896  ;;  %1229 = vst.msk [vmem:[%s2208_s23 + $0x340] sm:$0xff] %vm1124_vm0, %v1895_v5  ;;  %1922 = vtanh.f32 %v1666_v4  ;;  %v597_v7 = vpop.f32.mrf.mxu0 }
 0x150   : > { %v917_v8 = vpop.f32.mrf.mxu1  ;;  %v1899_v9 = vpop.eup %1898  ;;  %1168 = vst.msk [vmem:[%s2208_s23 + $0x158] sm:$0xff] %vm1124_vm0, %v1897_v6  ;;  %1924 = vtanh.f32 %v597_v7 }
 0x151   : > { %v1901_v10 = vpop.eup %1900  ;;  %1232 = vst.msk [vmem:[%s2208_s23 + $0x358] sm:$0xff] %vm1124_vm0, %v1899_v9  ;;  %1926 = vtanh.f32 %v917_v8  ;;  %v1573_v11 = vpop.f32.mrf.mxu0 }
 0x152   : > { %v1669_v12 = vpop.f32.mrf.mxu1  ;;  %v1903_v13 = vpop.eup %1902  ;;  %1167 = vst.msk [vmem:[%s2208_s23 + $0x150] sm:$0xff] %vm1124_vm0, %v1901_v10  ;;  %1928 = vtanh.f32 %v1573_v11 }
 0x153   : > { %v1905_v14 = vpop.eup %1904  ;;  %1231 = vst.msk [vmem:[%s2208_s23 + $0x350] sm:$0xff] %vm1124_vm0, %v1903_v13  ;;  %1930 = vtanh.f32 %v1669_v12  ;;  %v607_v15 = vpop.f32.mrf.mxu0 }
 0x154   : > { %v927_v16 = vpop.f32.mrf.mxu1  ;;  %v1907_v17 = vpop.eup %1906  ;;  %1170 = vst.msk [vmem:[%s2208_s23 + $0x168] sm:$0xff] %vm1124_vm0, %v1905_v14  ;;  %1932 = vtanh.f32 %v607_v15 }
 0x155   : > { %v1909_v18 = vpop.eup %1908  ;;  %1234 = vst.msk [vmem:[%s2208_s23 + $0x368] sm:$0xff] %vm1124_vm0, %v1907_v17  ;;  %1934 = vtanh.f32 %v927_v16  ;;  %v1576_v19 = vpop.f32.mrf.mxu0 }
 0x156   : > { %v1672_v20 = vpop.f32.mrf.mxu1  ;;  %v1911_v21 = vpop.eup %1910  ;;  %1169 = vst.msk [vmem:[%s2208_s23 + $0x160] sm:$0xff] %vm1124_vm0, %v1909_v18  ;;  %1936 = vtanh.f32 %v1576_v19 }
 0x157   : > { %v1913_v22 = vpop.eup %1912  ;;  %1233 = vst.msk [vmem:[%s2208_s23 + $0x360] sm:$0xff] %vm1124_vm0, %v1911_v21  ;;  %1938 = vtanh.f32 %v1672_v20  ;;  %v617_v23 = vpop.f32.mrf.mxu0 }
 0x158   : > { %v937_v24 = vpop.f32.mrf.mxu1  ;;  %v1915_v25 = vpop.eup %1914  ;;  %1172 = vst.msk [vmem:[%s2208_s23 + $0x178] sm:$0xff] %vm1124_vm0, %v1913_v22  ;;  %1940 = vtanh.f32 %v617_v23 }
 0x159   : > { %v1917_v26 = vpop.eup %1916  ;;  %1236 = vst.msk [vmem:[%s2208_s23 + $0x378] sm:$0xff] %vm1124_vm0, %v1915_v25  ;;  %1942 = vtanh.f32 %v937_v24  ;;  %v1579_v27 = vpop.f32.mrf.mxu0 }
 0x15a   : > { %v1675_v28 = vpop.f32.mrf.mxu1  ;;  %v1919_v29 = vpop.eup %1918  ;;  %1171 = vst.msk [vmem:[%s2208_s23 + $0x170] sm:$0xff] %vm1124_vm0, %v1917_v26  ;;  %1944 = vtanh.f32 %v1579_v27 }
 0x15b   : > { %v1921_v30 = vpop.eup %1920  ;;  %1235 = vst.msk [vmem:[%s2208_s23 + $0x370] sm:$0xff] %vm1124_vm0, %v1919_v29  ;;  %1946 = vtanh.f32 %v1675_v28  ;;  %v627_v31 = vpop.f32.mrf.mxu0 }
 0x15c   : > { %v947_v32 = vpop.f32.mrf.mxu1  ;;  %v1923_v33 = vpop.eup %1922  ;;  %1174 = vst.msk [vmem:[%s2208_s23 + $0x188] sm:$0xff] %vm1124_vm0, %v1921_v30  ;;  %1948 = vtanh.f32 %v627_v31 }
 0x15d   : > { %v1925_v34 = vpop.eup %1924  ;;  %1238 = vst.msk [vmem:[%s2208_s23 + $0x388] sm:$0xff] %vm1124_vm0, %v1923_v33  ;;  %1950 = vtanh.f32 %v947_v32  ;;  %v1582_v35 = vpop.f32.mrf.mxu0 }
 0x15e   : > { %v1678_v36 = vpop.f32.mrf.mxu1  ;;  %v1927_v37 = vpop.eup %1926  ;;  %1173 = vst.msk [vmem:[%s2208_s23 + $0x180] sm:$0xff] %vm1124_vm0, %v1925_v34  ;;  %1952 = vtanh.f32 %v1582_v35 }
 0x15f   : > { %v1929_v38 = vpop.eup %1928  ;;  %1237 = vst.msk [vmem:[%s2208_s23 + $0x380] sm:$0xff] %vm1124_vm0, %v1927_v37  ;;  %1954 = vtanh.f32 %v1678_v36  ;;  %v637_v39 = vpop.f32.mrf.mxu0 }
 0x160   : > { %v957_v40 = vpop.f32.mrf.mxu1  ;;  %v1931_v41 = vpop.eup %1930  ;;  %1176 = vst.msk [vmem:[%s2208_s23 + $0x198] sm:$0xff] %vm1124_vm0, %v1929_v38  ;;  %1956 = vtanh.f32 %v637_v39 }
 0x161   : > { %v1933_v42 = vpop.eup %1932  ;;  %1240 = vst.msk [vmem:[%s2208_s23 + $0x398] sm:$0xff] %vm1124_vm0, %v1931_v41  ;;  %1958 = vtanh.f32 %v957_v40  ;;  %v1585_v43 = vpop.f32.mrf.mxu0 }
 0x162   : > { %v1681_v44 = vpop.f32.mrf.mxu1  ;;  %v1935_v45 = vpop.eup %1934  ;;  %1175 = vst.msk [vmem:[%s2208_s23 + $0x190] sm:$0xff] %vm1124_vm0, %v1933_v42  ;;  %1960 = vtanh.f32 %v1585_v43 }
 0x163   : > { %v1937_v46 = vpop.eup %1936  ;;  %1239 = vst.msk [vmem:[%s2208_s23 + $0x390] sm:$0xff] %vm1124_vm0, %v1935_v45  ;;  %1962 = vtanh.f32 %v1681_v44  ;;  %v647_v47 = vpop.f32.mrf.mxu0 }
 0x164   : > { %v967_v48 = vpop.f32.mrf.mxu1  ;;  %v1939_v49 = vpop.eup %1938  ;;  %1178 = vst.msk [vmem:[%s2208_s23 + $0x1a8] sm:$0xff] %vm1124_vm0, %v1937_v46  ;;  %1964 = vtanh.f32 %v647_v47 }
 0x165   : > { %v1941_v50 = vpop.eup %1940  ;;  %1242 = vst.msk [vmem:[%s2208_s23 + $0x3a8] sm:$0xff] %vm1124_vm0, %v1939_v49  ;;  %1966 = vtanh.f32 %v967_v48  ;;  %v1588_v51 = vpop.f32.mrf.mxu0 }
 0x166   : > { %v1684_v52 = vpop.f32.mrf.mxu1  ;;  %v1943_v53 = vpop.eup %1942  ;;  %1177 = vst.msk [vmem:[%s2208_s23 + $0x1a0] sm:$0xff] %vm1124_vm0, %v1941_v50  ;;  %1968 = vtanh.f32 %v1588_v51 }
 0x167   : > { %v1945_v54 = vpop.eup %1944  ;;  %1241 = vst.msk [vmem:[%s2208_s23 + $0x3a0] sm:$0xff] %vm1124_vm0, %v1943_v53  ;;  %1970 = vtanh.f32 %v1684_v52  ;;  %v657_v55 = vpop.f32.mrf.mxu0 }
 0x168   : > { %v977_v56 = vpop.f32.mrf.mxu1  ;;  %v1947_v57 = vpop.eup %1946  ;;  %1180 = vst.msk [vmem:[%s2208_s23 + $0x1b8] sm:$0xff] %vm1124_vm0, %v1945_v54  ;;  %1972 = vtanh.f32 %v657_v55 }
 0x169   : > { %v1949_v58 = vpop.eup %1948  ;;  %1244 = vst.msk [vmem:[%s2208_s23 + $0x3b8] sm:$0xff] %vm1124_vm0, %v1947_v57  ;;  %1974 = vtanh.f32 %v977_v56  ;;  %v1591_v59 = vpop.f32.mrf.mxu0 }
 0x16a   : > { %v1687_v60 = vpop.f32.mrf.mxu1  ;;  %v1951_v61 = vpop.eup %1950  ;;  %1179 = vst.msk [vmem:[%s2208_s23 + $0x1b0] sm:$0xff] %vm1124_vm0, %v1949_v58  ;;  %1976 = vtanh.f32 %v1591_v59 }
 0x16b   : > { %v1953_v62 = vpop.eup %1952  ;;  %1243 = vst.msk [vmem:[%s2208_s23 + $0x3b0] sm:$0xff] %vm1124_vm0, %v1951_v61  ;;  %1978 = vtanh.f32 %v1687_v60  ;;  %v667_v63 = vpop.f32.mrf.mxu0 }
 0x16c   : > { %v987_v0 = vpop.f32.mrf.mxu1  ;;  %v1955_v1 = vpop.eup %1954  ;;  %1182 = vst.msk [vmem:[%s2208_s23 + $0x1c8] sm:$0xff] %vm1124_vm0, %v1953_v62  ;;  %1980 = vtanh.f32 %v667_v63 }
 0x16d   : > { %v1957_v2 = vpop.eup %1956  ;;  %1246 = vst.msk [vmem:[%s2208_s23 + $0x3c8] sm:$0xff] %vm1124_vm0, %v1955_v1  ;;  %1982 = vtanh.f32 %v987_v0 }
 0x16e   : > { %v1959_v3 = vpop.eup %1958  ;;  %1181 = vst.msk [vmem:[%s2208_s23 + $0x1c0] sm:$0xff] %vm1124_vm0, %v1957_v2 }
 0x16f   : > { %v1961_v4 = vpop.eup %1960  ;;  %1245 = vst.msk [vmem:[%s2208_s23 + $0x3c0] sm:$0xff] %vm1124_vm0, %v1959_v3 }
 0x170   : > { %v1963_v5 = vpop.eup %1962  ;;  %1184 = vst.msk [vmem:[%s2208_s23 + $0x1d8] sm:$0xff] %vm1124_vm0, %v1961_v4 }
 0x171   : > { %v1965_v6 = vpop.eup %1964  ;;  %1248 = vst.msk [vmem:[%s2208_s23 + $0x3d8] sm:$0xff] %vm1124_vm0, %v1963_v5 }
 0x172   : > { %v1967_v7 = vpop.eup %1966  ;;  %1183 = vst.msk [vmem:[%s2208_s23 + $0x1d0] sm:$0xff] %vm1124_vm0, %v1965_v6 }
 0x173   : > { %v1969_v8 = vpop.eup %1968  ;;  %1247 = vst.msk [vmem:[%s2208_s23 + $0x3d0] sm:$0xff] %vm1124_vm0, %v1967_v7 }
 0x174   : > { %v1971_v9 = vpop.eup %1970  ;;  %1186 = vst.msk [vmem:[%s2208_s23 + $0x1e8] sm:$0xff] %vm1124_vm0, %v1969_v8 }
 0x175   : > { %v1973_v10 = vpop.eup %1972  ;;  %1250 = vst.msk [vmem:[%s2208_s23 + $0x3e8] sm:$0xff] %vm1124_vm0, %v1971_v9 }
 0x176   : > { %v1975_v11 = vpop.eup %1974  ;;  %1185 = vst.msk [vmem:[%s2208_s23 + $0x1e0] sm:$0xff] %vm1124_vm0, %v1973_v10 }
 0x177   : > { %v1977_v12 = vpop.eup %1976  ;;  %1249 = vst.msk [vmem:[%s2208_s23 + $0x3e0] sm:$0xff] %vm1124_vm0, %v1975_v11 }
 0x178   : > { %v1979_v13 = vpop.eup %1978  ;;  %1188 = vst.msk [vmem:[%s2208_s23 + $0x1f8] sm:$0xff] %vm1124_vm0, %v1977_v12 }
 0x179   : > { %v1981_v14 = vpop.eup %1980  ;;  %1252 = vst.msk [vmem:[%s2208_s23 + $0x3f8] sm:$0xff] %vm1124_vm0, %v1979_v13 }
 0x17a   : > { %v1983_v15 = vpop.eup %1982  ;;  %1187 = vst.msk [vmem:[%s2208_s23 + $0x1f0] sm:$0xff] %vm1124_vm0, %v1981_v14 }
 0x17b   : > { %1251 = vst.msk [vmem:[%s2208_s23 + $0x3f0] sm:$0xff] %vm1124_vm0, %v1983_v15 }
 0x17c PF: > { %s12_s9 = sadd.s32 1, %s1990_s9  }
 0x17d   : > { %p9_p4 = scmp.ge.s32.totalorder %s12_s9, 4  }
 0x17f   :  { %11 = sbr.rel (!%p9_p4) target bundleno = 1 (0x1), region = 58 }

</bundles_post_ra>
